<compile_context>
chip_gen: v7x
topology: tpu7x:2x2x1
jax: 0.10.0
libtpu: 0.0.40
codegen_flags: <defaults>
</compile_context>

<pallas_src>
import functools

import jax
import jax.numpy as jnp
from jax import lax
from jax.experimental import pallas as pl
from jax.experimental.pallas import tpu as pltpu

# ----------------------------- small synthetic config -----------------------------
VISION = dict(image_size=16, patch_size=4, num_channels=3, hidden_size=32,
              intermediate_size=64, num_heads=4, num_layers=2, layer_norm_eps=1e-6)
TEXT = dict(hidden_size=32, intermediate_size=64, num_heads=4, num_kv_heads=4,
            head_dim=8, num_layers=2, rms_norm_eps=1e-6, rope_theta=10000.0,
            vocab_size=256)
PROJECTION_DIM = TEXT['hidden_size']
IMAGE_TOKEN_INDEX = 255
PAD_TOKEN_ID = 0
NUM_IMAGE_TOKENS = (VISION['image_size'] // VISION['patch_size']) ** 2  # 16

assert TEXT['num_heads'] % TEXT['num_kv_heads'] == 0, "GQA requires num_kv_heads | num_heads"

_VMEM_LIMIT = 48 * 1024 * 1024   # under v7x's 64 MiB physical, above the 32 MiB default


def _cparams(*sems):
    return pltpu.CompilerParams(dimension_semantics=tuple(sems),
                                vmem_limit_bytes=_VMEM_LIMIT)


# ----------------------------------- helpers ---------------------------------------
def _gelu_tanh(x):
    return 0.5 * x * (1.0 + jnp.tanh(0.7978845608028654 * (x + 0.044715 * x * x * x)))


def _col_tile(n):
    """Lane-dense column tile: 256 fills v6e/v7x MXU, 128 fallback, else full width."""
    for tn in (256, 128):
        if n % tn == 0:
            return tn
    return n


def _row_tile(rows, prefer_split):
    """Largest row tile (mult of 8) dividing rows; force >=2 steps only when asked."""
    cands = (512, 256, 128, 64, 32, 16, 8)
    if prefer_split:
        for tm in cands:
            if rows % tm == 0 and rows // tm >= 2:
                return tm
    for tm in cands:
        if rows % tm == 0:
            return tm
    return rows


# --------------------------- fused norm->matmul->epilogue ---------------------------
def _make_fused_kernel(has_norm, norm_kind, has_bias, has_resid, epilogue, eps):
    def kernel(*refs):
        refs = list(refs)
        x_ref = refs.pop(0)
        if has_norm:
            x = x_ref[...].astype(jnp.float32)
            if norm_kind == 'rms':                      # Gemma RMSNorm: x/rms * (1 + w)
                nw_ref = refs.pop(0)
                var = jnp.mean(x * x, axis=-1, keepdims=True)
                x = x * lax.rsqrt(var + eps) * (1.0 + nw_ref[...].astype(jnp.float32))
            else:                                       # LayerNorm
                nw_ref = refs.pop(0)
                nb_ref = refs.pop(0)
                mu = jnp.mean(x, axis=-1, keepdims=True)
                var = jnp.mean((x - mu) * (x - mu), axis=-1, keepdims=True)
                x = ((x - mu) * lax.rsqrt(var + eps) * nw_ref[...].astype(jnp.float32)
                     + nb_ref[...].astype(jnp.float32))
            xb = x.astype(jnp.bfloat16)
        else:
            xb = x_ref[...].astype(jnp.bfloat16)

        w_ref = refs.pop(0)
        wu_ref = refs.pop(0) if epilogue == 'geglu' else None
        b_ref = refs.pop(0) if has_bias else None
        bu_ref = refs.pop(0) if (has_bias and epilogue == 'geglu') else None

        acc = jnp.dot(xb, w_ref[...], preferred_element_type=jnp.float32)
        if has_bias:
            acc = acc + b_ref[...].astype(jnp.float32)
        if epilogue == 'gelu':
            acc = _gelu_tanh(acc)
        elif epilogue == 'geglu':
            acc_u = jnp.dot(xb, wu_ref[...], preferred_element_type=jnp.float32)
            if has_bias:
                acc_u = acc_u + bu_ref[...].astype(jnp.float32)
            acc = _gelu_tanh(acc) * acc_u
        if has_resid:
            r_ref = refs.pop(0)
            acc = acc + r_ref[...].astype(jnp.float32)
        o_ref = refs.pop(0)
        o_ref[...] = acc.astype(o_ref.dtype)
    return kernel


def fused_matmul(x, w, *, w_up=None, norm=None, bias=None, bias_up=None,
                 residual=None, epilogue='none', out_dtype=jnp.bfloat16):
    """y = epilogue(norm(x) @ w [+ bias]) [+ residual] over flattened rows.

    x: [..., K] f32/bf16; w: [K, N] bf16; bias: [N] f32; residual: [..., N] bf16/f32.
    norm: None | ('rms', weight, eps) | ('ln', weight, bias, eps).
    epilogue: 'none' | 'gelu' | 'geglu' (geglu: w = gate [K, N], w_up = up [K, N]).
    Grid is (N_tiles, R_tiles) with rows innermost -> each weight tile is DMA'd once.
    """
    lead, K = x.shape[:-1], x.shape[-1]
    x2 = x.reshape(-1, K)
    R = x2.shape[0]
    N = w.shape[-1]

    tn = _col_tile(N)
    n_col = N // tn
    # Only force a >=2-step row split when the column axis doesn't already parallelize.
    tm = _row_tile(R, prefer_split=(n_col < 2))
    # TODO(synk): at real model scale also cap tm/tn so the double-buffered working set
    # (x tile + gate/up weight tiles + out/residual tiles) stays ~16-20 MiB for v7x.
    grid = (n_col, R // tm)

    inputs = [x2]
    in_specs = [pl.BlockSpec((tm, K), lambda j, i: (i, 0))]

    has_norm = norm is not None
    norm_kind = None
    eps = 0.0
    if has_norm:
        norm_kind = norm[0]
        if norm_kind == 'rms':
            _, nw, eps = norm
            inputs.append(nw.reshape(1, K))
            in_specs.append(pl.BlockSpec((1, K), lambda j, i: (0, 0)))
        else:
            _, nw, nb, eps = norm
            inputs += [nw.reshape(1, K), nb.reshape(1, K)]
            in_specs += [pl.BlockSpec((1, K), lambda j, i: (0, 0)),
                         pl.BlockSpec((1, K), lambda j, i: (0, 0))]

    inputs.append(w)
    in_specs.append(pl.BlockSpec((K, tn), lambda j, i: (0, j)))
    if epilogue == 'geglu':
        inputs.append(w_up)
        in_specs.append(pl.BlockSpec((K, tn), lambda j, i: (0, j)))

    has_bias = bias is not None
    if has_bias:
        inputs.append(bias.reshape(1, N))
        in_specs.append(pl.BlockSpec((1, tn), lambda j, i: (0, j)))
        if epilogue == 'geglu':
            inputs.append(bias_up.reshape(1, N))
            in_specs.append(pl.BlockSpec((1, tn), lambda j, i: (0, j)))

    has_resid = residual is not None
    if has_resid:
        inputs.append(residual.reshape(-1, N))
        in_specs.append(pl.BlockSpec((tm, tn), lambda j, i: (i, j)))

    kernel = _make_fused_kernel(has_norm, norm_kind, has_bias, has_resid, epilogue, eps)
    out = pl.pallas_call(
        kernel,
        out_shape=jax.ShapeDtypeStruct((R, N), out_dtype),
        grid=grid,
        in_specs=in_specs,
        out_specs=pl.BlockSpec((tm, tn), lambda j, i: (i, j)),
        compiler_params=_cparams("parallel", "parallel"),
    )(*inputs)
    return out.reshape(*lead, N)


# ------------------------------- patch embedding ------------------------------------
def _patch_embed_kernel(x_ref, w_ref, b_ref, pos_ref, o_ref):
    x = x_ref[0].astype(jnp.bfloat16)                   # [Np, C*p*p]
    acc = jnp.dot(x, w_ref[...], preferred_element_type=jnp.float32)
    o_ref[0] = (acc + b_ref[...].astype(jnp.float32)
                + pos_ref[...].astype(jnp.float32)).astype(o_ref.dtype)


def patch_embed(patches, w, b, pos):
    """patches: [B, Np, C*p*p] -> conv-as-matmul + bias + position embedding (fused)."""
    B, Np, K = patches.shape
    Dv = w.shape[-1]
    return pl.pallas_call(
        _patch_embed_kernel,
        out_shape=jax.ShapeDtypeStruct((B, Np, Dv), jnp.bfloat16),
        grid=(B,),
        in_specs=[
            pl.BlockSpec((1, Np, K), lambda b: (b, 0, 0)),
            pl.BlockSpec((K, Dv), lambda b: (0, 0)),
            pl.BlockSpec((1, Dv), lambda b: (0, 0)),
            pl.BlockSpec((Np, Dv), lambda b: (0, 0)),
        ],
        out_specs=pl.BlockSpec((1, Np, Dv), lambda b: (b, 0, 0)),
        compiler_params=_cparams("parallel"),
    )(patches, w, b.reshape(1, Dv), pos)


# --------------------------------- attention kernels --------------------------------
# Prefill path: the reference builds an all-zero (non-causal) mask for the unpadded
# prompt, so no mask is materialized or DMA'd here and q-row tiles attend to all KV.
# TODO(synk): decode path with kv_cache, and flash-style KV tiling (online softmax with
# m/l/acc scratch) for long prefill sequences on v7x.

def _mha_core(qh, kh, vh, scale):
    """qh: [H, Tq, Dh], kh/vh: [H, S, Dh] -> [H, Tq, Dh] f32 (head-batched matmuls)."""
    s = jnp.einsum('hqd,hkd->hqk', qh.astype(jnp.bfloat16), kh.astype(jnp.bfloat16),
                   preferred_element_type=jnp.float32) * scale
    m = jnp.max(s, axis=-1, keepdims=True)
    p = jnp.exp(s - m)
    p = p / jnp.sum(p, axis=-1, keepdims=True)          # exact division for parity
    return jnp.einsum('hqk,hkd->hqd', p.astype(jnp.bfloat16), vh.astype(jnp.bfloat16),
                      preferred_element_type=jnp.float32)


def _vision_attn_kernel(q_ref, kv_ref, o_ref, *, num_heads, head_dim, scale):
    hd = num_heads * head_dim
    q_slab = q_ref[0]                                   # [Tq, 3*H*Dh]
    kv_slab = kv_ref[0]                                 # [S,  3*H*Dh]
    qh = jnp.stack([q_slab[:, h * head_dim:(h + 1) * head_dim]
                    for h in range(num_heads)], axis=0)
    kh = jnp.stack([kv_slab[:, hd + h * head_dim: hd + (h + 1) * head_dim]
                    for h in range(num_heads)], axis=0)
    vh = jnp.stack([kv_slab[:, 2 * hd + h * head_dim: 2 * hd + (h + 1) * head_dim]
                    for h in range(num_heads)], axis=0)
    o = _mha_core(qh, kh, vh, scale)                    # [H, Tq, Dh]
    o_ref[0] = jnp.concatenate([o[h] for h in range(num_heads)],
                               axis=-1).astype(o_ref.dtype)


def vision_attention(qkv, num_heads, head_dim):
    B, S, QKVD = qkv.shape
    hd = num_heads * head_dim
    nq = 2 if S % 16 == 0 else 1                        # q-row tiles -> more parallel steps
    tq = S // nq
    return pl.pallas_call(
        functools.partial(_vision_attn_kernel, num_heads=num_heads,
                          head_dim=head_dim, scale=head_dim ** -0.5),
        out_shape=jax.ShapeDtypeStruct((B, S, hd), jnp.bfloat16),
        grid=(B, nq),
        in_specs=[pl.BlockSpec((1, tq, QKVD), lambda b, qi: (b, qi, 0)),   # q rows
                  pl.BlockSpec((1, S, QKVD), lambda b, qi: (b, 0, 0))],    # full K/V
        out_specs=pl.BlockSpec((1, tq, hd), lambda b, qi: (b, qi, 0)),
        compiler_params=_cparams("parallel", "parallel"),
    )(qkv, qkv)


def _text_attn_kernel(q_ref, kv_ref, cq_ref, sq_ref, ck_ref, sk_ref, o_ref, *,
                      num_heads, num_kv, head_dim, scale):
    hd = num_heads * head_dim
    kvd = num_kv * head_dim
    g = num_heads // num_kv
    half = head_dim // 2
    q_slab = q_ref[0]                                   # [Tq, (H + 2*KV)*Dh]
    kv_slab = kv_ref[0]                                 # [S,  (H + 2*KV)*Dh]
    S = kv_slab.shape[0]

    def rope(xh, cos, sin):                             # xh [Hn, T, Dh] f32; cos/sin [T, Dh]
        c = cos[None]
        s = sin[None]
        x1 = xh[..., :half]
        x2 = xh[..., half:]
        rot = jnp.concatenate([-x2, x1], axis=-1)
        # TODO(synk): pltpu.roll(xh, half, axis=-1) * sign-mask at real head_dim (>=128)
        # moves the rotate onto the XLU slot.
        return xh * c + rot * s

    qh = jnp.stack([q_slab[:, h * head_dim:(h + 1) * head_dim]
                    for h in range(num_heads)], axis=0).astype(jnp.float32)
    kh = jnp.stack([kv_slab[:, hd + c * head_dim: hd + (c + 1) * head_dim]
                    for c in range(num_kv)], axis=0).astype(jnp.float32)
    vh = jnp.stack([kv_slab[:, hd + kvd + c * head_dim: hd + kvd + (c + 1) * head_dim]
                    for c in range(num_kv)], axis=0)

    qh = rope(qh, cq_ref[0].astype(jnp.float32), sq_ref[0].astype(jnp.float32))
    kh = rope(kh, ck_ref[0].astype(jnp.float32), sk_ref[0].astype(jnp.float32))  # once / KV head
    if g > 1:   # GQA: expand shared KV heads across their query group (rope(k) not recomputed)
        kh = jnp.broadcast_to(kh[:, None], (num_kv, g, S, head_dim)
                              ).reshape(num_heads, S, head_dim)
        vh = jnp.broadcast_to(vh[:, None], (num_kv, g, S, head_dim)
                              ).reshape(num_heads, S, head_dim)

    o = _mha_core(qh, kh, vh, scale)                    # [H, Tq, Dh]
    o_ref[0] = jnp.concatenate([o[h] for h in range(num_heads)],
                               axis=-1).astype(o_ref.dtype)


def text_attention(qkv, cos, sin, num_heads, num_kv, head_dim):
    B, S, QKVD = qkv.shape
    hd = num_heads * head_dim
    nq = 2 if S % 16 == 0 else 1
    tq = S // nq
    return pl.pallas_call(
        functools.partial(_text_attn_kernel, num_heads=num_heads, num_kv=num_kv,
                          head_dim=head_dim, scale=head_dim ** -0.5),
        out_shape=jax.ShapeDtypeStruct((B, S, hd), jnp.bfloat16),
        grid=(B, nq),
        in_specs=[pl.BlockSpec((1, tq, QKVD), lambda b, qi: (b, qi, 0)),     # q rows
                  pl.BlockSpec((1, S, QKVD), lambda b, qi: (b, 0, 0)),       # full K/V
                  pl.BlockSpec((1, tq, head_dim), lambda b, qi: (b, qi, 0)),  # cos (q rows)
                  pl.BlockSpec((1, tq, head_dim), lambda b, qi: (b, qi, 0)),  # sin (q rows)
                  pl.BlockSpec((1, S, head_dim), lambda b, qi: (b, 0, 0)),    # cos (all k)
                  pl.BlockSpec((1, S, head_dim), lambda b, qi: (b, 0, 0))],   # sin (all k)
        out_specs=pl.BlockSpec((1, tq, hd), lambda b, qi: (b, qi, 0)),
        compiler_params=_cparams("parallel", "parallel"),
    )(qkv, qkv, cos, sin, cos, sin)


# ----------------------------- image/text embedding merge ---------------------------
def _merge_kernel(ids_ref, txt_ref, img_ref, o_ref, *,
                  image_tok, pad_tok, inv_scale, scale):
    ids = ids_ref[0]                                    # [S, 1] int32
    txt = txt_ref[0].astype(jnp.float32)                # [S, D]
    img = img_ref[0].astype(jnp.float32)                # [Np, D]
    S, D = txt.shape
    Np = img.shape[0]
    # Image tokens occupy the contiguous prefix of the prompt.
    # TODO(synk): general masked_scatter for non-contiguous image-token placement.
    img_full = jnp.concatenate(
        [img * inv_scale, jnp.zeros((S - Np, D), jnp.float32)], axis=0)
    is_img = ids == image_tok
    is_pad = ids == pad_tok
    is_txt = jnp.logical_and(jnp.logical_not(is_img), jnp.logical_not(is_pad))
    out = jnp.where(is_txt, txt, 0.0)
    out = jnp.where(is_img, img_full, out)
    out = jnp.where(is_pad, 0.0, out)
    o_ref[0] = (out * scale).astype(o_ref.dtype)        # Gemma sqrt(D) embed normalizer


def merge_embeddings(input_ids, text_embeds, image_feats, hidden_scale):
    B, S, D = text_embeds.shape
    Np = image_feats.shape[1]
    ids3 = input_ids.reshape(B, S, 1).astype(jnp.int32)
    return pl.pallas_call(
        functools.partial(_merge_kernel, image_tok=IMAGE_TOKEN_INDEX,
                          pad_tok=PAD_TOKEN_ID,
                          inv_scale=1.0 / hidden_scale, scale=hidden_scale),
        out_shape=jax.ShapeDtypeStruct((B, S, D), jnp.bfloat16),
        grid=(B,),
        in_specs=[pl.BlockSpec((1, S, 1), lambda b: (b, 0, 0)),
                  pl.BlockSpec((1, S, D), lambda b: (b, 0, 0)),
                  pl.BlockSpec((1, Np, D), lambda b: (b, 0, 0))],
        out_specs=pl.BlockSpec((1, S, D), lambda b: (b, 0, 0)),
        compiler_params=_cparams("parallel"),
    )(ids3, text_embeds, image_feats)


# ---------------------------------- JAX glue ----------------------------------------
def im2col_patches(pixel_values, patch):
    """NCHW -> [B, num_patches, C*p*p], matching Conv2d(k=p, stride=p) + flatten(2).T."""
    B, C, H, W = pixel_values.shape
    x = pixel_values.reshape(B, C, H // patch, patch, W // patch, patch)
    x = x.transpose(0, 2, 4, 1, 3, 5)                   # [B, H/p, W/p, C, p, p]
    return x.reshape(B, (H // patch) * (W // patch), C * patch * patch)


def rope_cos_sin(position_ids, dim, base):
    inv_freq = 1.0 / (base ** (jnp.arange(0, dim, 2, dtype=jnp.float32) / dim))
    freqs = position_ids.astype(jnp.float32)[..., None] * inv_freq[None, None, :]
    emb = jnp.concatenate([freqs, freqs], axis=-1)      # [B, S, dim]
    return jnp.cos(emb), jnp.sin(emb)


# --------------------------------- model forward ------------------------------------
def siglip_vision_tower(p, pixel_values):
    H = VISION['num_heads']
    Dh = VISION['hidden_size'] // H
    eps = VISION['layer_norm_eps']
    patches = im2col_patches(pixel_values, VISION['patch_size'])
    x = patch_embed(patches, p['v_patch_w'], p['v_patch_b'], p['v_pos'])      # bf16
    for lp in p['v_layers']:
        # LayerNorm1 fused with the single (concatenated) QKV projection.
        qkv = fused_matmul(x, lp['qkv_w'],
                           norm=('ln', lp['ln1_w'], lp['ln1_b'], eps), bias=lp['qkv_b'])
        attn = vision_attention(qkv, H, Dh)
        x = fused_matmul(attn, lp['o_w'], bias=lp['o_b'], residual=x)
        # LayerNorm2 + fc1 + bias + GELU fused.
        h = fused_matmul(x, lp['fc1_w'],
                         norm=('ln', lp['ln2_w'], lp['ln2_b'], eps),
                         bias=lp['fc1_b'], epilogue='gelu')
        x = fused_matmul(h, lp['fc2_w'], bias=lp['fc2_b'], residual=x)
    # Post-LayerNorm fused with the multi-modal projector linear.
    return fused_matmul(x, p['proj_w'],
                        norm=('ln', p['v_post_ln_w'], p['v_post_ln_b'], eps),
                        bias=p['proj_b'])


def gemma_lm(p, hidden, position_ids):
    H, KV, Dh = TEXT['num_heads'], TEXT['num_kv_heads'], TEXT['head_dim']
    eps = TEXT['rms_norm_eps']
    cos, sin = rope_cos_sin(position_ids, Dh, TEXT['rope_theta'])    # [B, S, Dh] f32
    h = hidden                     # sqrt(D) embedding normalizer folded into merge kernel
    for lp in p['t_layers']:
        qkv = fused_matmul(h, lp['qkv_w'], norm=('rms', lp['in_norm'], eps))
        attn = text_attention(qkv, cos, sin, H, KV, Dh)
        h = fused_matmul(attn, lp['o_w'], residual=h)
        mlp = fused_matmul(h, lp['gate_w'], w_up=lp['up_w'],
                           norm=('rms', lp['post_norm'], eps), epilogue='geglu')
        h = fused_matmul(mlp, lp['down_w'], residual=h)
    # Final RMSNorm fused with the tied lm_head (persistent [D, V] bf16 copy of embed.T).
    return fused_matmul(h, p['lm_head_w'], norm=('rms', p['final_norm'], eps),
                        out_dtype=jnp.float32)


def paligemma_forward(p, input_ids, pixel_values, attention_mask):
    # reference asserts attention_mask is all ones (unpadded prefill)
    Dt = TEXT['hidden_size']
    inputs_embeds = jnp.take(p['embed'], input_ids, axis=0)          # [B, S, Dt] f32
    img = siglip_vision_tower(p, pixel_values)                       # [B, Np, Dt] bf16
    position_ids = jnp.where(attention_mask == 0, 1,
                             jnp.cumsum(attention_mask, axis=-1))
    merged = merge_embeddings(input_ids, inputs_embeds, img, Dt ** 0.5)
    return gemma_lm(p, merged, position_ids)


# ---------------------------------- parameters ---------------------------------------
def init_params(key):
    keys = iter(jax.random.split(key, 256))

    def nrm(shape, scale=0.02):
        return scale * jax.random.normal(next(keys), shape, jnp.float32)

    Dv, Iv = VISION['hidden_size'], VISION['intermediate_size']
    C, P = VISION['num_channels'], VISION['patch_size']
    Dt, It = TEXT['hidden_size'], TEXT['intermediate_size']
    H, Dh, KV = TEXT['num_heads'], TEXT['head_dim'], TEXT['num_kv_heads']

    embed = nrm((TEXT['vocab_size'], Dt))
    p = {
        'v_patch_w': nrm((C * P * P, Dv)).astype(jnp.bfloat16),
        'v_patch_b': jnp.zeros((Dv,), jnp.float32),
        'v_pos': nrm((NUM_IMAGE_TOKENS, Dv)),
        'v_post_ln_w': jnp.ones((Dv,), jnp.float32),
        'v_post_ln_b': jnp.zeros((Dv,), jnp.float32),
        'proj_w': nrm((Dv, PROJECTION_DIM)).astype(jnp.bfloat16),
        'proj_b': jnp.zeros((PROJECTION_DIM,), jnp.float32),
        'embed': embed,
        'lm_head_w': embed.T.astype(jnp.bfloat16),   # persistent transposed tied weight
        'final_norm': jnp.zeros((Dt,), jnp.float32),
        'v_layers': [], 't_layers': [],
    }
    for _ in range(VISION['num_layers']):
        qw, kw, vw = nrm((Dv, Dv)), nrm((Dv, Dv)), nrm((Dv, Dv))
        p['v_layers'].append(dict(
            ln1_w=jnp.ones((Dv,), jnp.float32), ln1_b=jnp.zeros((Dv,), jnp.float32),
            qkv_w=jnp.concatenate([qw, kw, vw], axis=1).astype(jnp.bfloat16),
            qkv_b=jnp.zeros((3 * Dv,), jnp.float32),
            o_w=nrm((Dv, Dv)).astype(jnp.bfloat16), o_b=jnp.zeros((Dv,), jnp.float32),
            ln2_w=jnp.ones((Dv,), jnp.float32), ln2_b=jnp.zeros((Dv,), jnp.float32),
            fc1_w=nrm((Dv, Iv)).astype(jnp.bfloat16), fc1_b=jnp.zeros((Iv,), jnp.float32),
            fc2_w=nrm((Iv, Dv)).astype(jnp.bfloat16), fc2_b=jnp.zeros((Dv,), jnp.float32),
        ))
    for _ in range(TEXT['num_layers']):
        qw, kw, vw = nrm((Dt, H * Dh)), nrm((Dt, KV * Dh)), nrm((Dt, KV * Dh))
        p['t_layers'].append(dict(
            in_norm=jnp.zeros((Dt,), jnp.float32),
            qkv_w=jnp.concatenate([qw, kw, vw], axis=1).astype(jnp.bfloat16),
            o_w=nrm((H * Dh, Dt)).astype(jnp.bfloat16),
            post_norm=jnp.zeros((Dt,), jnp.float32),
            gate_w=nrm((Dt, It)).astype(jnp.bfloat16),   # separate gate / up so the
            up_w=nrm((Dt, It)).astype(jnp.bfloat16),     # intermediate dim can be tiled
            down_w=nrm((It, Dt)).astype(jnp.bfloat16),
        ))
    return p


# -------------------------------------- main -----------------------------------------
if __name__ == "__main__":
    key = jax.random.PRNGKey(0)
    kp, ki, kx = jax.random.split(key, 3)
    params = init_params(kp)

    B = 2
    S = NUM_IMAGE_TOKENS + 16  # 16 image tokens + 16 text tokens = 32
    text_ids = jax.random.randint(ki, (B, S - NUM_IMAGE_TOKENS), 1, 200, dtype=jnp.int32)
    image_ids = jnp.full((B, NUM_IMAGE_TOKENS), IMAGE_TOKEN_INDEX, jnp.int32)
    input_ids = jnp.concatenate([image_ids, text_ids], axis=1)          # [2, 32]
    pixel_values = jax.random.normal(
        kx, (B, VISION['num_channels'], VISION['image_size'], VISION['image_size']),
        jnp.float32)                                                     # [2, 3, 16, 16] NCHW
    attention_mask = jnp.ones((B, S), jnp.int32)

    fwd = jax.jit(paligemma_forward)
    logits = fwd(params, input_ids, pixel_values, attention_mask)
    jax.block_until_ready(logits)

    assert logits.shape == (B, S, TEXT['vocab_size']), logits.shape
    assert bool(jnp.all(jnp.isfinite(logits)))
    print("KERNEL_OK")
</pallas_src>

<mosaic_0001>
module attributes {stable_mosaic.version = 11 : i64} {
  func.func @kernel(%arg0: i32, %arg1: i32, %arg2: memref<16x32xbf16, #tpu.memory_space<vmem>>, %arg3: memref<1x32xf32, #tpu.memory_space<vmem>>, %arg4: memref<1x32xf32, #tpu.memory_space<vmem>>, %arg5: memref<32x96xbf16, #tpu.memory_space<vmem>>, %arg6: memref<1x96xf32, #tpu.memory_space<vmem>>, %arg7: memref<16x96xbf16, #tpu.memory_space<vmem>>) attributes {dimension_semantics = [#tpu.dimension_semantics<parallel>, #tpu.dimension_semantics<parallel>], iteration_bounds = array<i64: 1, 2>, scalar_prefetch = 0 : i64, scratch_operands = 0 : i64, tpu.core_type = #tpu.core_type<tc>, window_params = [{transform_indices = @transform_0, window_bounds = array<i64: 16, 32>}, {pipeline_mode = #tpu.pipeline_mode<synchronous>, transform_indices = @transform_1, window_bounds = array<i64: 1, 32>}, {pipeline_mode = #tpu.pipeline_mode<synchronous>, transform_indices = @transform_2, window_bounds = array<i64: 1, 32>}, {transform_indices = @transform_3, window_bounds = array<i64: 32, 96>}, {transform_indices = @transform_4, window_bounds = array<i64: 1, 96>}, {transform_indices = @transform_5, window_bounds = array<i64: 16, 96>}]} {
    %c0 = arith.constant 0 : index
    %c0_0 = arith.constant 0 : index
    %0 = vector.load %arg2[%c0, %c0_0] : memref<16x32xbf16, #tpu.memory_space<vmem>>, vector<16x32xbf16>
    %1 = arith.extf %0 : vector<16x32xbf16> to vector<16x32xf32>
    %cst = arith.constant dense<0.000000e+00> : vector<16xf32>
    %2 = vector.multi_reduction <add>, %1, %cst [1] : vector<16x32xf32> to vector<16xf32>
    %3 = vector.shape_cast %2 : vector<16xf32> to vector<16x1xf32>
    %cst_1 = arith.constant 3.200000e+01 : f32
    %4 = vector.broadcast %cst_1 : f32 to vector<16x1xf32>
    %5 = arith.divf %3, %4 : vector<16x1xf32>
    %6 = vector.broadcast %5 : vector<16x1xf32> to vector<16x32xf32>
    %7 = arith.subf %1, %6 : vector<16x32xf32>
    %8 = vector.broadcast %5 : vector<16x1xf32> to vector<16x32xf32>
    %9 = arith.subf %1, %8 : vector<16x32xf32>
    %10 = arith.mulf %7, %9 : vector<16x32xf32>
    %cst_2 = arith.constant dense<0.000000e+00> : vector<16xf32>
    %11 = vector.multi_reduction <add>, %10, %cst_2 [1] : vector<16x32xf32> to vector<16xf32>
    %12 = vector.shape_cast %11 : vector<16xf32> to vector<16x1xf32>
    %cst_3 = arith.constant 3.200000e+01 : f32
    %13 = vector.broadcast %cst_3 : f32 to vector<16x1xf32>
    %14 = arith.divf %12, %13 : vector<16x1xf32>
    %15 = vector.broadcast %5 : vector<16x1xf32> to vector<16x32xf32>
    %16 = arith.subf %1, %15 : vector<16x32xf32>
    %cst_4 = arith.constant 9.99999997E-7 : f32
    %17 = vector.broadcast %cst_4 : f32 to vector<16x1xf32>
    %18 = arith.addf %14, %17 : vector<16x1xf32>
    %19 = math.rsqrt %18 : vector<16x1xf32>
    %20 = vector.broadcast %19 : vector<16x1xf32> to vector<16x32xf32>
    %21 = arith.mulf %16, %20 : vector<16x32xf32>
    %c0_5 = arith.constant 0 : index
    %c0_6 = arith.constant 0 : index
    %22 = vector.load %arg3[%c0_5, %c0_6] : memref<1x32xf32, #tpu.memory_space<vmem>>, vector<1x32xf32>
    %23 = vector.broadcast %22 : vector<1x32xf32> to vector<16x32xf32>
    %24 = arith.mulf %21, %23 : vector<16x32xf32>
    %c0_7 = arith.constant 0 : index
    %c0_8 = arith.constant 0 : index
    %25 = vector.load %arg4[%c0_7, %c0_8] : memref<1x32xf32, #tpu.memory_space<vmem>>, vector<1x32xf32>
    %26 = vector.broadcast %25 : vector<1x32xf32> to vector<16x32xf32>
    %27 = arith.addf %24, %26 : vector<16x32xf32>
    %28 = arith.truncf %27 : vector<16x32xf32> to vector<16x32xbf16>
    %c0_9 = arith.constant 0 : index
    %c0_10 = arith.constant 0 : index
    %29 = vector.load %arg5[%c0_9, %c0_10] : memref<32x96xbf16, #tpu.memory_space<vmem>>, vector<32x96xbf16>
    %cst_11 = arith.constant dense<0.000000e+00> : vector<16x96xf32>
    %30 = tpu.matmul %28, %29, %cst_11 {dimension_numbers = #tpu.dot_dimension_numbers<[1], [0], [0], [1], [0, 0, 1, 1], [], []>} : vector<16x32xbf16>, vector<32x96xbf16>, vector<16x96xf32> -> vector<16x96xf32>
    %c0_12 = arith.constant 0 : index
    %c0_13 = arith.constant 0 : index
    %31 = vector.load %arg6[%c0_12, %c0_13] : memref<1x96xf32, #tpu.memory_space<vmem>>, vector<1x96xf32>
    %32 = vector.broadcast %31 : vector<1x96xf32> to vector<16x96xf32>
    %33 = arith.addf %30, %32 : vector<16x96xf32>
    %34 = arith.truncf %33 : vector<16x96xf32> to vector<16x96xbf16>
    %c0_14 = arith.constant 0 : index
    %c0_15 = arith.constant 0 : index
    %35 = vector.load %arg7[%c0_14, %c0_15] : memref<16x96xbf16, #tpu.memory_space<vmem>>, vector<16x96xbf16>
    tpu.vector_store %arg7[%c0_14, %c0_15], %34 {strides = array<i32>} : memref<16x96xbf16, #tpu.memory_space<vmem>>, vector<16x96xbf16>,
    return
  }
  func.func @transform_0(%arg0: i32, %arg1: i32) -> (i32, i32) {
    %c0_i32 = arith.constant 0 : i32
    %c0_i32_0 = arith.constant 0 : i32
    return %arg1, %c0_i32 : i32, i32
  }
  func.func @transform_1(%arg0: i32, %arg1: i32) -> (i32, i32) {
    %c0_i32 = arith.constant 0 : i32
    %c0_i32_0 = arith.constant 0 : i32
    %c0_i32_1 = arith.constant 0 : i32
    return %c0_i32, %c0_i32_0 : i32, i32
  }
  func.func @transform_2(%arg0: i32, %arg1: i32) -> (i32, i32) {
    %c0_i32 = arith.constant 0 : i32
    %c0_i32_0 = arith.constant 0 : i32
    %c0_i32_1 = arith.constant 0 : i32
    return %c0_i32, %c0_i32_0 : i32, i32
  }
  func.func @transform_3(%arg0: i32, %arg1: i32) -> (i32, i32) {
    %c0_i32 = arith.constant 0 : i32
    %c0_i32_0 = arith.constant 0 : i32
    return %c0_i32, %arg0 : i32, i32
  }
  func.func @transform_4(%arg0: i32, %arg1: i32) -> (i32, i32) {
    %c0_i32 = arith.constant 0 : i32
    %c0_i32_0 = arith.constant 0 : i32
    return %c0_i32, %arg0 : i32, i32
  }
  func.func @transform_5(%arg0: i32, %arg1: i32) -> (i32, i32) {
    %c0_i32 = arith.constant 0 : i32
    return %arg1, %arg0 : i32, i32
  }
}

module attributes {stable_mosaic.version = 11 : i64} {
  func.func @_patch_embed_kernel(%arg0: i32, %arg1: memref<1x16x48xf32, #tpu.memory_space<vmem>>, %arg2: memref<48x32xbf16, #tpu.memory_space<vmem>>, %arg3: memref<1x32xf32, #tpu.memory_space<vmem>>, %arg4: memref<16x32xf32, #tpu.memory_space<vmem>>, %arg5: memref<1x16x32xbf16, #tpu.memory_space<vmem>>) attributes {dimension_semantics = [#tpu.dimension_semantics<parallel>], iteration_bounds = array<i64: 2>, scalar_prefetch = 0 : i64, scratch_operands = 0 : i64, tpu.core_type = #tpu.core_type<tc>, window_params = [{transform_indices = @transform_0, window_bounds = array<i64: 1, 16, 48>}, {pipeline_mode = #tpu.pipeline_mode<synchronous>, transform_indices = @transform_1, window_bounds = array<i64: 48, 32>}, {pipeline_mode = #tpu.pipeline_mode<synchronous>, transform_indices = @transform_2, window_bounds = array<i64: 1, 32>}, {pipeline_mode = #tpu.pipeline_mode<synchronous>, transform_indices = @transform_3, window_bounds = array<i64: 16, 32>}, {transform_indices = @transform_4, window_bounds = array<i64: 1, 16, 32>}]} {
    %c0 = arith.constant 0 : index
    %c0_0 = arith.constant 0 : index
    %c0_1 = arith.constant 0 : index
    %0 = vector.load %arg1[%c0, %c0_0, %c0_1] : memref<1x16x48xf32, #tpu.memory_space<vmem>>, vector<1x16x48xf32>
    %1 = vector.shape_cast %0 : vector<1x16x48xf32> to vector<16x48xf32>
    %2 = arith.truncf %1 : vector<16x48xf32> to vector<16x48xbf16>
    %c0_2 = arith.constant 0 : index
    %c0_3 = arith.constant 0 : index
    %3 = vector.load %arg2[%c0_2, %c0_3] : memref<48x32xbf16, #tpu.memory_space<vmem>>, vector<48x32xbf16>
    %cst = arith.constant dense<0.000000e+00> : vector<16x32xf32>
    %4 = tpu.matmul %2, %3, %cst {dimension_numbers = #tpu.dot_dimension_numbers<[1], [0], [0], [1], [0, 0, 1, 1], [], []>} : vector<16x48xbf16>, vector<48x32xbf16>, vector<16x32xf32> -> vector<16x32xf32>
    %c0_4 = arith.constant 0 : index
    %c0_5 = arith.constant 0 : index
    %5 = vector.load %arg3[%c0_4, %c0_5] : memref<1x32xf32, #tpu.memory_space<vmem>>, vector<1x32xf32>
    %6 = vector.broadcast %5 : vector<1x32xf32> to vector<16x32xf32>
    %7 = arith.addf %4, %6 : vector<16x32xf32>
    %c0_6 = arith.constant 0 : index
    %c0_7 = arith.constant 0 : index
    %8 = vector.load %arg4[%c0_6, %c0_7] : memref<16x32xf32, #tpu.memory_space<vmem>>, vector<16x32xf32>
    %9 = arith.addf %7, %8 : vector<16x32xf32>
    %10 = arith.truncf %9 : vector<16x32xf32> to vector<16x32xbf16>
    %c0_8 = arith.constant 0 : index
    %c0_9 = arith.constant 0 : index
    %c0_10 = arith.constant 0 : index
    %11 = vector.load %arg5[%c0_8, %c0_9, %c0_10] : memref<1x16x32xbf16, #tpu.memory_space<vmem>>, vector<1x16x32xbf16>
    %12 = vector.shape_cast %11 : vector<1x16x32xbf16> to vector<16x32xbf16>
    %13 = vector.shape_cast %10 : vector<16x32xbf16> to vector<1x16x32xbf16>
    tpu.vector_store %arg5[%c0_8, %c0_9, %c0_10], %13 {strides = array<i32>} : memref<1x16x32xbf16, #tpu.memory_space<vmem>>, vector<1x16x32xbf16>,
    return
  }
  func.func @transform_0(%arg0: i32) -> (i32, i32, i32) {
    %c0_i32 = arith.constant 0 : i32
    %c0_i32_0 = arith.constant 0 : i32
    %c0_i32_1 = arith.constant 0 : i32
    return %arg0, %c0_i32, %c0_i32_0 : i32, i32, i32
  }
  func.func @transform_1(%arg0: i32) -> (i32, i32) {
    %c0_i32 = arith.constant 0 : i32
    %c0_i32_0 = arith.constant 0 : i32
    %c0_i32_1 = arith.constant 0 : i32
    return %c0_i32, %c0_i32_0 : i32, i32
  }
  func.func @transform_2(%arg0: i32) -> (i32, i32) {
    %c0_i32 = arith.constant 0 : i32
    %c0_i32_0 = arith.constant 0 : i32
    %c0_i32_1 = arith.constant 0 : i32
    return %c0_i32, %c0_i32_0 : i32, i32
  }
  func.func @transform_3(%arg0: i32) -> (i32, i32) {
    %c0_i32 = arith.constant 0 : i32
    %c0_i32_0 = arith.constant 0 : i32
    %c0_i32_1 = arith.constant 0 : i32
    return %c0_i32, %c0_i32_0 : i32, i32
  }
  func.func @transform_4(%arg0: i32) -> (i32, i32, i32) {
    %c0_i32 = arith.constant 0 : i32
    %c0_i32_0 = arith.constant 0 : i32
    %c0_i32_1 = arith.constant 0 : i32
    return %arg0, %c0_i32, %c0_i32_0 : i32, i32, i32
  }
}

module attributes {stable_mosaic.version = 11 : i64} {
  func.func @kernel(%arg0: i32, %arg1: i32, %arg2: memref<16x32xbf16, #tpu.memory_space<vmem>>, %arg3: memref<32x32xbf16, #tpu.memory_space<vmem>>, %arg4: memref<1x32xf32, #tpu.memory_space<vmem>>, %arg5: memref<16x32xbf16, #tpu.memory_space<vmem>>, %arg6: memref<16x32xbf16, #tpu.memory_space<vmem>>) attributes {dimension_semantics = [#tpu.dimension_semantics<parallel>, #tpu.dimension_semantics<parallel>], iteration_bounds = array<i64: 1, 2>, scalar_prefetch = 0 : i64, scratch_operands = 0 : i64, tpu.core_type = #tpu.core_type<tc>, window_params = [{transform_indices = @transform_0, window_bounds = array<i64: 16, 32>}, {transform_indices = @transform_1, window_bounds = array<i64: 32, 32>}, {transform_indices = @transform_2, window_bounds = array<i64: 1, 32>}, {transform_indices = @transform_3, window_bounds = array<i64: 16, 32>}, {transform_indices = @transform_4, window_bounds = array<i64: 16, 32>}]} {
    %c0 = arith.constant 0 : index
    %c0_0 = arith.constant 0 : index
    %0 = vector.load %arg2[%c0, %c0_0] : memref<16x32xbf16, #tpu.memory_space<vmem>>, vector<16x32xbf16>
    %c0_1 = arith.constant 0 : index
    %c0_2 = arith.constant 0 : index
    %1 = vector.load %arg3[%c0_1, %c0_2] : memref<32x32xbf16, #tpu.memory_space<vmem>>, vector<32x32xbf16>
    %cst = arith.constant dense<0.000000e+00> : vector<16x32xf32>
    %2 = tpu.matmul %0, %1, %cst {dimension_numbers = #tpu.dot_dimension_numbers<[1], [0], [0], [1], [0, 0, 1, 1], [], []>} : vector<16x32xbf16>, vector<32x32xbf16>, vector<16x32xf32> -> vector<16x32xf32>
    %c0_3 = arith.constant 0 : index
    %c0_4 = arith.constant 0 : index
    %3 = vector.load %arg4[%c0_3, %c0_4] : memref<1x32xf32, #tpu.memory_space<vmem>>, vector<1x32xf32>
    %4 = vector.broadcast %3 : vector<1x32xf32> to vector<16x32xf32>
    %5 = arith.addf %2, %4 : vector<16x32xf32>
    %c0_5 = arith.constant 0 : index
    %c0_6 = arith.constant 0 : index
    %6 = vector.load %arg5[%c0_5, %c0_6] : memref<16x32xbf16, #tpu.memory_space<vmem>>, vector<16x32xbf16>
    %7 = arith.extf %6 : vector<16x32xbf16> to vector<16x32xf32>
    %8 = arith.addf %5, %7 : vector<16x32xf32>
    %9 = arith.truncf %8 : vector<16x32xf32> to vector<16x32xbf16>
    %c0_7 = arith.constant 0 : index
    %c0_8 = arith.constant 0 : index
    %10 = vector.load %arg6[%c0_7, %c0_8] : memref<16x32xbf16, #tpu.memory_space<vmem>>, vector<16x32xbf16>
    tpu.vector_store %arg6[%c0_7, %c0_8], %9 {strides = array<i32>} : memref<16x32xbf16, #tpu.memory_space<vmem>>, vector<16x32xbf16>,
    return
  }
  func.func @transform_0(%arg0: i32, %arg1: i32) -> (i32, i32) {
    %c0_i32 = arith.constant 0 : i32
    %c0_i32_0 = arith.constant 0 : i32
    return %arg1, %c0_i32 : i32, i32
  }
  func.func @transform_1(%arg0: i32, %arg1: i32) -> (i32, i32) {
    %c0_i32 = arith.constant 0 : i32
    %c0_i32_0 = arith.constant 0 : i32
    return %c0_i32, %arg0 : i32, i32
  }
  func.func @transform_2(%arg0: i32, %arg1: i32) -> (i32, i32) {
    %c0_i32 = arith.constant 0 : i32
    %c0_i32_0 = arith.constant 0 : i32
    return %c0_i32, %arg0 : i32, i32
  }
  func.func @transform_3(%arg0: i32, %arg1: i32) -> (i32, i32) {
    %c0_i32 = arith.constant 0 : i32
    return %arg1, %arg0 : i32, i32
  }
  func.func @transform_4(%arg0: i32, %arg1: i32) -> (i32, i32) {
    %c0_i32 = arith.constant 0 : i32
    return %arg1, %arg0 : i32, i32
  }
}

module attributes {stable_mosaic.version = 11 : i64} {
  func.func @_vision_attn_kernel(%arg0: i32, %arg1: i32, %arg2: memref<1x8x96xbf16, #tpu.memory_space<vmem>>, %arg3: memref<1x16x96xbf16, #tpu.memory_space<vmem>>, %arg4: memref<1x8x32xbf16, #tpu.memory_space<vmem>>) attributes {dimension_semantics = [#tpu.dimension_semantics<parallel>, #tpu.dimension_semantics<parallel>], iteration_bounds = array<i64: 2, 2>, scalar_prefetch = 0 : i64, scratch_operands = 0 : i64, tpu.core_type = #tpu.core_type<tc>, window_params = [{transform_indices = @transform_0, window_bounds = array<i64: 1, 8, 96>}, {transform_indices = @transform_1, window_bounds = array<i64: 1, 16, 96>}, {transform_indices = @transform_2, window_bounds = array<i64: 1, 8, 32>}]} {
    %c0 = arith.constant 0 : index
    %c0_0 = arith.constant 0 : index
    %c0_1 = arith.constant 0 : index
    %0 = vector.load %arg2[%c0, %c0_0, %c0_1] : memref<1x8x96xbf16, #tpu.memory_space<vmem>>, vector<1x8x96xbf16>
    %1 = vector.shape_cast %0 : vector<1x8x96xbf16> to vector<8x96xbf16>
    %c0_2 = arith.constant 0 : index
    %c0_3 = arith.constant 0 : index
    %c0_4 = arith.constant 0 : index
    %2 = vector.load %arg3[%c0_2, %c0_3, %c0_4] : memref<1x16x96xbf16, #tpu.memory_space<vmem>>, vector<1x16x96xbf16>
    %3 = vector.shape_cast %2 : vector<1x16x96xbf16> to vector<16x96xbf16>
    %4 = vector.extract_strided_slice %1 {offsets = [0, 0], sizes = [8, 8], strides = [1, 1]} : vector<8x96xbf16> to vector<8x8xbf16>
    %5 = vector.extract_strided_slice %1 {offsets = [0, 8], sizes = [8, 8], strides = [1, 1]} : vector<8x96xbf16> to vector<8x8xbf16>
    %6 = vector.extract_strided_slice %1 {offsets = [0, 16], sizes = [8, 8], strides = [1, 1]} : vector<8x96xbf16> to vector<8x8xbf16>
    %7 = vector.extract_strided_slice %1 {offsets = [0, 24], sizes = [8, 8], strides = [1, 1]} : vector<8x96xbf16> to vector<8x8xbf16>
    %8 = vector.shape_cast %4 : vector<8x8xbf16> to vector<1x8x8xbf16>
    %9 = vector.shape_cast %5 : vector<8x8xbf16> to vector<1x8x8xbf16>
    %10 = vector.shape_cast %6 : vector<8x8xbf16> to vector<1x8x8xbf16>
    %11 = vector.shape_cast %7 : vector<8x8xbf16> to vector<1x8x8xbf16>
    %12 = tpu.concatenate %8, %9, %10, %11 in 0 : vector<1x8x8xbf16>, vector<1x8x8xbf16>, vector<1x8x8xbf16>, vector<1x8x8xbf16> -> vector<4x8x8xbf16>
    %13 = vector.extract_strided_slice %3 {offsets = [0, 32], sizes = [16, 8], strides = [1, 1]} : vector<16x96xbf16> to vector<16x8xbf16>
    %14 = vector.extract_strided_slice %3 {offsets = [0, 40], sizes = [16, 8], strides = [1, 1]} : vector<16x96xbf16> to vector<16x8xbf16>
    %15 = vector.extract_strided_slice %3 {offsets = [0, 48], sizes = [16, 8], strides = [1, 1]} : vector<16x96xbf16> to vector<16x8xbf16>
    %16 = vector.extract_strided_slice %3 {offsets = [0, 56], sizes = [16, 8], strides = [1, 1]} : vector<16x96xbf16> to vector<16x8xbf16>
    %17 = vector.shape_cast %13 : vector<16x8xbf16> to vector<1x16x8xbf16>
    %18 = vector.shape_cast %14 : vector<16x8xbf16> to vector<1x16x8xbf16>
    %19 = vector.shape_cast %15 : vector<16x8xbf16> to vector<1x16x8xbf16>
    %20 = vector.shape_cast %16 : vector<16x8xbf16> to vector<1x16x8xbf16>
    %21 = tpu.concatenate %17, %18, %19, %20 in 0 : vector<1x16x8xbf16>, vector<1x16x8xbf16>, vector<1x16x8xbf16>, vector<1x16x8xbf16> -> vector<4x16x8xbf16>
    %22 = vector.extract_strided_slice %3 {offsets = [0, 64], sizes = [16, 8], strides = [1, 1]} : vector<16x96xbf16> to vector<16x8xbf16>
    %23 = vector.extract_strided_slice %3 {offsets = [0, 72], sizes = [16, 8], strides = [1, 1]} : vector<16x96xbf16> to vector<16x8xbf16>
    %24 = vector.extract_strided_slice %3 {offsets = [0, 80], sizes = [16, 8], strides = [1, 1]} : vector<16x96xbf16> to vector<16x8xbf16>
    %25 = vector.extract_strided_slice %3 {offsets = [0, 88], sizes = [16, 8], strides = [1, 1]} : vector<16x96xbf16> to vector<16x8xbf16>
    %26 = vector.shape_cast %22 : vector<16x8xbf16> to vector<1x16x8xbf16>
    %27 = vector.shape_cast %23 : vector<16x8xbf16> to vector<1x16x8xbf16>
    %28 = vector.shape_cast %24 : vector<16x8xbf16> to vector<1x16x8xbf16>
    %29 = vector.shape_cast %25 : vector<16x8xbf16> to vector<1x16x8xbf16>
    %30 = tpu.concatenate %26, %27, %28, %29 in 0 : vector<1x16x8xbf16>, vector<1x16x8xbf16>, vector<1x16x8xbf16>, vector<1x16x8xbf16> -> vector<4x16x8xbf16>
    "tpu.trace_start"() <{level = 10 : i32, message = "hqd,hkd->hqk"}> : () -> ()
    %cst = arith.constant dense<0.000000e+00> : vector<4x8x16xf32>
    %31 = tpu.matmul %12, %21, %cst {dimension_numbers = #tpu.dot_dimension_numbers<[2], [2], [1], [1], [0, 0, 0, 1, 1, 1], [0], [0]>} : vector<4x8x8xbf16>, vector<4x16x8xbf16>, vector<4x8x16xf32> -> vector<4x8x16xf32>
    "tpu.trace_stop"() : () -> ()
    %cst_5 = arith.constant 0.353553385 : f32
    %32 = vector.broadcast %cst_5 : f32 to vector<4x8x16xf32>
    %33 = arith.mulf %31, %32 : vector<4x8x16xf32>
    %cst_6 = arith.constant dense<0xFF800000> : vector<4x8xf32>
    %34 = vector.multi_reduction <maximumf>, %33, %cst_6 [2] : vector<4x8x16xf32> to vector<4x8xf32>
    %35 = vector.shape_cast %34 : vector<4x8xf32> to vector<4x8x1xf32>
    %36 = vector.broadcast %35 : vector<4x8x1xf32> to vector<4x8x16xf32>
    %37 = arith.subf %33, %36 : vector<4x8x16xf32>
    %38 = math.exp %37 : vector<4x8x16xf32>
    %cst_7 = arith.constant dense<0.000000e+00> : vector<4x8xf32>
    %39 = vector.multi_reduction <add>, %38, %cst_7 [2] : vector<4x8x16xf32> to vector<4x8xf32>
    %40 = vector.shape_cast %39 : vector<4x8xf32> to vector<4x8x1xf32>
    %41 = vector.broadcast %40 : vector<4x8x1xf32> to vector<4x8x16xf32>
    %42 = arith.divf %38, %41 : vector<4x8x16xf32>
    %43 = arith.truncf %42 : vector<4x8x16xf32> to vector<4x8x16xbf16>
    "tpu.trace_start"() <{level = 10 : i32, message = "hqk,hkd->hqd"}> : () -> ()
    %cst_8 = arith.constant dense<0.000000e+00> : vector<4x8x8xf32>
    %44 = tpu.matmul %43, %30, %cst_8 {dimension_numbers = #tpu.dot_dimension_numbers<[2], [1], [1], [2], [0, 0, 0, 1, 1, 2], [0], [0]>} : vector<4x8x16xbf16>, vector<4x16x8xbf16>, vector<4x8x8xf32> -> vector<4x8x8xf32>
    "tpu.trace_stop"() : () -> ()
    %45 = vector.extract_strided_slice %44 {offsets = [0, 0, 0], sizes = [1, 8, 8], strides = [1, 1, 1]} : vector<4x8x8xf32> to vector<1x8x8xf32>
    %46 = vector.shape_cast %45 : vector<1x8x8xf32> to vector<8x8xf32>
    %47 = vector.extract_strided_slice %44 {offsets = [1, 0, 0], sizes = [1, 8, 8], strides = [1, 1, 1]} : vector<4x8x8xf32> to vector<1x8x8xf32>
    %48 = vector.shape_cast %47 : vector<1x8x8xf32> to vector<8x8xf32>
    %49 = vector.extract_strided_slice %44 {offsets = [2, 0, 0], sizes = [1, 8, 8], strides = [1, 1, 1]} : vector<4x8x8xf32> to vector<1x8x8xf32>
    %50 = vector.shape_cast %49 : vector<1x8x8xf32> to vector<8x8xf32>
    %51 = vector.extract_strided_slice %44 {offsets = [3, 0, 0], sizes = [1, 8, 8], strides = [1, 1, 1]} : vector<4x8x8xf32> to vector<1x8x8xf32>
    %52 = vector.shape_cast %51 : vector<1x8x8xf32> to vector<8x8xf32>
    %53 = tpu.concatenate %46, %48, %50, %52 in 1 : vector<8x8xf32>, vector<8x8xf32>, vector<8x8xf32>, vector<8x8xf32> -> vector<8x32xf32>
    %54 = arith.truncf %53 : vector<8x32xf32> to vector<8x32xbf16>
    %c0_9 = arith.constant 0 : index
    %c0_10 = arith.constant 0 : index
    %c0_11 = arith.constant 0 : index
    %55 = vector.load %arg4[%c0_9, %c0_10, %c0_11] : memref<1x8x32xbf16, #tpu.memory_space<vmem>>, vector<1x8x32xbf16>
    %56 = vector.shape_cast %55 : vector<1x8x32xbf16> to vector<8x32xbf16>
    %57 = vector.shape_cast %54 : vector<8x32xbf16> to vector<1x8x32xbf16>
    tpu.vector_store %arg4[%c0_9, %c0_10, %c0_11], %57 {strides = array<i32>} : memref<1x8x32xbf16, #tpu.memory_space<vmem>>, vector<1x8x32xbf16>,
    return
  }
  func.func @transform_0(%arg0: i32, %arg1: i32) -> (i32, i32, i32) {
    %c0_i32 = arith.constant 0 : i32
    %c0_i32_0 = arith.constant 0 : i32
    return %arg0, %arg1, %c0_i32 : i32, i32, i32
  }
  func.func @transform_1(%arg0: i32, %arg1: i32) -> (i32, i32, i32) {
    %c0_i32 = arith.constant 0 : i32
    %c0_i32_0 = arith.constant 0 : i32
    %c0_i32_1 = arith.constant 0 : i32
    return %arg0, %c0_i32, %c0_i32_0 : i32, i32, i32
  }
  func.func @transform_2(%arg0: i32, %arg1: i32) -> (i32, i32, i32) {
    %c0_i32 = arith.constant 0 : i32
    %c0_i32_0 = arith.constant 0 : i32
    return %arg0, %arg1, %c0_i32 : i32, i32, i32
  }
}

module attributes {stable_mosaic.version = 11 : i64} {
  func.func @kernel(%arg0: i32, %arg1: i32, %arg2: memref<16x32xbf16, #tpu.memory_space<vmem>>, %arg3: memref<1x32xf32, #tpu.memory_space<vmem>>, %arg4: memref<1x32xf32, #tpu.memory_space<vmem>>, %arg5: memref<32x32xbf16, #tpu.memory_space<vmem>>, %arg6: memref<1x32xf32, #tpu.memory_space<vmem>>, %arg7: memref<16x32xbf16, #tpu.memory_space<vmem>>) attributes {dimension_semantics = [#tpu.dimension_semantics<parallel>, #tpu.dimension_semantics<parallel>], iteration_bounds = array<i64: 1, 2>, scalar_prefetch = 0 : i64, scratch_operands = 0 : i64, tpu.core_type = #tpu.core_type<tc>, window_params = [{transform_indices = @transform_0, window_bounds = array<i64: 16, 32>}, {pipeline_mode = #tpu.pipeline_mode<synchronous>, transform_indices = @transform_1, window_bounds = array<i64: 1, 32>}, {pipeline_mode = #tpu.pipeline_mode<synchronous>, transform_indices = @transform_2, window_bounds = array<i64: 1, 32>}, {transform_indices = @transform_3, window_bounds = array<i64: 32, 32>}, {transform_indices = @transform_4, window_bounds = array<i64: 1, 32>}, {transform_indices = @transform_5, window_bounds = array<i64: 16, 32>}]} {
    %c0 = arith.constant 0 : index
    %c0_0 = arith.constant 0 : index
    %0 = vector.load %arg2[%c0, %c0_0] : memref<16x32xbf16, #tpu.memory_space<vmem>>, vector<16x32xbf16>
    %1 = arith.extf %0 : vector<16x32xbf16> to vector<16x32xf32>
    %cst = arith.constant dense<0.000000e+00> : vector<16xf32>
    %2 = vector.multi_reduction <add>, %1, %cst [1] : vector<16x32xf32> to vector<16xf32>
    %3 = vector.shape_cast %2 : vector<16xf32> to vector<16x1xf32>
    %cst_1 = arith.constant 3.200000e+01 : f32
    %4 = vector.broadcast %cst_1 : f32 to vector<16x1xf32>
    %5 = arith.divf %3, %4 : vector<16x1xf32>
    %6 = vector.broadcast %5 : vector<16x1xf32> to vector<16x32xf32>
    %7 = arith.subf %1, %6 : vector<16x32xf32>
    %8 = vector.broadcast %5 : vector<16x1xf32> to vector<16x32xf32>
    %9 = arith.subf %1, %8 : vector<16x32xf32>
    %10 = arith.mulf %7, %9 : vector<16x32xf32>
    %cst_2 = arith.constant dense<0.000000e+00> : vector<16xf32>
    %11 = vector.multi_reduction <add>, %10, %cst_2 [1] : vector<16x32xf32> to vector<16xf32>
    %12 = vector.shape_cast %11 : vector<16xf32> to vector<16x1xf32>
    %cst_3 = arith.constant 3.200000e+01 : f32
    %13 = vector.broadcast %cst_3 : f32 to vector<16x1xf32>
    %14 = arith.divf %12, %13 : vector<16x1xf32>
    %15 = vector.broadcast %5 : vector<16x1xf32> to vector<16x32xf32>
    %16 = arith.subf %1, %15 : vector<16x32xf32>
    %cst_4 = arith.constant 9.99999997E-7 : f32
    %17 = vector.broadcast %cst_4 : f32 to vector<16x1xf32>
    %18 = arith.addf %14, %17 : vector<16x1xf32>
    %19 = math.rsqrt %18 : vector<16x1xf32>
    %20 = vector.broadcast %19 : vector<16x1xf32> to vector<16x32xf32>
    %21 = arith.mulf %16, %20 : vector<16x32xf32>
    %c0_5 = arith.constant 0 : index
    %c0_6 = arith.constant 0 : index
    %22 = vector.load %arg3[%c0_5, %c0_6] : memref<1x32xf32, #tpu.memory_space<vmem>>, vector<1x32xf32>
    %23 = vector.broadcast %22 : vector<1x32xf32> to vector<16x32xf32>
    %24 = arith.mulf %21, %23 : vector<16x32xf32>
    %c0_7 = arith.constant 0 : index
    %c0_8 = arith.constant 0 : index
    %25 = vector.load %arg4[%c0_7, %c0_8] : memref<1x32xf32, #tpu.memory_space<vmem>>, vector<1x32xf32>
    %26 = vector.broadcast %25 : vector<1x32xf32> to vector<16x32xf32>
    %27 = arith.addf %24, %26 : vector<16x32xf32>
    %28 = arith.truncf %27 : vector<16x32xf32> to vector<16x32xbf16>
    %c0_9 = arith.constant 0 : index
    %c0_10 = arith.constant 0 : index
    %29 = vector.load %arg5[%c0_9, %c0_10] : memref<32x32xbf16, #tpu.memory_space<vmem>>, vector<32x32xbf16>
    %cst_11 = arith.constant dense<0.000000e+00> : vector<16x32xf32>
    %30 = tpu.matmul %28, %29, %cst_11 {dimension_numbers = #tpu.dot_dimension_numbers<[1], [0], [0], [1], [0, 0, 1, 1], [], []>} : vector<16x32xbf16>, vector<32x32xbf16>, vector<16x32xf32> -> vector<16x32xf32>
    %c0_12 = arith.constant 0 : index
    %c0_13 = arith.constant 0 : index
    %31 = vector.load %arg6[%c0_12, %c0_13] : memref<1x32xf32, #tpu.memory_space<vmem>>, vector<1x32xf32>
    %32 = vector.broadcast %31 : vector<1x32xf32> to vector<16x32xf32>
    %33 = arith.addf %30, %32 : vector<16x32xf32>
    %34 = arith.truncf %33 : vector<16x32xf32> to vector<16x32xbf16>
    %c0_14 = arith.constant 0 : index
    %c0_15 = arith.constant 0 : index
    %35 = vector.load %arg7[%c0_14, %c0_15] : memref<16x32xbf16, #tpu.memory_space<vmem>>, vector<16x32xbf16>
    tpu.vector_store %arg7[%c0_14, %c0_15], %34 {strides = array<i32>} : memref<16x32xbf16, #tpu.memory_space<vmem>>, vector<16x32xbf16>,
    return
  }
  func.func @transform_0(%arg0: i32, %arg1: i32) -> (i32, i32) {
    %c0_i32 = arith.constant 0 : i32
    %c0_i32_0 = arith.constant 0 : i32
    return %arg1, %c0_i32 : i32, i32
  }
  func.func @transform_1(%arg0: i32, %arg1: i32) -> (i32, i32) {
    %c0_i32 = arith.constant 0 : i32
    %c0_i32_0 = arith.constant 0 : i32
    %c0_i32_1 = arith.constant 0 : i32
    return %c0_i32, %c0_i32_0 : i32, i32
  }
  func.func @transform_2(%arg0: i32, %arg1: i32) -> (i32, i32) {
    %c0_i32 = arith.constant 0 : i32
    %c0_i32_0 = arith.constant 0 : i32
    %c0_i32_1 = arith.constant 0 : i32
    return %c0_i32, %c0_i32_0 : i32, i32
  }
  func.func @transform_3(%arg0: i32, %arg1: i32) -> (i32, i32) {
    %c0_i32 = arith.constant 0 : i32
    %c0_i32_0 = arith.constant 0 : i32
    return %c0_i32, %arg0 : i32, i32
  }
  func.func @transform_4(%arg0: i32, %arg1: i32) -> (i32, i32) {
    %c0_i32 = arith.constant 0 : i32
    %c0_i32_0 = arith.constant 0 : i32
    return %c0_i32, %arg0 : i32, i32
  }
  func.func @transform_5(%arg0: i32, %arg1: i32) -> (i32, i32) {
    %c0_i32 = arith.constant 0 : i32
    return %arg1, %arg0 : i32, i32
  }
}

module attributes {stable_mosaic.version = 11 : i64} {
  func.func @kernel(%arg0: i32, %arg1: i32, %arg2: memref<16x32xbf16, #tpu.memory_space<vmem>>, %arg3: memref<1x32xf32, #tpu.memory_space<vmem>>, %arg4: memref<1x32xf32, #tpu.memory_space<vmem>>, %arg5: memref<32x64xbf16, #tpu.memory_space<vmem>>, %arg6: memref<1x64xf32, #tpu.memory_space<vmem>>, %arg7: memref<16x64xbf16, #tpu.memory_space<vmem>>) attributes {dimension_semantics = [#tpu.dimension_semantics<parallel>, #tpu.dimension_semantics<parallel>], iteration_bounds = array<i64: 1, 2>, scalar_prefetch = 0 : i64, scratch_operands = 0 : i64, tpu.core_type = #tpu.core_type<tc>, window_params = [{transform_indices = @transform_0, window_bounds = array<i64: 16, 32>}, {pipeline_mode = #tpu.pipeline_mode<synchronous>, transform_indices = @transform_1, window_bounds = array<i64: 1, 32>}, {pipeline_mode = #tpu.pipeline_mode<synchronous>, transform_indices = @transform_2, window_bounds = array<i64: 1, 32>}, {transform_indices = @transform_3, window_bounds = array<i64: 32, 64>}, {transform_indices = @transform_4, window_bounds = array<i64: 1, 64>}, {transform_indices = @transform_5, window_bounds = array<i64: 16, 64>}]} {
    %c0 = arith.constant 0 : index
    %c0_0 = arith.constant 0 : index
    %0 = vector.load %arg2[%c0, %c0_0] : memref<16x32xbf16, #tpu.memory_space<vmem>>, vector<16x32xbf16>
    %1 = arith.extf %0 : vector<16x32xbf16> to vector<16x32xf32>
    %cst = arith.constant dense<0.000000e+00> : vector<16xf32>
    %2 = vector.multi_reduction <add>, %1, %cst [1] : vector<16x32xf32> to vector<16xf32>
    %3 = vector.shape_cast %2 : vector<16xf32> to vector<16x1xf32>
    %cst_1 = arith.constant 3.200000e+01 : f32
    %4 = vector.broadcast %cst_1 : f32 to vector<16x1xf32>
    %5 = arith.divf %3, %4 : vector<16x1xf32>
    %6 = vector.broadcast %5 : vector<16x1xf32> to vector<16x32xf32>
    %7 = arith.subf %1, %6 : vector<16x32xf32>
    %8 = vector.broadcast %5 : vector<16x1xf32> to vector<16x32xf32>
    %9 = arith.subf %1, %8 : vector<16x32xf32>
    %10 = arith.mulf %7, %9 : vector<16x32xf32>
    %cst_2 = arith.constant dense<0.000000e+00> : vector<16xf32>
    %11 = vector.multi_reduction <add>, %10, %cst_2 [1] : vector<16x32xf32> to vector<16xf32>
    %12 = vector.shape_cast %11 : vector<16xf32> to vector<16x1xf32>
    %cst_3 = arith.constant 3.200000e+01 : f32
    %13 = vector.broadcast %cst_3 : f32 to vector<16x1xf32>
    %14 = arith.divf %12, %13 : vector<16x1xf32>
    %15 = vector.broadcast %5 : vector<16x1xf32> to vector<16x32xf32>
    %16 = arith.subf %1, %15 : vector<16x32xf32>
    %cst_4 = arith.constant 9.99999997E-7 : f32
    %17 = vector.broadcast %cst_4 : f32 to vector<16x1xf32>
    %18 = arith.addf %14, %17 : vector<16x1xf32>
    %19 = math.rsqrt %18 : vector<16x1xf32>
    %20 = vector.broadcast %19 : vector<16x1xf32> to vector<16x32xf32>
    %21 = arith.mulf %16, %20 : vector<16x32xf32>
    %c0_5 = arith.constant 0 : index
    %c0_6 = arith.constant 0 : index
    %22 = vector.load %arg3[%c0_5, %c0_6] : memref<1x32xf32, #tpu.memory_space<vmem>>, vector<1x32xf32>
    %23 = vector.broadcast %22 : vector<1x32xf32> to vector<16x32xf32>
    %24 = arith.mulf %21, %23 : vector<16x32xf32>
    %c0_7 = arith.constant 0 : index
    %c0_8 = arith.constant 0 : index
    %25 = vector.load %arg4[%c0_7, %c0_8] : memref<1x32xf32, #tpu.memory_space<vmem>>, vector<1x32xf32>
    %26 = vector.broadcast %25 : vector<1x32xf32> to vector<16x32xf32>
    %27 = arith.addf %24, %26 : vector<16x32xf32>
    %28 = arith.truncf %27 : vector<16x32xf32> to vector<16x32xbf16>
    %c0_9 = arith.constant 0 : index
    %c0_10 = arith.constant 0 : index
    %29 = vector.load %arg5[%c0_9, %c0_10] : memref<32x64xbf16, #tpu.memory_space<vmem>>, vector<32x64xbf16>
    %cst_11 = arith.constant dense<0.000000e+00> : vector<16x64xf32>
    %30 = tpu.matmul %28, %29, %cst_11 {dimension_numbers = #tpu.dot_dimension_numbers<[1], [0], [0], [1], [0, 0, 1, 1], [], []>} : vector<16x32xbf16>, vector<32x64xbf16>, vector<16x64xf32> -> vector<16x64xf32>
    %c0_12 = arith.constant 0 : index
    %c0_13 = arith.constant 0 : index
    %31 = vector.load %arg6[%c0_12, %c0_13] : memref<1x64xf32, #tpu.memory_space<vmem>>, vector<1x64xf32>
    %32 = vector.broadcast %31 : vector<1x64xf32> to vector<16x64xf32>
    %33 = arith.addf %30, %32 : vector<16x64xf32>
    %cst_14 = arith.constant 5.000000e-01 : f32
    %34 = vector.broadcast %cst_14 : f32 to vector<16x64xf32>
    %35 = arith.mulf %34, %33 : vector<16x64xf32>
    %cst_15 = arith.constant 4.471500e-02 : f32
    %36 = vector.broadcast %cst_15 : f32 to vector<16x64xf32>
    %37 = arith.mulf %36, %33 : vector<16x64xf32>
    %38 = arith.mulf %37, %33 : vector<16x64xf32>
    %39 = arith.mulf %38, %33 : vector<16x64xf32>
    %40 = arith.addf %33, %39 : vector<16x64xf32>
    %cst_16 = arith.constant 0.797884583 : f32
    %41 = vector.broadcast %cst_16 : f32 to vector<16x64xf32>
    %42 = arith.mulf %41, %40 : vector<16x64xf32>
    %43 = math.tanh %42 : vector<16x64xf32>
    %cst_17 = arith.constant 1.000000e+00 : f32
    %44 = vector.broadcast %cst_17 : f32 to vector<16x64xf32>
    %45 = arith.addf %44, %43 : vector<16x64xf32>
    %46 = arith.mulf %35, %45 : vector<16x64xf32>
    %47 = arith.truncf %46 : vector<16x64xf32> to vector<16x64xbf16>
    %c0_18 = arith.constant 0 : index
    %c0_19 = arith.constant 0 : index
    %48 = vector.load %arg7[%c0_18, %c0_19] : memref<16x64xbf16, #tpu.memory_space<vmem>>, vector<16x64xbf16>
    tpu.vector_store %arg7[%c0_18, %c0_19], %47 {strides = array<i32>} : memref<16x64xbf16, #tpu.memory_space<vmem>>, vector<16x64xbf16>,
    return
  }
  func.func @transform_0(%arg0: i32, %arg1: i32) -> (i32, i32) {
    %c0_i32 = arith.constant 0 : i32
    %c0_i32_0 = arith.constant 0 : i32
    return %arg1, %c0_i32 : i32, i32
  }
  func.func @transform_1(%arg0: i32, %arg1: i32) -> (i32, i32) {
    %c0_i32 = arith.constant 0 : i32
    %c0_i32_0 = arith.constant 0 : i32
    %c0_i32_1 = arith.constant 0 : i32
    return %c0_i32, %c0_i32_0 : i32, i32
  }
  func.func @transform_2(%arg0: i32, %arg1: i32) -> (i32, i32) {
    %c0_i32 = arith.constant 0 : i32
    %c0_i32_0 = arith.constant 0 : i32
    %c0_i32_1 = arith.constant 0 : i32
    return %c0_i32, %c0_i32_0 : i32, i32
  }
  func.func @transform_3(%arg0: i32, %arg1: i32) -> (i32, i32) {
    %c0_i32 = arith.constant 0 : i32
    %c0_i32_0 = arith.constant 0 : i32
    return %c0_i32, %arg0 : i32, i32
  }
  func.func @transform_4(%arg0: i32, %arg1: i32) -> (i32, i32) {
    %c0_i32 = arith.constant 0 : i32
    %c0_i32_0 = arith.constant 0 : i32
    return %c0_i32, %arg0 : i32, i32
  }
  func.func @transform_5(%arg0: i32, %arg1: i32) -> (i32, i32) {
    %c0_i32 = arith.constant 0 : i32
    return %arg1, %arg0 : i32, i32
  }
}

module attributes {stable_mosaic.version = 11 : i64} {
  func.func @kernel(%arg0: i32, %arg1: i32, %arg2: memref<16x64xbf16, #tpu.memory_space<vmem>>, %arg3: memref<64x32xbf16, #tpu.memory_space<vmem>>, %arg4: memref<1x32xf32, #tpu.memory_space<vmem>>, %arg5: memref<16x32xbf16, #tpu.memory_space<vmem>>, %arg6: memref<16x32xbf16, #tpu.memory_space<vmem>>) attributes {dimension_semantics = [#tpu.dimension_semantics<parallel>, #tpu.dimension_semantics<parallel>], iteration_bounds = array<i64: 1, 2>, scalar_prefetch = 0 : i64, scratch_operands = 0 : i64, tpu.core_type = #tpu.core_type<tc>, window_params = [{transform_indices = @transform_0, window_bounds = array<i64: 16, 64>}, {transform_indices = @transform_1, window_bounds = array<i64: 64, 32>}, {transform_indices = @transform_2, window_bounds = array<i64: 1, 32>}, {transform_indices = @transform_3, window_bounds = array<i64: 16, 32>}, {transform_indices = @transform_4, window_bounds = array<i64: 16, 32>}]} {
    %c0 = arith.constant 0 : index
    %c0_0 = arith.constant 0 : index
    %0 = vector.load %arg2[%c0, %c0_0] : memref<16x64xbf16, #tpu.memory_space<vmem>>, vector<16x64xbf16>
    %c0_1 = arith.constant 0 : index
    %c0_2 = arith.constant 0 : index
    %1 = vector.load %arg3[%c0_1, %c0_2] : memref<64x32xbf16, #tpu.memory_space<vmem>>, vector<64x32xbf16>
    %cst = arith.constant dense<0.000000e+00> : vector<16x32xf32>
    %2 = tpu.matmul %0, %1, %cst {dimension_numbers = #tpu.dot_dimension_numbers<[1], [0], [0], [1], [0, 0, 1, 1], [], []>} : vector<16x64xbf16>, vector<64x32xbf16>, vector<16x32xf32> -> vector<16x32xf32>
    %c0_3 = arith.constant 0 : index
    %c0_4 = arith.constant 0 : index
    %3 = vector.load %arg4[%c0_3, %c0_4] : memref<1x32xf32, #tpu.memory_space<vmem>>, vector<1x32xf32>
    %4 = vector.broadcast %3 : vector<1x32xf32> to vector<16x32xf32>
    %5 = arith.addf %2, %4 : vector<16x32xf32>
    %c0_5 = arith.constant 0 : index
    %c0_6 = arith.constant 0 : index
    %6 = vector.load %arg5[%c0_5, %c0_6] : memref<16x32xbf16, #tpu.memory_space<vmem>>, vector<16x32xbf16>
    %7 = arith.extf %6 : vector<16x32xbf16> to vector<16x32xf32>
    %8 = arith.addf %5, %7 : vector<16x32xf32>
    %9 = arith.truncf %8 : vector<16x32xf32> to vector<16x32xbf16>
    %c0_7 = arith.constant 0 : index
    %c0_8 = arith.constant 0 : index
    %10 = vector.load %arg6[%c0_7, %c0_8] : memref<16x32xbf16, #tpu.memory_space<vmem>>, vector<16x32xbf16>
    tpu.vector_store %arg6[%c0_7, %c0_8], %9 {strides = array<i32>} : memref<16x32xbf16, #tpu.memory_space<vmem>>, vector<16x32xbf16>,
    return
  }
  func.func @transform_0(%arg0: i32, %arg1: i32) -> (i32, i32) {
    %c0_i32 = arith.constant 0 : i32
    %c0_i32_0 = arith.constant 0 : i32
    return %arg1, %c0_i32 : i32, i32
  }
  func.func @transform_1(%arg0: i32, %arg1: i32) -> (i32, i32) {
    %c0_i32 = arith.constant 0 : i32
    %c0_i32_0 = arith.constant 0 : i32
    return %c0_i32, %arg0 : i32, i32
  }
  func.func @transform_2(%arg0: i32, %arg1: i32) -> (i32, i32) {
    %c0_i32 = arith.constant 0 : i32
    %c0_i32_0 = arith.constant 0 : i32
    return %c0_i32, %arg0 : i32, i32
  }
  func.func @transform_3(%arg0: i32, %arg1: i32) -> (i32, i32) {
    %c0_i32 = arith.constant 0 : i32
    return %arg1, %arg0 : i32, i32
  }
  func.func @transform_4(%arg0: i32, %arg1: i32) -> (i32, i32) {
    %c0_i32 = arith.constant 0 : i32
    return %arg1, %arg0 : i32, i32
  }
}

module attributes {stable_mosaic.version = 11 : i64} {
  func.func @_merge_kernel(%arg0: i32, %arg1: memref<1x32x1xi32, #tpu.memory_space<vmem>>, %arg2: memref<1x32x32xf32, #tpu.memory_space<vmem>>, %arg3: memref<1x16x32xbf16, #tpu.memory_space<vmem>>, %arg4: memref<1x32x32xbf16, #tpu.memory_space<vmem>>) attributes {dimension_semantics = [#tpu.dimension_semantics<parallel>], iteration_bounds = array<i64: 2>, scalar_prefetch = 0 : i64, scratch_operands = 0 : i64, tpu.core_type = #tpu.core_type<tc>, window_params = [{transform_indices = @transform_0, window_bounds = array<i64: 1, 32, 1>}, {transform_indices = @transform_1, window_bounds = array<i64: 1, 32, 32>}, {transform_indices = @transform_2, window_bounds = array<i64: 1, 16, 32>}, {transform_indices = @transform_3, window_bounds = array<i64: 1, 32, 32>}]} {
    %c0 = arith.constant 0 : index
    %c0_0 = arith.constant 0 : index
    %c0_1 = arith.constant 0 : index
    %0 = vector.load %arg1[%c0, %c0_0, %c0_1] : memref<1x32x1xi32, #tpu.memory_space<vmem>>, vector<1x32x1xi32>
    %1 = vector.shape_cast %0 : vector<1x32x1xi32> to vector<32x1xi32>
    %c0_2 = arith.constant 0 : index
    %c0_3 = arith.constant 0 : index
    %c0_4 = arith.constant 0 : index
    %2 = vector.load %arg2[%c0_2, %c0_3, %c0_4] : memref<1x32x32xf32, #tpu.memory_space<vmem>>, vector<1x32x32xf32>
    %3 = vector.shape_cast %2 : vector<1x32x32xf32> to vector<32x32xf32>
    %c0_5 = arith.constant 0 : index
    %c0_6 = arith.constant 0 : index
    %c0_7 = arith.constant 0 : index
    %4 = vector.load %arg3[%c0_5, %c0_6, %c0_7] : memref<1x16x32xbf16, #tpu.memory_space<vmem>>, vector<1x16x32xbf16>
    %5 = vector.shape_cast %4 : vector<1x16x32xbf16> to vector<16x32xbf16>
    %6 = arith.extf %5 : vector<16x32xbf16> to vector<16x32xf32>
    %cst = arith.constant 0.176776692 : f32
    %7 = vector.broadcast %cst : f32 to vector<16x32xf32>
    %8 = arith.mulf %6, %7 : vector<16x32xf32>
    %cst_8 = arith.constant 0.000000e+00 : f32
    %9 = vector.broadcast %cst_8 : f32 to vector<16x32xf32>
    %10 = tpu.concatenate %8, %9 in 0 : vector<16x32xf32>, vector<16x32xf32> -> vector<32x32xf32>
    %c255_i32 = arith.constant 255 : i32
    %11 = vector.broadcast %c255_i32 : i32 to vector<32x1xi32>
    %12 = arith.cmpi eq, %1, %11 : vector<32x1xi32>
    %c0_i32 = arith.constant 0 : i32
    %13 = vector.broadcast %c0_i32 : i32 to vector<32x1xi32>
    %14 = arith.cmpi eq, %1, %13 : vector<32x1xi32>
    %cst_9 = arith.constant dense<true> : vector<32x1xi1>
    %15 = arith.xori %12, %cst_9 : vector<32x1xi1>
    %cst_10 = arith.constant dense<true> : vector<32x1xi1>
    %16 = arith.xori %14, %cst_10 : vector<32x1xi1>
    %17 = arith.andi %15, %16 : vector<32x1xi1>
    %cst_11 = arith.constant 0.000000e+00 : f32
    %18 = vector.shape_cast %17 : vector<32x1xi1> to vector<32x1xi1>
    %19 = vector.broadcast %18 : vector<32x1xi1> to vector<32x32xi1>
    %20 = vector.broadcast %cst_11 : f32 to vector<32x32xf32>
    %21 = arith.select %19, %3, %20 : vector<32x32xi1>, vector<32x32xf32>
    %22 = vector.shape_cast %12 : vector<32x1xi1> to vector<32x1xi1>
    %23 = vector.broadcast %22 : vector<32x1xi1> to vector<32x32xi1>
    %24 = arith.select %23, %10, %21 : vector<32x32xi1>, vector<32x32xf32>
    %cst_12 = arith.constant 0.000000e+00 : f32
    %25 = vector.shape_cast %14 : vector<32x1xi1> to vector<32x1xi1>
    %26 = vector.broadcast %25 : vector<32x1xi1> to vector<32x32xi1>
    %27 = vector.broadcast %cst_12 : f32 to vector<32x32xf32>
    %28 = arith.select %26, %27, %24 : vector<32x32xi1>, vector<32x32xf32>
    %cst_13 = arith.constant 5.65685415 : f32
    %29 = vector.broadcast %cst_13 : f32 to vector<32x32xf32>
    %30 = arith.mulf %28, %29 : vector<32x32xf32>
    %31 = arith.truncf %30 : vector<32x32xf32> to vector<32x32xbf16>
    %c0_14 = arith.constant 0 : index
    %c0_15 = arith.constant 0 : index
    %c0_16 = arith.constant 0 : index
    %32 = vector.load %arg4[%c0_14, %c0_15, %c0_16] : memref<1x32x32xbf16, #tpu.memory_space<vmem>>, vector<1x32x32xbf16>
    %33 = vector.shape_cast %32 : vector<1x32x32xbf16> to vector<32x32xbf16>
    %34 = vector.shape_cast %31 : vector<32x32xbf16> to vector<1x32x32xbf16>
    tpu.vector_store %arg4[%c0_14, %c0_15, %c0_16], %34 {strides = array<i32>} : memref<1x32x32xbf16, #tpu.memory_space<vmem>>, vector<1x32x32xbf16>,
    return
  }
  func.func @transform_0(%arg0: i32) -> (i32, i32, i32) {
    %c0_i32 = arith.constant 0 : i32
    %c0_i32_0 = arith.constant 0 : i32
    %c0_i32_1 = arith.constant 0 : i32
    return %arg0, %c0_i32, %c0_i32_0 : i32, i32, i32
  }
  func.func @transform_1(%arg0: i32) -> (i32, i32, i32) {
    %c0_i32 = arith.constant 0 : i32
    %c0_i32_0 = arith.constant 0 : i32
    %c0_i32_1 = arith.constant 0 : i32
    return %arg0, %c0_i32, %c0_i32_0 : i32, i32, i32
  }
  func.func @transform_2(%arg0: i32) -> (i32, i32, i32) {
    %c0_i32 = arith.constant 0 : i32
    %c0_i32_0 = arith.constant 0 : i32
    %c0_i32_1 = arith.constant 0 : i32
    return %arg0, %c0_i32, %c0_i32_0 : i32, i32, i32
  }
  func.func @transform_3(%arg0: i32) -> (i32, i32, i32) {
    %c0_i32 = arith.constant 0 : i32
    %c0_i32_0 = arith.constant 0 : i32
    %c0_i32_1 = arith.constant 0 : i32
    return %arg0, %c0_i32, %c0_i32_0 : i32, i32, i32
  }
}

module attributes {stable_mosaic.version = 11 : i64} {
  func.func @kernel(%arg0: i32, %arg1: i32, %arg2: memref<32x32xbf16, #tpu.memory_space<vmem>>, %arg3: memref<1x32xf32, #tpu.memory_space<vmem>>, %arg4: memref<32x96xbf16, #tpu.memory_space<vmem>>, %arg5: memref<32x96xbf16, #tpu.memory_space<vmem>>) attributes {dimension_semantics = [#tpu.dimension_semantics<parallel>, #tpu.dimension_semantics<parallel>], iteration_bounds = array<i64: 1, 2>, scalar_prefetch = 0 : i64, scratch_operands = 0 : i64, tpu.core_type = #tpu.core_type<tc>, window_params = [{transform_indices = @transform_0, window_bounds = array<i64: 32, 32>}, {pipeline_mode = #tpu.pipeline_mode<synchronous>, transform_indices = @transform_1, window_bounds = array<i64: 1, 32>}, {transform_indices = @transform_2, window_bounds = array<i64: 32, 96>}, {transform_indices = @transform_3, window_bounds = array<i64: 32, 96>}]} {
    %c0 = arith.constant 0 : index
    %c0_0 = arith.constant 0 : index
    %0 = vector.load %arg2[%c0, %c0_0] : memref<32x32xbf16, #tpu.memory_space<vmem>>, vector<32x32xbf16>
    %1 = arith.extf %0 : vector<32x32xbf16> to vector<32x32xf32>
    %2 = arith.mulf %1, %1 : vector<32x32xf32>
    %cst = arith.constant dense<0.000000e+00> : vector<32xf32>
    %3 = vector.multi_reduction <add>, %2, %cst [1] : vector<32x32xf32> to vector<32xf32>
    %4 = vector.shape_cast %3 : vector<32xf32> to vector<32x1xf32>
    %cst_1 = arith.constant 3.200000e+01 : f32
    %5 = vector.broadcast %cst_1 : f32 to vector<32x1xf32>
    %6 = arith.divf %4, %5 : vector<32x1xf32>
    %cst_2 = arith.constant 9.99999997E-7 : f32
    %7 = vector.broadcast %cst_2 : f32 to vector<32x1xf32>
    %8 = arith.addf %6, %7 : vector<32x1xf32>
    %9 = math.rsqrt %8 : vector<32x1xf32>
    %10 = vector.broadcast %9 : vector<32x1xf32> to vector<32x32xf32>
    %11 = arith.mulf %1, %10 : vector<32x32xf32>
    %c0_3 = arith.constant 0 : index
    %c0_4 = arith.constant 0 : index
    %12 = vector.load %arg3[%c0_3, %c0_4] : memref<1x32xf32, #tpu.memory_space<vmem>>, vector<1x32xf32>
    %cst_5 = arith.constant 1.000000e+00 : f32
    %13 = vector.broadcast %cst_5 : f32 to vector<1x32xf32>
    %14 = arith.addf %13, %12 : vector<1x32xf32>
    %15 = vector.broadcast %14 : vector<1x32xf32> to vector<32x32xf32>
    %16 = arith.mulf %11, %15 : vector<32x32xf32>
    %17 = arith.truncf %16 : vector<32x32xf32> to vector<32x32xbf16>
    %c0_6 = arith.constant 0 : index
    %c0_7 = arith.constant 0 : index
    %18 = vector.load %arg4[%c0_6, %c0_7] : memref<32x96xbf16, #tpu.memory_space<vmem>>, vector<32x96xbf16>
    %cst_8 = arith.constant dense<0.000000e+00> : vector<32x96xf32>
    %19 = tpu.matmul %17, %18, %cst_8 {dimension_numbers = #tpu.dot_dimension_numbers<[1], [0], [0], [1], [0, 0, 1, 1], [], []>} : vector<32x32xbf16>, vector<32x96xbf16>, vector<32x96xf32> -> vector<32x96xf32>
    %20 = arith.truncf %19 : vector<32x96xf32> to vector<32x96xbf16>
    %c0_9 = arith.constant 0 : index
    %c0_10 = arith.constant 0 : index
    %21 = vector.load %arg5[%c0_9, %c0_10] : memref<32x96xbf16, #tpu.memory_space<vmem>>, vector<32x96xbf16>
    tpu.vector_store %arg5[%c0_9, %c0_10], %20 {strides = array<i32>} : memref<32x96xbf16, #tpu.memory_space<vmem>>, vector<32x96xbf16>,
    return
  }
  func.func @transform_0(%arg0: i32, %arg1: i32) -> (i32, i32) {
    %c0_i32 = arith.constant 0 : i32
    %c0_i32_0 = arith.constant 0 : i32
    return %arg1, %c0_i32 : i32, i32
  }
  func.func @transform_1(%arg0: i32, %arg1: i32) -> (i32, i32) {
    %c0_i32 = arith.constant 0 : i32
    %c0_i32_0 = arith.constant 0 : i32
    %c0_i32_1 = arith.constant 0 : i32
    return %c0_i32, %c0_i32_0 : i32, i32
  }
  func.func @transform_2(%arg0: i32, %arg1: i32) -> (i32, i32) {
    %c0_i32 = arith.constant 0 : i32
    %c0_i32_0 = arith.constant 0 : i32
    return %c0_i32, %arg0 : i32, i32
  }
  func.func @transform_3(%arg0: i32, %arg1: i32) -> (i32, i32) {
    %c0_i32 = arith.constant 0 : i32
    return %arg1, %arg0 : i32, i32
  }
}

module attributes {stable_mosaic.version = 11 : i64} {
  func.func @kernel(%arg0: i32, %arg1: i32, %arg2: memref<32x32xbf16, #tpu.memory_space<vmem>>, %arg3: memref<32x32xbf16, #tpu.memory_space<vmem>>, %arg4: memref<32x32xbf16, #tpu.memory_space<vmem>>, %arg5: memref<32x32xbf16, #tpu.memory_space<vmem>>) attributes {dimension_semantics = [#tpu.dimension_semantics<parallel>, #tpu.dimension_semantics<parallel>], iteration_bounds = array<i64: 1, 2>, scalar_prefetch = 0 : i64, scratch_operands = 0 : i64, tpu.core_type = #tpu.core_type<tc>, window_params = [{transform_indices = @transform_0, window_bounds = array<i64: 32, 32>}, {transform_indices = @transform_1, window_bounds = array<i64: 32, 32>}, {transform_indices = @transform_2, window_bounds = array<i64: 32, 32>}, {transform_indices = @transform_3, window_bounds = array<i64: 32, 32>}]} {
    %c0 = arith.constant 0 : index
    %c0_0 = arith.constant 0 : index
    %0 = vector.load %arg2[%c0, %c0_0] : memref<32x32xbf16, #tpu.memory_space<vmem>>, vector<32x32xbf16>
    %c0_1 = arith.constant 0 : index
    %c0_2 = arith.constant 0 : index
    %1 = vector.load %arg3[%c0_1, %c0_2] : memref<32x32xbf16, #tpu.memory_space<vmem>>, vector<32x32xbf16>
    %cst = arith.constant dense<0.000000e+00> : vector<32x32xf32>
    %2 = tpu.matmul %0, %1, %cst {dimension_numbers = #tpu.dot_dimension_numbers<[1], [0], [0], [1], [0, 0, 1, 1], [], []>} : vector<32x32xbf16>, vector<32x32xbf16>, vector<32x32xf32> -> vector<32x32xf32>
    %c0_3 = arith.constant 0 : index
    %c0_4 = arith.constant 0 : index
    %3 = vector.load %arg4[%c0_3, %c0_4] : memref<32x32xbf16, #tpu.memory_space<vmem>>, vector<32x32xbf16>
    %4 = arith.extf %3 : vector<32x32xbf16> to vector<32x32xf32>
    %5 = arith.addf %2, %4 : vector<32x32xf32>
    %6 = arith.truncf %5 : vector<32x32xf32> to vector<32x32xbf16>
    %c0_5 = arith.constant 0 : index
    %c0_6 = arith.constant 0 : index
    %7 = vector.load %arg5[%c0_5, %c0_6] : memref<32x32xbf16, #tpu.memory_space<vmem>>, vector<32x32xbf16>
    tpu.vector_store %arg5[%c0_5, %c0_6], %6 {strides = array<i32>} : memref<32x32xbf16, #tpu.memory_space<vmem>>, vector<32x32xbf16>,
    return
  }
  func.func @transform_0(%arg0: i32, %arg1: i32) -> (i32, i32) {
    %c0_i32 = arith.constant 0 : i32
    %c0_i32_0 = arith.constant 0 : i32
    return %arg1, %c0_i32 : i32, i32
  }
  func.func @transform_1(%arg0: i32, %arg1: i32) -> (i32, i32) {
    %c0_i32 = arith.constant 0 : i32
    %c0_i32_0 = arith.constant 0 : i32
    return %c0_i32, %arg0 : i32, i32
  }
  func.func @transform_2(%arg0: i32, %arg1: i32) -> (i32, i32) {
    %c0_i32 = arith.constant 0 : i32
    return %arg1, %arg0 : i32, i32
  }
  func.func @transform_3(%arg0: i32, %arg1: i32) -> (i32, i32) {
    %c0_i32 = arith.constant 0 : i32
    return %arg1, %arg0 : i32, i32
  }
}

module attributes {stable_mosaic.version = 11 : i64} {
  func.func @_text_attn_kernel(%arg0: i32, %arg1: i32, %arg2: memref<1x16x96xbf16, #tpu.memory_space<vmem>>, %arg3: memref<1x32x96xbf16, #tpu.memory_space<vmem>>, %arg4: memref<1x16x8xf32, #tpu.memory_space<vmem>>, %arg5: memref<1x16x8xf32, #tpu.memory_space<vmem>>, %arg6: memref<1x32x8xf32, #tpu.memory_space<vmem>>, %arg7: memref<1x32x8xf32, #tpu.memory_space<vmem>>, %arg8: memref<1x16x32xbf16, #tpu.memory_space<vmem>>) attributes {dimension_semantics = [#tpu.dimension_semantics<parallel>, #tpu.dimension_semantics<parallel>], iteration_bounds = array<i64: 2, 2>, scalar_prefetch = 0 : i64, scratch_operands = 0 : i64, tpu.core_type = #tpu.core_type<tc>, window_params = [{transform_indices = @transform_0, window_bounds = array<i64: 1, 16, 96>}, {transform_indices = @transform_1, window_bounds = array<i64: 1, 32, 96>}, {transform_indices = @transform_2, window_bounds = array<i64: 1, 16, 8>}, {transform_indices = @transform_3, window_bounds = array<i64: 1, 16, 8>}, {transform_indices = @transform_4, window_bounds = array<i64: 1, 32, 8>}, {transform_indices = @transform_5, window_bounds = array<i64: 1, 32, 8>}, {transform_indices = @transform_6, window_bounds = array<i64: 1, 16, 32>}]} {
    %c0 = arith.constant 0 : index
    %c0_0 = arith.constant 0 : index
    %c0_1 = arith.constant 0 : index
    %0 = vector.load %arg2[%c0, %c0_0, %c0_1] : memref<1x16x96xbf16, #tpu.memory_space<vmem>>, vector<1x16x96xbf16>
    %1 = vector.shape_cast %0 : vector<1x16x96xbf16> to vector<16x96xbf16>
    %c0_2 = arith.constant 0 : index
    %c0_3 = arith.constant 0 : index
    %c0_4 = arith.constant 0 : index
    %2 = vector.load %arg3[%c0_2, %c0_3, %c0_4] : memref<1x32x96xbf16, #tpu.memory_space<vmem>>, vector<1x32x96xbf16>
    %3 = vector.shape_cast %2 : vector<1x32x96xbf16> to vector<32x96xbf16>
    %4 = vector.extract_strided_slice %1 {offsets = [0, 0], sizes = [16, 8], strides = [1, 1]} : vector<16x96xbf16> to vector<16x8xbf16>
    %5 = vector.extract_strided_slice %1 {offsets = [0, 8], sizes = [16, 8], strides = [1, 1]} : vector<16x96xbf16> to vector<16x8xbf16>
    %6 = vector.extract_strided_slice %1 {offsets = [0, 16], sizes = [16, 8], strides = [1, 1]} : vector<16x96xbf16> to vector<16x8xbf16>
    %7 = vector.extract_strided_slice %1 {offsets = [0, 24], sizes = [16, 8], strides = [1, 1]} : vector<16x96xbf16> to vector<16x8xbf16>
    %8 = vector.shape_cast %4 : vector<16x8xbf16> to vector<1x16x8xbf16>
    %9 = vector.shape_cast %5 : vector<16x8xbf16> to vector<1x16x8xbf16>
    %10 = vector.shape_cast %6 : vector<16x8xbf16> to vector<1x16x8xbf16>
    %11 = vector.shape_cast %7 : vector<16x8xbf16> to vector<1x16x8xbf16>
    %12 = tpu.concatenate %8, %9, %10, %11 in 0 : vector<1x16x8xbf16>, vector<1x16x8xbf16>, vector<1x16x8xbf16>, vector<1x16x8xbf16> -> vector<4x16x8xbf16>
    %13 = arith.extf %12 : vector<4x16x8xbf16> to vector<4x16x8xf32>
    %14 = vector.extract_strided_slice %3 {offsets = [0, 32], sizes = [32, 8], strides = [1, 1]} : vector<32x96xbf16> to vector<32x8xbf16>
    %15 = vector.extract_strided_slice %3 {offsets = [0, 40], sizes = [32, 8], strides = [1, 1]} : vector<32x96xbf16> to vector<32x8xbf16>
    %16 = vector.extract_strided_slice %3 {offsets = [0, 48], sizes = [32, 8], strides = [1, 1]} : vector<32x96xbf16> to vector<32x8xbf16>
    %17 = vector.extract_strided_slice %3 {offsets = [0, 56], sizes = [32, 8], strides = [1, 1]} : vector<32x96xbf16> to vector<32x8xbf16>
    %18 = vector.shape_cast %14 : vector<32x8xbf16> to vector<1x32x8xbf16>
    %19 = vector.shape_cast %15 : vector<32x8xbf16> to vector<1x32x8xbf16>
    %20 = vector.shape_cast %16 : vector<32x8xbf16> to vector<1x32x8xbf16>
    %21 = vector.shape_cast %17 : vector<32x8xbf16> to vector<1x32x8xbf16>
    %22 = tpu.concatenate %18, %19, %20, %21 in 0 : vector<1x32x8xbf16>, vector<1x32x8xbf16>, vector<1x32x8xbf16>, vector<1x32x8xbf16> -> vector<4x32x8xbf16>
    %23 = arith.extf %22 : vector<4x32x8xbf16> to vector<4x32x8xf32>
    %24 = vector.extract_strided_slice %3 {offsets = [0, 64], sizes = [32, 8], strides = [1, 1]} : vector<32x96xbf16> to vector<32x8xbf16>
    %25 = vector.extract_strided_slice %3 {offsets = [0, 72], sizes = [32, 8], strides = [1, 1]} : vector<32x96xbf16> to vector<32x8xbf16>
    %26 = vector.extract_strided_slice %3 {offsets = [0, 80], sizes = [32, 8], strides = [1, 1]} : vector<32x96xbf16> to vector<32x8xbf16>
    %27 = vector.extract_strided_slice %3 {offsets = [0, 88], sizes = [32, 8], strides = [1, 1]} : vector<32x96xbf16> to vector<32x8xbf16>
    %28 = vector.shape_cast %24 : vector<32x8xbf16> to vector<1x32x8xbf16>
    %29 = vector.shape_cast %25 : vector<32x8xbf16> to vector<1x32x8xbf16>
    %30 = vector.shape_cast %26 : vector<32x8xbf16> to vector<1x32x8xbf16>
    %31 = vector.shape_cast %27 : vector<32x8xbf16> to vector<1x32x8xbf16>
    %32 = tpu.concatenate %28, %29, %30, %31 in 0 : vector<1x32x8xbf16>, vector<1x32x8xbf16>, vector<1x32x8xbf16>, vector<1x32x8xbf16> -> vector<4x32x8xbf16>
    %c0_5 = arith.constant 0 : index
    %c0_6 = arith.constant 0 : index
    %c0_7 = arith.constant 0 : index
    %33 = vector.load %arg4[%c0_5, %c0_6, %c0_7] : memref<1x16x8xf32, #tpu.memory_space<vmem>>, vector<1x16x8xf32>
    %34 = vector.shape_cast %33 : vector<1x16x8xf32> to vector<16x8xf32>
    %c0_8 = arith.constant 0 : index
    %c0_9 = arith.constant 0 : index
    %c0_10 = arith.constant 0 : index
    %35 = vector.load %arg5[%c0_8, %c0_9, %c0_10] : memref<1x16x8xf32, #tpu.memory_space<vmem>>, vector<1x16x8xf32>
    %36 = vector.shape_cast %35 : vector<1x16x8xf32> to vector<16x8xf32>
    %37 = vector.shape_cast %34 : vector<16x8xf32> to vector<1x16x8xf32>
    %38 = vector.shape_cast %36 : vector<16x8xf32> to vector<1x16x8xf32>
    %39 = vector.extract_strided_slice %13 {offsets = [0, 0, 0], sizes = [4, 16, 4], strides = [1, 1, 1]} : vector<4x16x8xf32> to vector<4x16x4xf32>
    %40 = vector.extract_strided_slice %13 {offsets = [0, 0, 4], sizes = [4, 16, 4], strides = [1, 1, 1]} : vector<4x16x8xf32> to vector<4x16x4xf32>
    %cst = arith.constant 0.000000e+00 : f32
    %41 = vector.broadcast %cst : f32 to vector<4x16x4xf32>
    %42 = arith.subf %41, %40 : vector<4x16x4xf32>
    %43 = tpu.concatenate %42, %39 in 2 : vector<4x16x4xf32>, vector<4x16x4xf32> -> vector<4x16x8xf32>
    %44 = vector.broadcast %37 : vector<1x16x8xf32> to vector<4x16x8xf32>
    %45 = arith.mulf %13, %44 : vector<4x16x8xf32>
    %46 = vector.broadcast %38 : vector<1x16x8xf32> to vector<4x16x8xf32>
    %47 = arith.mulf %43, %46 : vector<4x16x8xf32>
    %48 = arith.addf %45, %47 : vector<4x16x8xf32>
    %c0_11 = arith.constant 0 : index
    %c0_12 = arith.constant 0 : index
    %c0_13 = arith.constant 0 : index
    %49 = vector.load %arg6[%c0_11, %c0_12, %c0_13] : memref<1x32x8xf32, #tpu.memory_space<vmem>>, vector<1x32x8xf32>
    %50 = vector.shape_cast %49 : vector<1x32x8xf32> to vector<32x8xf32>
    %c0_14 = arith.constant 0 : index
    %c0_15 = arith.constant 0 : index
    %c0_16 = arith.constant 0 : index
    %51 = vector.load %arg7[%c0_14, %c0_15, %c0_16] : memref<1x32x8xf32, #tpu.memory_space<vmem>>, vector<1x32x8xf32>
    %52 = vector.shape_cast %51 : vector<1x32x8xf32> to vector<32x8xf32>
    %53 = vector.shape_cast %50 : vector<32x8xf32> to vector<1x32x8xf32>
    %54 = vector.shape_cast %52 : vector<32x8xf32> to vector<1x32x8xf32>
    %55 = vector.extract_strided_slice %23 {offsets = [0, 0, 0], sizes = [4, 32, 4], strides = [1, 1, 1]} : vector<4x32x8xf32> to vector<4x32x4xf32>
    %56 = vector.extract_strided_slice %23 {offsets = [0, 0, 4], sizes = [4, 32, 4], strides = [1, 1, 1]} : vector<4x32x8xf32> to vector<4x32x4xf32>
    %cst_17 = arith.constant 0.000000e+00 : f32
    %57 = vector.broadcast %cst_17 : f32 to vector<4x32x4xf32>
    %58 = arith.subf %57, %56 : vector<4x32x4xf32>
    %59 = tpu.concatenate %58, %55 in 2 : vector<4x32x4xf32>, vector<4x32x4xf32> -> vector<4x32x8xf32>
    %60 = vector.broadcast %53 : vector<1x32x8xf32> to vector<4x32x8xf32>
    %61 = arith.mulf %23, %60 : vector<4x32x8xf32>
    %62 = vector.broadcast %54 : vector<1x32x8xf32> to vector<4x32x8xf32>
    %63 = arith.mulf %59, %62 : vector<4x32x8xf32>
    %64 = arith.addf %61, %63 : vector<4x32x8xf32>
    %65 = arith.truncf %48 : vector<4x16x8xf32> to vector<4x16x8xbf16>
    %66 = arith.truncf %64 : vector<4x32x8xf32> to vector<4x32x8xbf16>
    "tpu.trace_start"() <{level = 10 : i32, message = "hqd,hkd->hqk"}> : () -> ()
    %cst_18 = arith.constant dense<0.000000e+00> : vector<4x16x32xf32>
    %67 = tpu.matmul %65, %66, %cst_18 {dimension_numbers = #tpu.dot_dimension_numbers<[2], [2], [1], [1], [0, 0, 0, 1, 1, 1], [0], [0]>} : vector<4x16x8xbf16>, vector<4x32x8xbf16>, vector<4x16x32xf32> -> vector<4x16x32xf32>
    "tpu.trace_stop"() : () -> ()
    %cst_19 = arith.constant 0.353553385 : f32
    %68 = vector.broadcast %cst_19 : f32 to vector<4x16x32xf32>
    %69 = arith.mulf %67, %68 : vector<4x16x32xf32>
    %cst_20 = arith.constant dense<0xFF800000> : vector<4x16xf32>
    %70 = vector.multi_reduction <maximumf>, %69, %cst_20 [2] : vector<4x16x32xf32> to vector<4x16xf32>
    %71 = vector.shape_cast %70 : vector<4x16xf32> to vector<4x16x1xf32>
    %72 = vector.broadcast %71 : vector<4x16x1xf32> to vector<4x16x32xf32>
    %73 = arith.subf %69, %72 : vector<4x16x32xf32>
    %74 = math.exp %73 : vector<4x16x32xf32>
    %cst_21 = arith.constant dense<0.000000e+00> : vector<4x16xf32>
    %75 = vector.multi_reduction <add>, %74, %cst_21 [2] : vector<4x16x32xf32> to vector<4x16xf32>
    %76 = vector.shape_cast %75 : vector<4x16xf32> to vector<4x16x1xf32>
    %77 = vector.broadcast %76 : vector<4x16x1xf32> to vector<4x16x32xf32>
    %78 = arith.divf %74, %77 : vector<4x16x32xf32>
    %79 = arith.truncf %78 : vector<4x16x32xf32> to vector<4x16x32xbf16>
    "tpu.trace_start"() <{level = 10 : i32, message = "hqk,hkd->hqd"}> : () -> ()
    %cst_22 = arith.constant dense<0.000000e+00> : vector<4x16x8xf32>
    %80 = tpu.matmul %79, %32, %cst_22 {dimension_numbers = #tpu.dot_dimension_numbers<[2], [1], [1], [2], [0, 0, 0, 1, 1, 2], [0], [0]>} : vector<4x16x32xbf16>, vector<4x32x8xbf16>, vector<4x16x8xf32> -> vector<4x16x8xf32>
    "tpu.trace_stop"() : () -> ()
    %81 = vector.extract_strided_slice %80 {offsets = [0, 0, 0], sizes = [1, 16, 8], strides = [1, 1, 1]} : vector<4x16x8xf32> to vector<1x16x8xf32>
    %82 = vector.shape_cast %81 : vector<1x16x8xf32> to vector<16x8xf32>
    %83 = vector.extract_strided_slice %80 {offsets = [1, 0, 0], sizes = [1, 16, 8], strides = [1, 1, 1]} : vector<4x16x8xf32> to vector<1x16x8xf32>
    %84 = vector.shape_cast %83 : vector<1x16x8xf32> to vector<16x8xf32>
    %85 = vector.extract_strided_slice %80 {offsets = [2, 0, 0], sizes = [1, 16, 8], strides = [1, 1, 1]} : vector<4x16x8xf32> to vector<1x16x8xf32>
    %86 = vector.shape_cast %85 : vector<1x16x8xf32> to vector<16x8xf32>
    %87 = vector.extract_strided_slice %80 {offsets = [3, 0, 0], sizes = [1, 16, 8], strides = [1, 1, 1]} : vector<4x16x8xf32> to vector<1x16x8xf32>
    %88 = vector.shape_cast %87 : vector<1x16x8xf32> to vector<16x8xf32>
    %89 = tpu.concatenate %82, %84, %86, %88 in 1 : vector<16x8xf32>, vector<16x8xf32>, vector<16x8xf32>, vector<16x8xf32> -> vector<16x32xf32>
    %90 = arith.truncf %89 : vector<16x32xf32> to vector<16x32xbf16>
    %c0_23 = arith.constant 0 : index
    %c0_24 = arith.constant 0 : index
    %c0_25 = arith.constant 0 : index
    %91 = vector.load %arg8[%c0_23, %c0_24, %c0_25] : memref<1x16x32xbf16, #tpu.memory_space<vmem>>, vector<1x16x32xbf16>
    %92 = vector.shape_cast %91 : vector<1x16x32xbf16> to vector<16x32xbf16>
    %93 = vector.shape_cast %90 : vector<16x32xbf16> to vector<1x16x32xbf16>
    tpu.vector_store %arg8[%c0_23, %c0_24, %c0_25], %93 {strides = array<i32>} : memref<1x16x32xbf16, #tpu.memory_space<vmem>>, vector<1x16x32xbf16>,
    return
  }
  func.func @transform_0(%arg0: i32, %arg1: i32) -> (i32, i32, i32) {
    %c0_i32 = arith.constant 0 : i32
    %c0_i32_0 = arith.constant 0 : i32
    return %arg0, %arg1, %c0_i32 : i32, i32, i32
  }
  func.func @transform_1(%arg0: i32, %arg1: i32) -> (i32, i32, i32) {
    %c0_i32 = arith.constant 0 : i32
    %c0_i32_0 = arith.constant 0 : i32
    %c0_i32_1 = arith.constant 0 : i32
    return %arg0, %c0_i32, %c0_i32_0 : i32, i32, i32
  }
  func.func @transform_2(%arg0: i32, %arg1: i32) -> (i32, i32, i32) {
    %c0_i32 = arith.constant 0 : i32
    %c0_i32_0 = arith.constant 0 : i32
    return %arg0, %arg1, %c0_i32 : i32, i32, i32
  }
  func.func @transform_3(%arg0: i32, %arg1: i32) -> (i32, i32, i32) {
    %c0_i32 = arith.constant 0 : i32
    %c0_i32_0 = arith.constant 0 : i32
    return %arg0, %arg1, %c0_i32 : i32, i32, i32
  }
  func.func @transform_4(%arg0: i32, %arg1: i32) -> (i32, i32, i32) {
    %c0_i32 = arith.constant 0 : i32
    %c0_i32_0 = arith.constant 0 : i32
    %c0_i32_1 = arith.constant 0 : i32
    return %arg0, %c0_i32, %c0_i32_0 : i32, i32, i32
  }
  func.func @transform_5(%arg0: i32, %arg1: i32) -> (i32, i32, i32) {
    %c0_i32 = arith.constant 0 : i32
    %c0_i32_0 = arith.constant 0 : i32
    %c0_i32_1 = arith.constant 0 : i32
    return %arg0, %c0_i32, %c0_i32_0 : i32, i32, i32
  }
  func.func @transform_6(%arg0: i32, %arg1: i32) -> (i32, i32, i32) {
    %c0_i32 = arith.constant 0 : i32
    %c0_i32_0 = arith.constant 0 : i32
    return %arg0, %arg1, %c0_i32 : i32, i32, i32
  }
}

module attributes {stable_mosaic.version = 11 : i64} {
  func.func @kernel(%arg0: i32, %arg1: i32, %arg2: memref<32x32xbf16, #tpu.memory_space<vmem>>, %arg3: memref<1x32xf32, #tpu.memory_space<vmem>>, %arg4: memref<32x64xbf16, #tpu.memory_space<vmem>>, %arg5: memref<32x64xbf16, #tpu.memory_space<vmem>>, %arg6: memref<32x64xbf16, #tpu.memory_space<vmem>>) attributes {dimension_semantics = [#tpu.dimension_semantics<parallel>, #tpu.dimension_semantics<parallel>], iteration_bounds = array<i64: 1, 2>, scalar_prefetch = 0 : i64, scratch_operands = 0 : i64, tpu.core_type = #tpu.core_type<tc>, window_params = [{transform_indices = @transform_0, window_bounds = array<i64: 32, 32>}, {pipeline_mode = #tpu.pipeline_mode<synchronous>, transform_indices = @transform_1, window_bounds = array<i64: 1, 32>}, {transform_indices = @transform_2, window_bounds = array<i64: 32, 64>}, {transform_indices = @transform_3, window_bounds = array<i64: 32, 64>}, {transform_indices = @transform_4, window_bounds = array<i64: 32, 64>}]} {
    %c0 = arith.constant 0 : index
    %c0_0 = arith.constant 0 : index
    %0 = vector.load %arg2[%c0, %c0_0] : memref<32x32xbf16, #tpu.memory_space<vmem>>, vector<32x32xbf16>
    %1 = arith.extf %0 : vector<32x32xbf16> to vector<32x32xf32>
    %2 = arith.mulf %1, %1 : vector<32x32xf32>
    %cst = arith.constant dense<0.000000e+00> : vector<32xf32>
    %3 = vector.multi_reduction <add>, %2, %cst [1] : vector<32x32xf32> to vector<32xf32>
    %4 = vector.shape_cast %3 : vector<32xf32> to vector<32x1xf32>
    %cst_1 = arith.constant 3.200000e+01 : f32
    %5 = vector.broadcast %cst_1 : f32 to vector<32x1xf32>
    %6 = arith.divf %4, %5 : vector<32x1xf32>
    %cst_2 = arith.constant 9.99999997E-7 : f32
    %7 = vector.broadcast %cst_2 : f32 to vector<32x1xf32>
    %8 = arith.addf %6, %7 : vector<32x1xf32>
    %9 = math.rsqrt %8 : vector<32x1xf32>
    %10 = vector.broadcast %9 : vector<32x1xf32> to vector<32x32xf32>
    %11 = arith.mulf %1, %10 : vector<32x32xf32>
    %c0_3 = arith.constant 0 : index
    %c0_4 = arith.constant 0 : index
    %12 = vector.load %arg3[%c0_3, %c0_4] : memref<1x32xf32, #tpu.memory_space<vmem>>, vector<1x32xf32>
    %cst_5 = arith.constant 1.000000e+00 : f32
    %13 = vector.broadcast %cst_5 : f32 to vector<1x32xf32>
    %14 = arith.addf %13, %12 : vector<1x32xf32>
    %15 = vector.broadcast %14 : vector<1x32xf32> to vector<32x32xf32>
    %16 = arith.mulf %11, %15 : vector<32x32xf32>
    %17 = arith.truncf %16 : vector<32x32xf32> to vector<32x32xbf16>
    %c0_6 = arith.constant 0 : index
    %c0_7 = arith.constant 0 : index
    %18 = vector.load %arg4[%c0_6, %c0_7] : memref<32x64xbf16, #tpu.memory_space<vmem>>, vector<32x64xbf16>
    %cst_8 = arith.constant dense<0.000000e+00> : vector<32x64xf32>
    %19 = tpu.matmul %17, %18, %cst_8 {dimension_numbers = #tpu.dot_dimension_numbers<[1], [0], [0], [1], [0, 0, 1, 1], [], []>} : vector<32x32xbf16>, vector<32x64xbf16>, vector<32x64xf32> -> vector<32x64xf32>
    %c0_9 = arith.constant 0 : index
    %c0_10 = arith.constant 0 : index
    %20 = vector.load %arg5[%c0_9, %c0_10] : memref<32x64xbf16, #tpu.memory_space<vmem>>, vector<32x64xbf16>
    %cst_11 = arith.constant dense<0.000000e+00> : vector<32x64xf32>
    %21 = tpu.matmul %17, %20, %cst_11 {dimension_numbers = #tpu.dot_dimension_numbers<[1], [0], [0], [1], [0, 0, 1, 1], [], []>} : vector<32x32xbf16>, vector<32x64xbf16>, vector<32x64xf32> -> vector<32x64xf32>
    %cst_12 = arith.constant 5.000000e-01 : f32
    %22 = vector.broadcast %cst_12 : f32 to vector<32x64xf32>
    %23 = arith.mulf %22, %19 : vector<32x64xf32>
    %cst_13 = arith.constant 4.471500e-02 : f32
    %24 = vector.broadcast %cst_13 : f32 to vector<32x64xf32>
    %25 = arith.mulf %24, %19 : vector<32x64xf32>
    %26 = arith.mulf %25, %19 : vector<32x64xf32>
    %27 = arith.mulf %26, %19 : vector<32x64xf32>
    %28 = arith.addf %19, %27 : vector<32x64xf32>
    %cst_14 = arith.constant 0.797884583 : f32
    %29 = vector.broadcast %cst_14 : f32 to vector<32x64xf32>
    %30 = arith.mulf %29, %28 : vector<32x64xf32>
    %31 = math.tanh %30 : vector<32x64xf32>
    %cst_15 = arith.constant 1.000000e+00 : f32
    %32 = vector.broadcast %cst_15 : f32 to vector<32x64xf32>
    %33 = arith.addf %32, %31 : vector<32x64xf32>
    %34 = arith.mulf %23, %33 : vector<32x64xf32>
    %35 = arith.mulf %34, %21 : vector<32x64xf32>
    %36 = arith.truncf %35 : vector<32x64xf32> to vector<32x64xbf16>
    %c0_16 = arith.constant 0 : index
    %c0_17 = arith.constant 0 : index
    %37 = vector.load %arg6[%c0_16, %c0_17] : memref<32x64xbf16, #tpu.memory_space<vmem>>, vector<32x64xbf16>
    tpu.vector_store %arg6[%c0_16, %c0_17], %36 {strides = array<i32>} : memref<32x64xbf16, #tpu.memory_space<vmem>>, vector<32x64xbf16>,
    return
  }
  func.func @transform_0(%arg0: i32, %arg1: i32) -> (i32, i32) {
    %c0_i32 = arith.constant 0 : i32
    %c0_i32_0 = arith.constant 0 : i32
    return %arg1, %c0_i32 : i32, i32
  }
  func.func @transform_1(%arg0: i32, %arg1: i32) -> (i32, i32) {
    %c0_i32 = arith.constant 0 : i32
    %c0_i32_0 = arith.constant 0 : i32
    %c0_i32_1 = arith.constant 0 : i32
    return %c0_i32, %c0_i32_0 : i32, i32
  }
  func.func @transform_2(%arg0: i32, %arg1: i32) -> (i32, i32) {
    %c0_i32 = arith.constant 0 : i32
    %c0_i32_0 = arith.constant 0 : i32
    return %c0_i32, %arg0 : i32, i32
  }
  func.func @transform_3(%arg0: i32, %arg1: i32) -> (i32, i32) {
    %c0_i32 = arith.constant 0 : i32
    %c0_i32_0 = arith.constant 0 : i32
    return %c0_i32, %arg0 : i32, i32
  }
  func.func @transform_4(%arg0: i32, %arg1: i32) -> (i32, i32) {
    %c0_i32 = arith.constant 0 : i32
    return %arg1, %arg0 : i32, i32
  }
}

module attributes {stable_mosaic.version = 11 : i64} {
  func.func @kernel(%arg0: i32, %arg1: i32, %arg2: memref<32x64xbf16, #tpu.memory_space<vmem>>, %arg3: memref<64x32xbf16, #tpu.memory_space<vmem>>, %arg4: memref<32x32xbf16, #tpu.memory_space<vmem>>, %arg5: memref<32x32xbf16, #tpu.memory_space<vmem>>) attributes {dimension_semantics = [#tpu.dimension_semantics<parallel>, #tpu.dimension_semantics<parallel>], iteration_bounds = array<i64: 1, 2>, scalar_prefetch = 0 : i64, scratch_operands = 0 : i64, tpu.core_type = #tpu.core_type<tc>, window_params = [{transform_indices = @transform_0, window_bounds = array<i64: 32, 64>}, {transform_indices = @transform_1, window_bounds = array<i64: 64, 32>}, {transform_indices = @transform_2, window_bounds = array<i64: 32, 32>}, {transform_indices = @transform_3, window_bounds = array<i64: 32, 32>}]} {
    %c0 = arith.constant 0 : index
    %c0_0 = arith.constant 0 : index
    %0 = vector.load %arg2[%c0, %c0_0] : memref<32x64xbf16, #tpu.memory_space<vmem>>, vector<32x64xbf16>
    %c0_1 = arith.constant 0 : index
    %c0_2 = arith.constant 0 : index
    %1 = vector.load %arg3[%c0_1, %c0_2] : memref<64x32xbf16, #tpu.memory_space<vmem>>, vector<64x32xbf16>
    %cst = arith.constant dense<0.000000e+00> : vector<32x32xf32>
    %2 = tpu.matmul %0, %1, %cst {dimension_numbers = #tpu.dot_dimension_numbers<[1], [0], [0], [1], [0, 0, 1, 1], [], []>} : vector<32x64xbf16>, vector<64x32xbf16>, vector<32x32xf32> -> vector<32x32xf32>
    %c0_3 = arith.constant 0 : index
    %c0_4 = arith.constant 0 : index
    %3 = vector.load %arg4[%c0_3, %c0_4] : memref<32x32xbf16, #tpu.memory_space<vmem>>, vector<32x32xbf16>
    %4 = arith.extf %3 : vector<32x32xbf16> to vector<32x32xf32>
    %5 = arith.addf %2, %4 : vector<32x32xf32>
    %6 = arith.truncf %5 : vector<32x32xf32> to vector<32x32xbf16>
    %c0_5 = arith.constant 0 : index
    %c0_6 = arith.constant 0 : index
    %7 = vector.load %arg5[%c0_5, %c0_6] : memref<32x32xbf16, #tpu.memory_space<vmem>>, vector<32x32xbf16>
    tpu.vector_store %arg5[%c0_5, %c0_6], %6 {strides = array<i32>} : memref<32x32xbf16, #tpu.memory_space<vmem>>, vector<32x32xbf16>,
    return
  }
  func.func @transform_0(%arg0: i32, %arg1: i32) -> (i32, i32) {
    %c0_i32 = arith.constant 0 : i32
    %c0_i32_0 = arith.constant 0 : i32
    return %arg1, %c0_i32 : i32, i32
  }
  func.func @transform_1(%arg0: i32, %arg1: i32) -> (i32, i32) {
    %c0_i32 = arith.constant 0 : i32
    %c0_i32_0 = arith.constant 0 : i32
    return %c0_i32, %arg0 : i32, i32
  }
  func.func @transform_2(%arg0: i32, %arg1: i32) -> (i32, i32) {
    %c0_i32 = arith.constant 0 : i32
    return %arg1, %arg0 : i32, i32
  }
  func.func @transform_3(%arg0: i32, %arg1: i32) -> (i32, i32) {
    %c0_i32 = arith.constant 0 : i32
    return %arg1, %arg0 : i32, i32
  }
}

module attributes {stable_mosaic.version = 11 : i64} {
  func.func @kernel(%arg0: i32, %arg1: i32, %arg2: memref<32x32xbf16, #tpu.memory_space<vmem>>, %arg3: memref<1x32xf32, #tpu.memory_space<vmem>>, %arg4: memref<32x256xbf16, #tpu.memory_space<vmem>>, %arg5: memref<32x256xf32, #tpu.memory_space<vmem>>) attributes {dimension_semantics = [#tpu.dimension_semantics<parallel>, #tpu.dimension_semantics<parallel>], iteration_bounds = array<i64: 1, 2>, scalar_prefetch = 0 : i64, scratch_operands = 0 : i64, tpu.core_type = #tpu.core_type<tc>, window_params = [{transform_indices = @transform_0, window_bounds = array<i64: 32, 32>}, {pipeline_mode = #tpu.pipeline_mode<synchronous>, transform_indices = @transform_1, window_bounds = array<i64: 1, 32>}, {transform_indices = @transform_2, window_bounds = array<i64: 32, 256>}, {transform_indices = @transform_3, window_bounds = array<i64: 32, 256>}]} {
    %c0 = arith.constant 0 : index
    %c0_0 = arith.constant 0 : index
    %0 = vector.load %arg2[%c0, %c0_0] : memref<32x32xbf16, #tpu.memory_space<vmem>>, vector<32x32xbf16>
    %1 = arith.extf %0 : vector<32x32xbf16> to vector<32x32xf32>
    %2 = arith.mulf %1, %1 : vector<32x32xf32>
    %cst = arith.constant dense<0.000000e+00> : vector<32xf32>
    %3 = vector.multi_reduction <add>, %2, %cst [1] : vector<32x32xf32> to vector<32xf32>
    %4 = vector.shape_cast %3 : vector<32xf32> to vector<32x1xf32>
    %cst_1 = arith.constant 3.200000e+01 : f32
    %5 = vector.broadcast %cst_1 : f32 to vector<32x1xf32>
    %6 = arith.divf %4, %5 : vector<32x1xf32>
    %cst_2 = arith.constant 9.99999997E-7 : f32
    %7 = vector.broadcast %cst_2 : f32 to vector<32x1xf32>
    %8 = arith.addf %6, %7 : vector<32x1xf32>
    %9 = math.rsqrt %8 : vector<32x1xf32>
    %10 = vector.broadcast %9 : vector<32x1xf32> to vector<32x32xf32>
    %11 = arith.mulf %1, %10 : vector<32x32xf32>
    %c0_3 = arith.constant 0 : index
    %c0_4 = arith.constant 0 : index
    %12 = vector.load %arg3[%c0_3, %c0_4] : memref<1x32xf32, #tpu.memory_space<vmem>>, vector<1x32xf32>
    %cst_5 = arith.constant 1.000000e+00 : f32
    %13 = vector.broadcast %cst_5 : f32 to vector<1x32xf32>
    %14 = arith.addf %13, %12 : vector<1x32xf32>
    %15 = vector.broadcast %14 : vector<1x32xf32> to vector<32x32xf32>
    %16 = arith.mulf %11, %15 : vector<32x32xf32>
    %17 = arith.truncf %16 : vector<32x32xf32> to vector<32x32xbf16>
    %c0_6 = arith.constant 0 : index
    %c0_7 = arith.constant 0 : index
    %18 = vector.load %arg4[%c0_6, %c0_7] : memref<32x256xbf16, #tpu.memory_space<vmem>>, vector<32x256xbf16>
    %cst_8 = arith.constant dense<0.000000e+00> : vector<32x256xf32>
    %19 = tpu.matmul %17, %18, %cst_8 {dimension_numbers = #tpu.dot_dimension_numbers<[1], [0], [0], [1], [0, 0, 1, 1], [], []>} : vector<32x32xbf16>, vector<32x256xbf16>, vector<32x256xf32> -> vector<32x256xf32>
    %c0_9 = arith.constant 0 : index
    %c0_10 = arith.constant 0 : index
    %20 = vector.load %arg5[%c0_9, %c0_10] : memref<32x256xf32, #tpu.memory_space<vmem>>, vector<32x256xf32>
    tpu.vector_store %arg5[%c0_9, %c0_10], %19 {strides = array<i32>} : memref<32x256xf32, #tpu.memory_space<vmem>>, vector<32x256xf32>,
    return
  }
  func.func @transform_0(%arg0: i32, %arg1: i32) -> (i32, i32) {
    %c0_i32 = arith.constant 0 : i32
    %c0_i32_0 = arith.constant 0 : i32
    return %arg1, %c0_i32 : i32, i32
  }
  func.func @transform_1(%arg0: i32, %arg1: i32) -> (i32, i32) {
    %c0_i32 = arith.constant 0 : i32
    %c0_i32_0 = arith.constant 0 : i32
    %c0_i32_1 = arith.constant 0 : i32
    return %c0_i32, %c0_i32_0 : i32, i32
  }
  func.func @transform_2(%arg0: i32, %arg1: i32) -> (i32, i32) {
    %c0_i32 = arith.constant 0 : i32
    %c0_i32_0 = arith.constant 0 : i32
    return %c0_i32, %arg0 : i32, i32
  }
  func.func @transform_3(%arg0: i32, %arg1: i32) -> (i32, i32) {
    %c0_i32 = arith.constant 0 : i32
    return %arg1, %arg0 : i32, i32
  }
}

</mosaic_0001>

<bundles_post_ra>
// kernel: paligemma_forward.24
= control target key start
LH: loop header
LB: loop body
LE: loop exit
PB: predicated region body
PF: predicated region fallthrough
CT: control target
= control target key end

     0   :  { %s432_s15 = smov 0   ;;  %s467_s0 = inlined_call_operand.vmem [shape: f32[2,16,48], index: 0, kind: input, shape index: {}]   ;;  %s468_s1 = inlined_call_operand.vmem [shape: bf16[48,32], index: 1, kind: input, shape index: {}]   ;;  %s469_s2 = inlined_call_operand.vmem [shape: f32[1,32], index: 2, kind: input, shape index: {}]   ;;  %s470_s3 = inlined_call_operand.vmem [shape: f32[16,32], index: 3, kind: input, shape index: {}]   ;;  %s471_s4 = inlined_call_operand.vmem [shape: bf16[2,16,32], index: 4, kind: output, shape index: {}]  }
   0x1 LB: > { %s348_s16 = sadd.s32 4294967295, %s403_s15   ;;  %p352_p0 = scmp.ge.s32.totalorder %s403_s15, 1  ;;  %s403_s15 = sphi %s432_s15, %s14_s15  }
   0x2   : > { %p162_p1 = scmp.lt.s32.totalorder %s403_s15, 3 }
   0x4   : > { %p163_p2 = pnand %p352_p0, %p162_p1 }
   0x5   : > { %v394_v0 = vld [vmem:[%s468_s1] sm:$0xff] (!%p163_p2)   ;;  %v405_v1 = vmov (!%p163_p2), 0.0   ;;  %v395_v2 = vld [vmem:[%s468_s1 + $0x8] sm:$0xff] (!%p163_p2)   ;;  %vm406_vm0 = vmmov (!%p163_p2), 0   ;;  %p188_p3 = scmp.lt.s32.totalorder (!%p163_p2), %s348_s16, 1  ;;  %v396_v3 = vld [vmem:[%s468_s1 + $0x10] sm:$0xff] (!%p163_p2)  }
   0x6   : > { %166 = sbr.rel (%p163_p2) target bundleno = 240 (0xf0), region = 36  ;;  %374 = vmatprep.subr.bf16.mxu0 (!%p163_p2), %v405_v1  ;;  %380 = vmatprep.mubr.msk.bf16.mxu0 (!%p163_p2), %vm406_vm0, %v405_v1  ;;  %vm233_vm1 = vcmask (!%p163_p2), 392192   ;;  %v357_v7 = vld [vmem:[%s469_s2] ss:$0 sm:$0xff] (!%p163_p2)  ;;  %v279_v13 = vld [vmem:[%s470_s3 + $0x8] sm:$0xff] (!%p163_p2)  ;;  %vm290_vm2 = vcmask (!%p163_p2), 257024  }
   0x7   : > { %375 = vmatpush3.bf16.msra.mxu0 (!%p163_p2), %v394_v0  ;;  %v278_v9 = vld [vmem:[%s470_s3] sm:$0xff] (!%p163_p2) }
   0x8   : > { %376 = vmatprep.subr.bf16.mxu0 (!%p163_p2), %v405_v1 }
   0xb   : > { %377 = vmatpush3.bf16.msra.mxu0 (!%p163_p2), %v395_v2 }
   0xc   : > { %378 = vmatprep.subr.bf16.mxu0 (!%p163_p2), %v405_v1 }
   0xd   : > { %s473_s16 = smov (!%p188_p3, %s348_s16), 1 }
   0xe   : > { %s366_s23 = sshll.u32 %s473_s16, 4  ;;  %s367_s5 = sshll.u32 %s473_s16, 3 }
   0xf   : > { %s192_s26 = scalar_lea.vmem %s467_s0, %s366_s23  ;;  %379 = vmatpush3.bf16.msra.mxu0 %v396_v3  ;;  %s197_s10 = scalar_lea.vmem %s471_s4, %s367_s5 }
  0x10   : > { %v199_v4 = vld [vmem:[%s192_s26] sm:$0xff]  ;;  %v200_v5 = vld [vmem:[%s192_s26 + $0x8] sm:$0xff] }
  0x11   : > { %v201_v6 = vpack.c.bf16 %v200_v5, %v199_v4 }
  0x13   : > { %381 = vmatmul.mubr.msk.bf16.vlgmr.msra.gmra.mrb[0].mxu0 %vm233_vm1, %v201_v6 }
  0xe6   : > { %v271_v8 = vpop.f32.mrb[0].mxu0 }
  0xe7   : > { %v272_v10 = vadd.f32 %v357_v7, %v271_v8  ;;  %v382_v11 = vpop.f32.mrb[1].mxu0 }
  0xe8   : > { %v274_v12 = vpop.f32.mrb[2].mxu0 }
  0xe9   : > { %v280_v14 = vadd.f32 %v278_v9, %v272_v10  ;;  %v275_v15 = vadd.f32 %v357_v7, %v274_v12  ;;  %v383_v16 = vpop.f32.mrb[3].mxu0 }
  0xeb   : > { %v368_v17 = vpack.c.bf16 %v280_v14, %v280_v14  ;;  %v281_v18 = vadd.f32 %v279_v13, %v275_v15 }
  0xed   : > { %291 = vst.msk [vmem:[%s197_s10] sm:$0xf] %vm290_vm2, %v368_v17  ;;  %v369_v19 = vpack.c.bf16 %v281_v18, %v281_v18 }
  0xef   : > { %292 = vst.msk [vmem:[%s197_s10 + $0x4] sm:$0xf] %vm290_vm2, %v369_v19 }
  0xf0 PF: > { %s14_s15 = sadd.s32 1, %s403_s15  }
  0xf1   : > { %p11_p4 = scmp.ge.s32.totalorder %s14_s15, 4  }
  0xf3   :  { %13 = sbr.rel (!%p11_p4) target bundleno = 1 (0x1), region = 66 }

// kernel: paligemma_forward.27
= control target key start
LH: loop header
LB: loop body
LE: loop exit
PB: predicated region body
PF: predicated region fallthrough
CT: control target
= control target key end

     0   :  { %s614_s15 = smov 0   ;;  %s616_s16 = smov 0   ;;  %s659_s0 = inlined_call_operand.vmem [shape: bf16[32,32], index: 0, kind: input, shape index: {}]   ;;  %s660_s1 = inlined_call_operand.vmem [shape: bf16[32,32], index: 1, kind: input, shape index: {}]   ;;  %s661_s2 = inlined_call_operand.vmem [shape: f32[1,32], index: 2, kind: input, shape index: {}]   ;;  %s662_s3 = inlined_call_operand.vmem [shape: bf16[32,32], index: 3, kind: input, shape index: {}]   ;;  %s663_s4 = inlined_call_operand.vmem [shape: bf16[32,32], index: 4, kind: output, shape index: {}]  }
   0x1   :  { %s618_s17 = smov 0  }
   0x2 LB: > { %s23_s18 = sadd.s32 1, %s581_s16  ;;  %p501_p0 = scmp.ge.s32.totalorder %s585_s17, 1  ;;  %s585_s17 = sphi %s618_s17, %s14_s17   ;;  %s581_s16 = sphi %s616_s16, %s665_s16   ;;  %s577_s15 = sphi %s614_s15, %s664_s15  }
   0x3   : > { %p24_p1 = scmp.ge.s32.totalorder %s23_s18, 2  ;;  %p210_p2 = scmp.lt.s32.totalorder %s585_s17, 3 }
   0x5   : > { %s667_s18 = smov (%p24_p1, %s23_s18), 0  ;;  %p211_p3 = pnand %p501_p0, %p210_p2 }
   0x6   : > { %v560_v0 = vld [vmem:[%s660_s1] sm:$0xff] (!%p211_p3)   ;;  %v587_v1 = vmov (!%p211_p3), 0.0   ;;  %v561_v2 = vld [vmem:[%s660_s1 + $0x8] sm:$0xff] (!%p211_p3)   ;;  %vm588_vm0 = vmmov (!%p211_p3), 0   ;;  %s502_s23 = sshll.u32 (!%p211_p3), %s577_s15, 1  ;;  %vm316_vm1 = vcmask (!%p211_p3), 261120  }
   0x7   : > { %214 = sbr.rel (%p211_p3) target bundleno = 239 (0xef), region = 36  ;;  %526 = vmatprep.subr.bf16.mxu0 (!%p211_p3), %v587_v1  ;;  %530 = vmatprep.mubr.msk.bf16.mxu0 (!%p211_p3), %vm588_vm0, %v587_v1  ;;  %p255_p4 = scmp.lt.s32.totalorder (!%p211_p3), %s502_s23, 3  ;;  %v508_v5 = vld [vmem:[%s661_s2] ss:$0 sm:$0xff] (!%p211_p3)  ;;  %vm375_vm2 = vcmask (!%p211_p3), 257024  }
   0x8   : > { %527 = vmatpush3.bf16.msra.mxu0 (!%p211_p3), %v560_v0 }
   0x9   : > { %528 = vmatprep.subr.bf16.mxu0 (!%p211_p3), %v587_v1 }
   0xc   : > { %529 = vmatpush3.bf16.msra.mxu0 (!%p211_p3), %v561_v2 }
   0xe   : > { %s669_s23 = smov (!%p255_p4, %s502_s23), 3 }
   0xf   : > { %s503_s24 = sshll.u32 %s669_s23, 2 }
  0x10   : > { %s258_s27 = scalar_lea.vmem %s659_s0, %s503_s24  ;;  %s274_s30 = scalar_lea.vmem %s662_s3, %s503_s24 }
  0x11   : > { %v562_v3 = vld [vmem:[%s258_s27] sm:$0xff]   ;;  %s283_s9 = scalar_lea.vmem %s663_s4, %s503_s24 }
  0x12   : > { %531 = vmatmul.mubr.msk.bf16.vlgmr.msra.gmra.mrb[0].mxu0 %vm316_vm1, %v562_v3  ;;  %v520_v4 = vld [vmem:[%s274_s30] sm:$0xff]  }
  0x13   : > { %v521_v6 = vunpack.c.l.bf16 %v520_v4  ;;  %v522_v10 = vunpack.c.h.bf16 %v520_v4 }
  0xe5   : > { %v354_v7 = vpop.f32.mrb[0].mxu0 }
  0xe6   : > { %v355_v8 = vadd.f32 %v508_v5, %v354_v7  ;;  %v532_v9 = vpop.f32.mrb[1].mxu0 }
  0xe7   : > { %v357_v11 = vpop.f32.mrb[2].mxu0 }
  0xe8   : > { %v365_v12 = vadd.f32 %v521_v6, %v355_v8  ;;  %v358_v13 = vadd.f32 %v508_v5, %v357_v11  ;;  %v533_v14 = vpop.f32.mrb[3].mxu0 }
  0xea   : > { %v517_v15 = vpack.c.bf16 %v365_v12, %v365_v12  ;;  %v366_v16 = vadd.f32 %v522_v10, %v358_v13 }
  0xec   : > { %376 = vst.msk [vmem:[%s283_s9] sm:$0xf] %vm375_vm2, %v517_v15  ;;  %v518_v17 = vpack.c.bf16 %v366_v16, %v366_v16 }
  0xee   : > { %377 = vst.msk [vmem:[%s283_s9 + $0x4] sm:$0xf] %vm375_vm2, %v518_v17 }
  0xef PF: > { %s14_s17 = sadd.s32 1, %s585_s17   ;;  %s664_s15 = smov %s581_s16 }
  0xf0   : > { %p11_p5 = scmp.ge.s32.totalorder %s14_s17, 4   ;;  %s665_s16 = smov %s667_s18 }
  0xf2   :  { %13 = sbr.rel (!%p11_p5) target bundleno = 2 (0x2), region = 75 }

// kernel: paligemma_forward.25
= control target key start
LH: loop header
LB: loop body
LE: loop exit
PB: predicated region body
PF: predicated region fallthrough
CT: control target
= control target key end

     0   :  { %s637_s18 = smov 0   ;;  %s639_s19 = smov 0   ;;  %s697_s0 = inlined_call_operand.vmem [shape: bf16[32,32], index: 0, kind: input, shape index: {}]   ;;  %s698_s1 = inlined_call_operand.vmem [shape: f32[1,32], index: 1, kind: input, shape index: {}]   ;;  %s699_s2 = inlined_call_operand.vmem [shape: f32[1,32], index: 2, kind: input, shape index: {}]   ;;  %s700_s3 = inlined_call_operand.vmem [shape: bf16[32,96], index: 3, kind: input, shape index: {}]   ;;  %s701_s4 = inlined_call_operand.vmem [shape: f32[1,96], index: 4, kind: input, shape index: {}]   ;;  %s702_s5 = inlined_call_operand.vmem [shape: bf16[32,96], index: 5, kind: output, shape index: {}]  }
   0x1   :  { %s641_s20 = smov 0  }
   0x2 LB: > { %s24_s21 = sadd.s32 1, %s599_s19  ;;  %p517_p0 = scmp.ge.s32.totalorder %s603_s20, 1  ;;  %s603_s20 = sphi %s641_s20, %s15_s20   ;;  %s599_s19 = sphi %s639_s19, %s704_s19   ;;  %s595_s18 = sphi %s637_s18, %s703_s18  }
   0x3   : > { %p25_p1 = scmp.ge.s32.totalorder %s24_s21, 2  ;;  %p219_p2 = scmp.lt.s32.totalorder %s603_s20, 3 }
   0x5   : > { %s706_s21 = smov (%p25_p1, %s24_s21), 0  ;;  %p220_p3 = pnand %p517_p0, %p219_p2 }
   0x6   : > { %s518_s22 = sshll.u32 (!%p220_p3), %s595_s18, 1  ;;  %vm284_vm0 = vcmask (!%p220_p3), 261120   ;;  %v575_v15 = vld [vmem:[%s700_s3] sm:$0xff] (!%p220_p3)   ;;  %v605_v16 = vmov (!%p220_p3), 0.0   ;;  %v576_v17 = vld [vmem:[%s700_s3 + $0x8] sm:$0xff] (!%p220_p3)   ;;  %vm606_vm1 = vmmov (!%p220_p3), 0  }
   0x7   : > { %223 = sbr.rel (%p220_p3) target bundleno = 558 (0x22e), region = 40  ;;  %p258_p4 = scmp.lt.s32.totalorder (!%p220_p3), %s518_s22, 3  ;;  %541 = vmatprep.subr.bf16.mxu0 (!%p220_p3), %v605_v16  ;;  %545 = vmatprep.mubr.msk.bf16.mxu0 (!%p220_p3), %vm606_vm1, %v605_v16  ;;  %v522_v26 = vld [vmem:[%s698_s1] ss:$0 sm:$0xff] (!%p220_p3)  ;;  %vm406_vm2 = vcmask (!%p220_p3), 781312  }
   0x8   : > { %542 = vmatpush3.bf16.msra.mxu0 (!%p220_p3), %v575_v15  ;;  %v523_v30 = vld [vmem:[%s699_s2] ss:$0 sm:$0xff] (!%p220_p3) }
   0x9   : > { %543 = vmatprep.subr.bf16.mxu0 (!%p220_p3), %v605_v16  ;;  %v524_v35 = vld [vmem:[%s701_s4] ss:$0 sm:$0xff] (!%p220_p3) }
   0xc   : > { %544 = vmatpush3.bf16.msra.mxu0 (!%p220_p3), %v576_v17 }
   0xe   : > { %s708_s22 = smov (!%p258_p4, %s518_s22), 3 }
   0xf   : > { %s519_s23 = sshll.u32 %s708_s22, 2 }
  0x10   : > { %s261_s26 = scalar_lea.vmem %s697_s0, %s519_s23  ;;  %s277_s14 = scalar_lea.vmem %s702_s5, %s519_s23 }
  0x11   : > { %v535_v0 = vld [vmem:[%s261_s26] sm:$0xff]  }
  0x12   : > { %v536_v1 = vunpack.c.l.bf16 %v535_v0  ;;  %v537_v2 = vunpack.c.h.bf16 %v535_v0 }
  0x14   : > { %v285_v3 = vsel %vm284_vm0, %v536_v1, 0.0  ;;  %v288_v4 = vsel %vm284_vm0, %v537_v2, 0.0 }
  0x15   : > { %286 = vadd.xlane.f32.xlu0 %v285_v3 }
  0x19   : > { %289 = vadd.xlane.f32.xlu0 %v288_v4 }
  0xa2   : > { %v287_v5 = vpop.xlane.xlu0 %286 }
  0xa3   : > { %v292_v6 = vmul.f32 0.03125, %v287_v5 }
  0xa5   : > { %v294_v7 = vsub.f32 %v536_v1, %v292_v6 }
  0xa6   : > { %v290_v8 = vpop.xlane.xlu0 %289 }
  0xa7   : > { %v293_v9 = vmul.f32 0.03125, %v290_v8  ;;  %v296_v10 = vmul.f32 %v294_v7, %v294_v7 }
  0xa9   : > { %v295_v11 = vsub.f32 %v537_v2, %v293_v9  ;;  %v298_v12 = vsel %vm284_vm0, %v296_v10, 0.0 }
  0xaa   : > { %299 = vadd.xlane.f32.xlu1 %v298_v12 }
  0xab   : > { %v297_v13 = vmul.f32 %v295_v11, %v295_v11 }
  0xad   : > { %v301_v14 = vsel %vm284_vm0, %v297_v13, 0.0 }
  0xae   : > { %302 = vadd.xlane.f32.xlu1 %v301_v14 }
 0x137   : > { %v300_v18 = vpop.xlane.xlu1 %299 }
 0x138   : > { %v304_v19 = vmul.f32 0.03125, %v300_v18 }
 0x13a   : > { %v306_v20 = vadd.f32 1e-06, %v304_v19 }
 0x13b   : > { %v303_v21 = vpop.xlane.xlu1 %302 }
 0x13c   : > { %577 = vrsqrt.f32 %v306_v20  ;;  %v305_v22 = vmul.f32 0.03125, %v303_v21 }
 0x13e   : > { %v307_v23 = vadd.f32 1e-06, %v305_v22 }
 0x140   : > { %579 = vrsqrt.f32 %v307_v23 }
 0x146   : > { %v578_v24 = vpop.eup %577 }
 0x147   : > { %v310_v25 = vmul.f32 %v578_v24, %v294_v7 }
 0x149   : > { %v319_v29 = vmul.f32 %v522_v26, %v310_v25 }
 0x14a   : > { %v580_v27 = vpop.eup %579 }
 0x14b   : > { %v311_v28 = vmul.f32 %v580_v27, %v295_v11  ;;  %v328_v32 = vadd.f32 %v523_v30, %v319_v29 }
 0x14d   : > { %v320_v31 = vmul.f32 %v522_v26, %v311_v28 }
 0x14f   : > { %v329_v33 = vadd.f32 %v523_v30, %v320_v31 }
 0x151   : > { %v330_v34 = vpack.c.bf16 %v329_v33, %v328_v32 }
 0x153   : > { %546 = vmatmul.mubr.msk.bf16.vlgmr.msra.gmra.mrb[0].mxu0 %vm284_vm0, %v330_v34 }
 0x226   : > { %v391_v36 = vpop.f32.mrb[0].mxu0 }
 0x227   : > { %v392_v37 = vadd.f32 %v524_v35, %v391_v36  ;;  %v547_v38 = vpop.f32.mrb[1].mxu0 }
 0x228   : > { %v394_v39 = vpop.f32.mrb[2].mxu0 }
 0x229   : > { %v532_v40 = vpack.c.bf16 %v392_v37, %v392_v37  ;;  %v395_v41 = vadd.f32 %v524_v35, %v394_v39  ;;  %v548_v42 = vpop.f32.mrb[3].mxu0 }
 0x22b   : > { %407 = vst.msk [vmem:[%s277_s14] sm:$0xf] %vm406_vm2, %v532_v40  ;;  %v533_v43 = vpack.c.bf16 %v395_v41, %v395_v41 }
 0x22d   : > { %408 = vst.msk [vmem:[%s277_s14 + $0x4] sm:$0xf] %vm406_vm2, %v533_v43 }
 0x22e PF: > { %s15_s20 = sadd.s32 1, %s603_s20   ;;  %s703_s18 = smov %s599_s19 }
 0x22f   : > { %p12_p5 = scmp.ge.s32.totalorder %s15_s20, 4   ;;  %s704_s19 = smov %s706_s21 }
 0x231   :  { %14 = sbr.rel (!%p12_p5) target bundleno = 2 (0x2), region = 76 }

// kernel: paligemma_forward.26
= control target key start
LH: loop header
LB: loop body
LE: loop exit
PB: predicated region body
PF: predicated region fallthrough
CT: control target
= control target key end

     0   :  { %s1001_s9 = smov 0   ;;  %s1003_s10 = smov 0   ;;  %s1141_s0 = inlined_call_operand.vmem [shape: bf16[2,16,96], index: 0, kind: input, shape index: {}, may-alias: {0,1}]   ;;  %s1142_s1 = inlined_call_operand.vmem [shape: bf16[2,16,96], index: 1, kind: input, shape index: {}, may-alias: {0,1}]   ;;  %s1143_s2 = inlined_call_operand.vmem [shape: bf16[2,16,32], index: 2, kind: output, shape index: {}]  }
   0x1   :  { %s1005_s11 = smov 0   ;;  %s1007_s12 = smov 0  }
   0x2   :  { %s1009_s13 = smov 0  }
   0x3 LB: > { %s21_s14 = sadd.s32 1, %s966_s11  ;;  %s24_s15 = sadd.s32 1, %s970_s12  ;;  %s974_s13 = sphi %s1009_s13, %s12_s13   ;;  %s970_s12 = sphi %s1007_s12, %s1147_s12   ;;  %s966_s11 = sphi %s1005_s11, %s1146_s11   ;;  %s962_s10 = sphi %s1003_s10, %s1145_s10   ;;  %s958_s9 = sphi %s1001_s9, %s1144_s9  }
   0x4   : > { %p22_p0 = scmp.ge.s32.totalorder %s21_s14, 2  ;;  %p783_p1 = scmp.ge.s32.totalorder %s974_s13, 1 }
   0x5   : > { %p141_p2 = scmp.lt.s32.totalorder %s974_s13, 5 }
   0x6   : > { %s1149_s14 = smov (%p22_p0, %s21_s14), 0  ;;  %s1151_s15 = smov (!%p22_p0, %s24_s15), %s970_s12 }
   0x7   : > { %p142_p3 = pnand %p783_p1, %p141_p2  ;;  %p26_p4 = scmp.ge.s32.totalorder %s1151_s15, 2 }
   0x8   : > { %p174_p5 = scmp.lt.s32.totalorder (!%p142_p3), %s962_s10, 1  ;;  %v976_v1 = vmov (!%p142_p3), 0.0   ;;  %s977_s20 = smov (!%p142_p3), 112   ;;  %vm979_vm0 = vmmov (!%p142_p3), 0   ;;  %vm225_vm1 = vcmask (!%p142_p3), 64512   ;;  %vm429_vm2 = vcmask (!%p142_p3), 130048  }
   0x9   : > { %s1153_s15 = smov (%p26_p4, %s1151_s15), 0  ;;  %145 = sbr.rel (%p142_p3) target bundleno = 1133 (0x46d), region = 28 }
   0xa   : > { %821 = vmatprep.subr.bf16.mxu0 (!%p142_p3), %v976_v1  ;;  %827 = vmatprep.subr.bf16.mxu1 (!%p142_p3), %v976_v1  ;;  %s978_s21 = smov (!%p142_p3), 120   ;;  %s980_s22 = smov (!%p142_p3), 104   ;;  %vm676_vm3 = vcmask (!%p142_p3), 195584   ;;  %vm679_vm4 = vcmask (!%p142_p3), 257024  }
   0xb   : > { %823 = vmatprep.mubr.msk.bf16.mxu0 (!%p142_p3), %vm979_vm0, %v976_v1  ;;  %829 = vmatprep.mubr.msk.bf16.mxu1 (!%p142_p3), %vm979_vm0, %v976_v1  ;;  %s981_s23 = smov (!%p142_p3), 96   ;;  %p176_p6 = scmp.lt.s32.totalorder (!%p142_p3), %s958_s9, 1 }
   0xc   : > { %s982_s30 = smov (!%p142_p3), 64   ;;  %s983_s3 = smov (!%p142_p3), 8  }
   0xd   : > { %s984_s4 = smov (!%p142_p3), 16   ;;  %s985_s5 = smov (!%p142_p3), 24  }
  0x10   : > { %s1155_s10 = smov (!%p174_p5, %s962_s10), 1  ;;  %s1157_s9 = smov (!%p176_p6, %s958_s9), 1 }
  0x11   : > { %s804_s16 = sshll.u32 %s1155_s10, 3  ;;  %s784_s24 = sshll.u32 %s1155_s10, 1 }
  0x12   : > { %s186_s19 = scalar_lea.vmem %s1142_s1, %s804_s16  ;;  %s1053_s25 = sadd.s32 %s784_s24, %s1157_s9 }
  0x13   : > { %v197_v0 = vld [vmem:[%s186_s19] sm:$0xf]  ;;  %v198_v2 = vld [vmem:[%s186_s19 + $0x4] sm:$0xf]  ;;  %s785_s26 = sshll.u32 %s1053_s25, 2 }
  0x14   : > { %212 = vrot.lane.b32.xlu1 %v197_v0, %s977_s20  ;;  %208 = vrot.lane.b32.xlu0 %v197_v0, %s978_s21  ;;  %v1048_v3 = vcombine.low %v197_v0, %v198_v2  ;;  %s181_s29 = scalar_lea.vmem %s1141_s0, %s785_s26  ;;  %s194_s8 = scalar_lea.vmem %s1143_s2, %s785_s26 }
  0x15   : > { %v196_v12 = vld [vmem:[%s181_s29] sm:$0xf] }
  0x18   : > { %214 = vrot.lane.b32.xlu1 %v198_v2, %s977_s20  ;;  %210 = vrot.lane.b32.xlu0 %v198_v2, %s978_s21 }
  0x1c   : > { %216 = vrot.lane.b32.xlu0 %v197_v0, %s980_s22  ;;  %218 = vrot.lane.b32.xlu1 %v198_v2, %s980_s22 }
  0x20   : > { %223 = vrot.lane.b32.xlu0 %v1048_v3, %s981_s23 }
  0x86   : > { %v213_v4 = vpop.permute.xlu1 %212  ;;  %v209_v5 = vpop.permute.xlu0 %208 }
  0x8a   : > { %v215_v6 = vpop.permute.xlu1 %214  ;;  %v211_v7 = vpop.permute.xlu0 %210 }
  0x8b   : > { %v1056_v8 = vcombine.low %v213_v4, %v215_v6  ;;  %v1058_v9 = vcombine.low %v209_v5, %v211_v7 }
  0x8d   : > { %275 = vrot.lane.b32.xlu1 %v1058_v9, %s981_s23  ;;  %326 = vrot.lane.b32.xlu0 %v1056_v8, %s981_s23 }
  0x8e   : > { %v217_v10 = vpop.permute.xlu0 %216  ;;  %v219_v11 = vpop.permute.xlu1 %218 }
  0x8f   : > { %v1067_v13 = vcombine.low %v217_v10, %v219_v11 }
  0x91   : > { %377 = vrot.lane.b32.xlu0 %v1067_v13, %s981_s23  ;;  %200 = vrot.lane.b32.xlu1 %v196_v12, %s978_s21 }
  0x92   : > { %v224_v14 = vpop.permute.xlu0 %223 }
  0x93   : > { %v230_v15 = vsel %vm225_vm1, %v224_v14, 0 }
  0x94   : > { %822 = vmatpush3.bf16.xpose.msra.mxu0 %v230_v15 }
  0x95   : > { %202 = vrot.lane.b32.xlu1 %v196_v12, %s977_s20  ;;  %204 = vrot.lane.b32.xlu0 %v196_v12, %s980_s22 }
  0x96   : > { %833 = vmatprep.subr.bf16.mxu0 %v976_v1 }
  0x9b   : > { %824 = vmatmul.mubr.msk.bf16.vlgmr.msra.gmra.mrb[0].mxu0 %vm225_vm1, %v196_v12 }
  0x9c   : > { %835 = vmatprep.mubr.msk.bf16.mxu0 %vm979_vm0, %v976_v1 }
  0xff   : > { %v276_v16 = vpop.permute.xlu1 %275  ;;  %v327_v17 = vpop.permute.xlu0 %326 }
 0x100   : > { %v332_v18 = vsel %vm225_vm1, %v327_v17, 0  ;;  %v281_v19 = vsel %vm225_vm1, %v276_v16, 0 }
 0x101   : > { %828 = vmatpush3.bf16.xpose.msra.mxu1 %v281_v19  ;;  %834 = vmatpush3.bf16.xpose.msra.mxu0 %v332_v18 }
 0x102   : > { %839 = vmatprep.subr.bf16.mxu1 %v976_v1  ;;  %845 = vmatprep.subr.bf16.mxu0 %v976_v1 }
 0x103   : > { %v378_v20 = vpop.permute.xlu0 %377  ;;  %v201_v21 = vpop.permute.xlu1 %200 }
 0x104   : > { %v383_v22 = vsel %vm225_vm1, %v378_v20, 0 }
 0x107   : > { %v203_v23 = vpop.permute.xlu1 %202  ;;  %v205_v24 = vpop.permute.xlu0 %204 }
 0x108   : > { %830 = vmatmul.mubr.msk.bf16.vlgmr.msra.gmra.mrb[0].mxu1 %vm225_vm1, %v201_v21  ;;  %836 = vmatmul.mubr.msk.bf16.vlgmr.msra.gmra.mrb[4].mxu0 %vm225_vm1, %v203_v23 }
 0x109   : > { %840 = vmatpush3.bf16.xpose.msra.mxu1 %v383_v22  ;;  %841 = vmatprep.mubr.msk.bf16.mxu1 %vm979_vm0, %v976_v1 }
 0x10a   : > { %851 = vmatprep.subr.bf16.mxu1 %v976_v1  ;;  %847 = vmatprep.mubr.msk.bf16.mxu0 %vm979_vm0, %v976_v1 }
 0x110   : > { %842 = vmatmul.mubr.msk.bf16.vlgmr.msra.gmra.mrb[4].mxu1 %vm225_vm1, %v205_v24 }
 0x111   : > { %853 = vmatprep.mubr.msk.bf16.mxu1 %vm979_vm0, %v976_v1 }
 0x16e   : > { %v266_v25 = vpop.f32.mrb[0].mxu0 }
 0x16f   : > { %v425_v26 = vmul.f32 0.35355338, %v266_v25  ;;  %v825_v27 = vpop.f32.mrb[1].mxu0 }
 0x170   : > { %v269_v28 = vpop.f32.mrb[2].mxu0 }
 0x171   : > { %v430_v29 = vsel %vm429_vm2, %v425_v26, -inf  ;;  %v826_v30 = vpop.f32.mrb[3].mxu0 }
 0x172   : > { %431 = vmax.xlane.f32.xlu1 %v430_v29 }
 0x1db   : > { %v317_v31 = vpop.f32.mrb[0].mxu1  ;;  %v368_v32 = vpop.f32.mrb[4].mxu0 }
 0x1dc   : > { %v426_v33 = vmul.f32 0.35355338, %v317_v31  ;;  %v831_v34 = vpop.f32.mrb[1].mxu1  ;;  %v427_v35 = vmul.f32 0.35355338, %v368_v32  ;;  %v837_v36 = vpop.f32.mrb[5].mxu0 }
 0x1dd   : > { %v320_v37 = vpop.f32.mrb[2].mxu1  ;;  %v371_v38 = vpop.f32.mrb[6].mxu0 }
 0x1de   : > { %v832_v39 = vpop.f32.mrb[3].mxu1  ;;  %v433_v40 = vsel %vm429_vm2, %v426_v33, -inf  ;;  %v838_v41 = vpop.f32.mrb[7].mxu0  ;;  %v436_v42 = vsel %vm429_vm2, %v427_v35, -inf }
 0x1df   : > { %434 = vmax.xlane.f32.xlu0 %v433_v40 }
 0x1e3   : > { %v419_v43 = vpop.f32.mrb[4].mxu1  ;;  %437 = vmax.xlane.f32.xlu0 %v436_v42 }
 0x1e4   : > { %v428_v44 = vmul.f32 0.35355338, %v419_v43  ;;  %v843_v45 = vpop.f32.mrb[5].mxu1 }
 0x1e5   : > { %v422_v46 = vpop.f32.mrb[6].mxu1 }
 0x1e6   : > { %v844_v47 = vpop.f32.mrb[7].mxu1  ;;  %v439_v48 = vsel %vm429_vm2, %v428_v44, -inf }
 0x1e7   : > { %440 = vmax.xlane.f32.xlu1 %v439_v48 }
 0x1f8   : > { %524 = vrot.lane.b32.xlu1 %v1058_v9, %s982_s30 }
 0x1f9   : > { %478 = vrot.lane.b32.xlu0 %v1048_v3, %s982_s30 }
 0x1ff   : > { %v432_v49 = vpop.xlane.xlu1 %431 }
 0x200   : > { %v442_v50 = vsub.f32 %v425_v26, %v432_v49 }
 0x202   : > { %v446_v51 = vmul.f32 1.442695, %v442_v50 }
 0x204   : > { %920 = vpow2.f32 %v446_v51 }
 0x20e   : > { %v921_v52 = vpop.eup %920 }
 0x20f   : > { %v454_v53 = vsel %vm429_vm2, %v921_v52, 0.0 }
 0x218   : > { %455 = vadd.xlane.f32.xlu0 %v454_v53 }
 0x26c   : > { %v435_v54 = vpop.xlane.xlu0 %434 }
 0x26d   : > { %v443_v55 = vsub.f32 %v426_v33, %v435_v54 }
 0x26f   : > { %v448_v56 = vmul.f32 1.442695, %v443_v55 }
 0x270   : > { %v438_v57 = vpop.xlane.xlu0 %437 }
 0x271   : > { %922 = vpow2.f32 %v448_v56  ;;  %v444_v58 = vsub.f32 %v427_v35, %v438_v57 }
 0x273   : > { %v450_v59 = vmul.f32 1.442695, %v444_v58 }
 0x274   : > { %v441_v60 = vpop.xlane.xlu1 %440  ;;  %v479_v61 = vpop.permute.xlu0 %478 }
 0x275   : > { %924 = vpow2.f32 %v450_v59  ;;  %v445_v62 = vsub.f32 %v428_v44, %v441_v60  ;;  %846 = vmatpush3.bf16.msra.mxu0 %v479_v61 }
 0x276   : > { %857 = vmatprep.subr.bf16.mxu0 %v976_v1 }
 0x277   : > { %v452_v63 = vmul.f32 1.442695, %v445_v62 }
 0x278   : > { %v525_v0 = vpop.permute.xlu1 %524 }
 0x279   : > { %926 = vpow2.f32 %v452_v63  ;;  %852 = vmatpush3.bf16.msra.mxu1 %v525_v0 }
 0x27a   : > { %863 = vmatprep.subr.bf16.mxu1 %v976_v1 }
 0x27b   : > { %v923_v2 = vpop.eup %922 }
 0x27c   : > { %v457_v3 = vsel %vm429_vm2, %v923_v2, 0.0 }
 0x27d   : > { %458 = vadd.xlane.f32.xlu1 %v457_v3 }
 0x27f   : > { %v925_v4 = vpop.eup %924 }
 0x280   : > { %v460_v5 = vsel %vm429_vm2, %v925_v4, 0.0 }
 0x281   : > { %461 = vadd.xlane.f32.xlu0 %v460_v5 }
 0x283   : > { %v927_v6 = vpop.eup %926 }
 0x284   : > { %v463_v7 = vsel %vm429_vm2, %v927_v6, 0.0 }
 0x285   : > { %464 = vadd.xlane.f32.xlu1 %v463_v7 }
 0x296   : > { %570 = vrot.lane.b32.xlu1 %v1056_v8, %s982_s30 }
 0x297   : > { %616 = vrot.lane.b32.xlu0 %v1067_v13, %s982_s30 }
 0x2a5   : > { %v456_v9 = vpop.xlane.xlu0 %455 }
 0x2a6   : > { %928 = vrcp.f32 %v456_v9 }
 0x2b0   : > { %v929_v10 = vpop.eup %928 }
 0x2b1   : > { %v467_v11 = vmul.f32 %v929_v10, %v921_v52 }
 0x2b3   : > { %v474_v12 = vpack.c.bf16 %v467_v11, %v467_v11 }
 0x2b5   : > { %848 = vmatmul.mubr.msk.bf16.vlgmr.msra.gmra.mrb[8].mxu0 %vm429_vm2, %v474_v12 }
 0x2b6   : > { %859 = vmatprep.mubr.msk.bf16.mxu0 %vm979_vm0, %v976_v1 }
 0x30a   : > { %v459_v14 = vpop.xlane.xlu1 %458 }
 0x30b   : > { %930 = vrcp.f32 %v459_v14 }
 0x30e   : > { %v462_v15 = vpop.xlane.xlu0 %461 }
 0x30f   : > { %932 = vrcp.f32 %v462_v15 }
 0x312   : > { %v465_v16 = vpop.xlane.xlu1 %464  ;;  %v617_v21 = vpop.permute.xlu0 %616 }
 0x313   : > { %934 = vrcp.f32 %v465_v16 }
 0x315   : > { %v931_v8 = vpop.eup %930 }
 0x316   : > { %v469_v17 = vmul.f32 %v931_v8, %v923_v2  ;;  %v571_v18 = vpop.permute.xlu1 %570 }
 0x317   : > { %858 = vmatpush3.bf16.msra.mxu0 %v571_v18 }
 0x318   : > { %v475_v13 = vpack.c.bf16 %v469_v17, %v469_v17 }
 0x319   : > { %v933_v19 = vpop.eup %932 }
 0x31a   : > { %v471_v20 = vmul.f32 %v933_v19, %v925_v4  ;;  %854 = vmatmul.mubr.msk.bf16.vlgmr.msra.gmra.mrb[8].mxu1 %vm429_vm2, %v475_v13 }
 0x31b   : > { %864 = vmatpush3.bf16.msra.mxu1 %v617_v21  ;;  %865 = vmatprep.mubr.msk.bf16.mxu1 %vm979_vm0, %v976_v1 }
 0x31c   : > { %v476_v22 = vpack.c.bf16 %v471_v20, %v471_v20 }
 0x31d   : > { %v935_v23 = vpop.eup %934 }
 0x31e   : > { %v473_v24 = vmul.f32 %v935_v23, %v927_v6  ;;  %860 = vmatmul.mubr.msk.bf16.vlgmr.msra.gmra.mrb[12].mxu0 %vm429_vm2, %v476_v22 }
 0x320   : > { %v477_v25 = vpack.c.bf16 %v473_v24, %v473_v24 }
 0x322   : > { %866 = vmatmul.mubr.msk.bf16.vlgmr.msra.gmra.mrb[12].mxu1 %vm429_vm2, %v477_v25 }
 0x388   : > { %v518_v26 = vpop.f32.mrb[8].mxu0 }
 0x389   : > { %v849_v27 = vpop.f32.mrb[9].mxu0 }
 0x38a   : > { %v521_v28 = vpop.f32.mrb[10].mxu0 }
 0x38b   : > { %v850_v29 = vpop.f32.mrb[11].mxu0 }
 0x3ed   : > { %v564_v30 = vpop.f32.mrb[8].mxu1 }
 0x3ee   : > { %663 = vrot.lane.b32.xlu1 %v564_v30, %s983_s3  ;;  %v855_v31 = vpop.f32.mrb[9].mxu1 }
 0x3ef   : > { %v567_v32 = vpop.f32.mrb[10].mxu1 }
 0x3f0   : > { %v856_v33 = vpop.f32.mrb[11].mxu1 }
 0x3f1   : > { %v610_v34 = vpop.f32.mrb[12].mxu0 }
 0x3f2   : > { %667 = vrot.lane.b32.xlu0 %v610_v34, %s984_s4  ;;  %v861_v1 = vpop.f32.mrb[13].mxu0 }
 0x3f3   : > { %v613_v35 = vpop.f32.mrb[14].mxu0 }
 0x3f4   : > { %v862_v36 = vpop.f32.mrb[15].mxu0 }
 0x3f5   : > { %v656_v37 = vpop.f32.mrb[12].mxu1 }
 0x3f6   : > { %671 = vrot.lane.b32.xlu1 %v656_v37, %s985_s5  ;;  %v867_v38 = vpop.f32.mrb[13].mxu1 }
 0x3f7   : > { %v659_v39 = vpop.f32.mrb[14].mxu1 }
 0x3f8   : > { %v868_v40 = vpop.f32.mrb[15].mxu1 }
 0x460   : > { %v664_v41 = vpop.permute.xlu1 %663 }
 0x461   : > { %v674_v43 = vsel %vm225_vm1, %v518_v26, %v664_v41 }
 0x464   : > { %v668_v42 = vpop.permute.xlu0 %667 }
 0x465   : > { %v675_v44 = vsel %vm429_vm2, %v674_v43, %v668_v42 }
 0x468   : > { %v672_v45 = vpop.permute.xlu1 %671 }
 0x469   : > { %v677_v46 = vsel %vm676_vm3, %v675_v44, %v672_v45 }
 0x46a   : > { %v678_v47 = vpack.c.bf16 %v677_v46, %v677_v46 }
 0x46c   : > { %680 = vst.msk [vmem:[%s194_s8] sm:$0xf] %vm679_vm4, %v678_v47 }
 0x46d PF: > { %s12_s13 = sadd.s32 1, %s974_s13   ;;  %s1144_s9 = smov %s966_s11 }
 0x46e   : > { %p9_p7 = scmp.ge.s32.totalorder %s12_s13, 6   ;;  %s1145_s10 = smov %s970_s12 }
 0x46f   : > { %s1146_s11 = smov %s1149_s14  ;;  %s1147_s12 = smov %s1153_s15 }
 0x470   :  { %11 = sbr.rel (!%p9_p7) target bundleno = 3 (0x3), region = 61 }

// kernel: paligemma_forward.35
= control target key start
LH: loop header
LB: loop body
LE: loop exit
PB: predicated region body
PF: predicated region fallthrough
CT: control target
= control target key end

     0   :  { %s637_s18 = smov 0   ;;  %s639_s19 = smov 0   ;;  %s697_s0 = inlined_call_operand.vmem [shape: bf16[32,32], index: 0, kind: input, shape index: {}]   ;;  %s698_s1 = inlined_call_operand.vmem [shape: f32[1,32], index: 1, kind: input, shape index: {}]   ;;  %s699_s2 = inlined_call_operand.vmem [shape: f32[1,32], index: 2, kind: input, shape index: {}]   ;;  %s700_s3 = inlined_call_operand.vmem [shape: bf16[32,32], index: 3, kind: input, shape index: {}]   ;;  %s701_s4 = inlined_call_operand.vmem [shape: f32[1,32], index: 4, kind: input, shape index: {}]   ;;  %s702_s5 = inlined_call_operand.vmem [shape: bf16[32,32], index: 5, kind: output, shape index: {}]  }
   0x1   :  { %s641_s20 = smov 0  }
   0x2 LB: > { %s24_s21 = sadd.s32 1, %s599_s19  ;;  %p517_p0 = scmp.ge.s32.totalorder %s603_s20, 1  ;;  %s603_s20 = sphi %s641_s20, %s15_s20   ;;  %s599_s19 = sphi %s639_s19, %s704_s19   ;;  %s595_s18 = sphi %s637_s18, %s703_s18  }
   0x3   : > { %p25_p1 = scmp.ge.s32.totalorder %s24_s21, 2  ;;  %p219_p2 = scmp.lt.s32.totalorder %s603_s20, 3 }
   0x5   : > { %s706_s21 = smov (%p25_p1, %s24_s21), 0  ;;  %p220_p3 = pnand %p517_p0, %p219_p2 }
   0x6   : > { %s518_s22 = sshll.u32 (!%p220_p3), %s595_s18, 1  ;;  %vm284_vm0 = vcmask (!%p220_p3), 261120   ;;  %v575_v15 = vld [vmem:[%s700_s3] sm:$0xff] (!%p220_p3)   ;;  %v605_v16 = vmov (!%p220_p3), 0.0   ;;  %v576_v17 = vld [vmem:[%s700_s3 + $0x8] sm:$0xff] (!%p220_p3)   ;;  %vm606_vm1 = vmmov (!%p220_p3), 0  }
   0x7   : > { %223 = sbr.rel (%p220_p3) target bundleno = 558 (0x22e), region = 40  ;;  %p258_p4 = scmp.lt.s32.totalorder (!%p220_p3), %s518_s22, 3  ;;  %541 = vmatprep.subr.bf16.mxu0 (!%p220_p3), %v605_v16  ;;  %545 = vmatprep.mubr.msk.bf16.mxu0 (!%p220_p3), %vm606_vm1, %v605_v16  ;;  %v522_v26 = vld [vmem:[%s698_s1] ss:$0 sm:$0xff] (!%p220_p3)  ;;  %vm406_vm2 = vcmask (!%p220_p3), 257024  }
   0x8   : > { %542 = vmatpush3.bf16.msra.mxu0 (!%p220_p3), %v575_v15  ;;  %v523_v30 = vld [vmem:[%s699_s2] ss:$0 sm:$0xff] (!%p220_p3) }
   0x9   : > { %543 = vmatprep.subr.bf16.mxu0 (!%p220_p3), %v605_v16  ;;  %v524_v35 = vld [vmem:[%s701_s4] ss:$0 sm:$0xff] (!%p220_p3) }
   0xc   : > { %544 = vmatpush3.bf16.msra.mxu0 (!%p220_p3), %v576_v17 }
   0xe   : > { %s708_s22 = smov (!%p258_p4, %s518_s22), 3 }
   0xf   : > { %s519_s23 = sshll.u32 %s708_s22, 2 }
  0x10   : > { %s261_s26 = scalar_lea.vmem %s697_s0, %s519_s23  ;;  %s277_s14 = scalar_lea.vmem %s702_s5, %s519_s23 }
  0x11   : > { %v535_v0 = vld [vmem:[%s261_s26] sm:$0xff]  }
  0x12   : > { %v536_v1 = vunpack.c.l.bf16 %v535_v0  ;;  %v537_v2 = vunpack.c.h.bf16 %v535_v0 }
  0x14   : > { %v285_v3 = vsel %vm284_vm0, %v536_v1, 0.0  ;;  %v288_v4 = vsel %vm284_vm0, %v537_v2, 0.0 }
  0x15   : > { %286 = vadd.xlane.f32.xlu0 %v285_v3 }
  0x19   : > { %289 = vadd.xlane.f32.xlu0 %v288_v4 }
  0xa2   : > { %v287_v5 = vpop.xlane.xlu0 %286 }
  0xa3   : > { %v292_v6 = vmul.f32 0.03125, %v287_v5 }
  0xa5   : > { %v294_v7 = vsub.f32 %v536_v1, %v292_v6 }
  0xa6   : > { %v290_v8 = vpop.xlane.xlu0 %289 }
  0xa7   : > { %v293_v9 = vmul.f32 0.03125, %v290_v8  ;;  %v296_v10 = vmul.f32 %v294_v7, %v294_v7 }
  0xa9   : > { %v295_v11 = vsub.f32 %v537_v2, %v293_v9  ;;  %v298_v12 = vsel %vm284_vm0, %v296_v10, 0.0 }
  0xaa   : > { %299 = vadd.xlane.f32.xlu1 %v298_v12 }
  0xab   : > { %v297_v13 = vmul.f32 %v295_v11, %v295_v11 }
  0xad   : > { %v301_v14 = vsel %vm284_vm0, %v297_v13, 0.0 }
  0xae   : > { %302 = vadd.xlane.f32.xlu1 %v301_v14 }
 0x137   : > { %v300_v18 = vpop.xlane.xlu1 %299 }
 0x138   : > { %v304_v19 = vmul.f32 0.03125, %v300_v18 }
 0x13a   : > { %v306_v20 = vadd.f32 1e-06, %v304_v19 }
 0x13b   : > { %v303_v21 = vpop.xlane.xlu1 %302 }
 0x13c   : > { %577 = vrsqrt.f32 %v306_v20  ;;  %v305_v22 = vmul.f32 0.03125, %v303_v21 }
 0x13e   : > { %v307_v23 = vadd.f32 1e-06, %v305_v22 }
 0x140   : > { %579 = vrsqrt.f32 %v307_v23 }
 0x146   : > { %v578_v24 = vpop.eup %577 }
 0x147   : > { %v310_v25 = vmul.f32 %v578_v24, %v294_v7 }
 0x149   : > { %v319_v29 = vmul.f32 %v522_v26, %v310_v25 }
 0x14a   : > { %v580_v27 = vpop.eup %579 }
 0x14b   : > { %v311_v28 = vmul.f32 %v580_v27, %v295_v11  ;;  %v328_v32 = vadd.f32 %v523_v30, %v319_v29 }
 0x14d   : > { %v320_v31 = vmul.f32 %v522_v26, %v311_v28 }
 0x14f   : > { %v329_v33 = vadd.f32 %v523_v30, %v320_v31 }
 0x151   : > { %v330_v34 = vpack.c.bf16 %v329_v33, %v328_v32 }
 0x153   : > { %546 = vmatmul.mubr.msk.bf16.vlgmr.msra.gmra.mrb[0].mxu0 %vm284_vm0, %v330_v34 }
 0x226   : > { %v391_v36 = vpop.f32.mrb[0].mxu0 }
 0x227   : > { %v392_v37 = vadd.f32 %v524_v35, %v391_v36  ;;  %v547_v38 = vpop.f32.mrb[1].mxu0 }
 0x228   : > { %v394_v39 = vpop.f32.mrb[2].mxu0 }
 0x229   : > { %v532_v40 = vpack.c.bf16 %v392_v37, %v392_v37  ;;  %v395_v41 = vadd.f32 %v524_v35, %v394_v39  ;;  %v548_v42 = vpop.f32.mrb[3].mxu0 }
 0x22b   : > { %407 = vst.msk [vmem:[%s277_s14] sm:$0xf] %vm406_vm2, %v532_v40  ;;  %v533_v43 = vpack.c.bf16 %v395_v41, %v395_v41 }
 0x22d   : > { %408 = vst.msk [vmem:[%s277_s14 + $0x4] sm:$0xf] %vm406_vm2, %v533_v43 }
 0x22e PF: > { %s15_s20 = sadd.s32 1, %s603_s20   ;;  %s703_s18 = smov %s599_s19 }
 0x22f   : > { %p12_p5 = scmp.ge.s32.totalorder %s15_s20, 4   ;;  %s704_s19 = smov %s706_s21 }
 0x231   :  { %14 = sbr.rel (!%p12_p5) target bundleno = 2 (0x2), region = 76 }

// kernel: paligemma_forward.29
= control target key start
LH: loop header
LB: loop body
LE: loop exit
PB: predicated region body
PF: predicated region fallthrough
CT: control target
= control target key end

     0   :  { %s640_s15 = smov 0   ;;  %s642_s16 = smov 0   ;;  %s691_s0 = inlined_call_operand.vmem [shape: bf16[32,64], index: 0, kind: input, shape index: {}]   ;;  %s692_s1 = inlined_call_operand.vmem [shape: bf16[64,32], index: 1, kind: input, shape index: {}]   ;;  %s693_s2 = inlined_call_operand.vmem [shape: f32[1,32], index: 2, kind: input, shape index: {}]   ;;  %s694_s3 = inlined_call_operand.vmem [shape: bf16[32,32], index: 3, kind: input, shape index: {}]   ;;  %s695_s4 = inlined_call_operand.vmem [shape: bf16[32,32], index: 4, kind: output, shape index: {}]  }
   0x1   :  { %s644_s17 = smov 0  }
   0x2 LB: > { %s23_s18 = sadd.s32 1, %s607_s16  ;;  %p517_p0 = scmp.ge.s32.totalorder %s611_s17, 1  ;;  %s611_s17 = sphi %s644_s17, %s14_s17   ;;  %s607_s16 = sphi %s642_s16, %s697_s16   ;;  %s603_s15 = sphi %s640_s15, %s696_s15  }
   0x3   : > { %p24_p1 = scmp.ge.s32.totalorder %s23_s18, 2  ;;  %p210_p2 = scmp.lt.s32.totalorder %s611_s17, 3 }
   0x5   : > { %s699_s18 = smov (%p24_p1, %s23_s18), 0  ;;  %p211_p3 = pnand %p517_p0, %p210_p2 }
   0x6   : > { %v584_v0 = vld [vmem:[%s692_s1] sm:$0xff] (!%p211_p3)   ;;  %v613_v1 = vmov (!%p211_p3), 0.0   ;;  %v585_v2 = vld [vmem:[%s692_s1 + $0x8] sm:$0xff] (!%p211_p3)   ;;  %vm614_vm0 = vmmov (!%p211_p3), 0   ;;  %s518_s23 = sshll.u32 (!%p211_p3), %s603_s15, 1  ;;  %v586_v3 = vld [vmem:[%s692_s1 + $0x10] sm:$0xff] (!%p211_p3)  }
   0x7   : > { %214 = sbr.rel (%p211_p3) target bundleno = 244 (0xf4), region = 36  ;;  %546 = vmatprep.subr.bf16.mxu0 (!%p211_p3), %v613_v1  ;;  %554 = vmatprep.mubr.msk.bf16.mxu0 (!%p211_p3), %vm614_vm0, %v613_v1  ;;  %p255_p4 = scmp.lt.s32.totalorder (!%p211_p3), %s518_s23, 3  ;;  %v587_v4 = vld [vmem:[%s692_s1 + $0x18] sm:$0xff] (!%p211_p3)   ;;  %vm332_vm1 = vcmask (!%p211_p3), 523264   ;;  %v524_v7 = vld [vmem:[%s693_s2] ss:$0 sm:$0xff] (!%p211_p3) }
   0x8   : > { %547 = vmatpush3.bf16.msra.mxu0 (!%p211_p3), %v584_v0  ;;  %vm391_vm2 = vcmask (!%p211_p3), 257024  }
   0x9   : > { %548 = vmatprep.subr.bf16.mxu0 (!%p211_p3), %v613_v1 }
   0xc   : > { %549 = vmatpush3.bf16.msra.mxu0 (!%p211_p3), %v585_v2 }
   0xd   : > { %550 = vmatprep.subr.bf16.mxu0 (!%p211_p3), %v613_v1 }
   0xe   : > { %s701_s23 = smov (!%p255_p4, %s518_s23), 3 }
   0xf   : > { %s519_s26 = sshll.u32 %s701_s23, 2 }
  0x10   : > { %s258_s29 = scalar_lea.vmem %s691_s0, %s519_s26  ;;  %551 = vmatpush3.bf16.msra.mxu0 %v586_v3  ;;  %s274_s8 = scalar_lea.vmem %s694_s3, %s519_s26 }
  0x11   : > { %552 = vmatprep.subr.bf16.mxu0 %v613_v1  ;;  %v588_v5 = vld [vmem:[%s258_s29] sm:$0xff]   ;;  %s283_s13 = scalar_lea.vmem %s695_s4, %s519_s26 }
  0x12   : > { %v538_v6 = vld [vmem:[%s274_s8] sm:$0xff]  }
  0x13   : > { %v539_v8 = vunpack.c.l.bf16 %v538_v6  ;;  %v540_v12 = vunpack.c.h.bf16 %v538_v6 }
  0x14   : > { %553 = vmatpush3.bf16.msra.mxu0 %v587_v4 }
  0x17   : > { %555 = vmatmul.mubr.msk.bf16.vlgmr.msra.gmra.mrb[0].mxu0 %vm332_vm1, %v588_v5 }
  0xea   : > { %v370_v9 = vpop.f32.mrb[0].mxu0 }
  0xeb   : > { %v371_v10 = vadd.f32 %v524_v7, %v370_v9  ;;  %v556_v11 = vpop.f32.mrb[1].mxu0 }
  0xec   : > { %v373_v13 = vpop.f32.mrb[2].mxu0 }
  0xed   : > { %v381_v14 = vadd.f32 %v539_v8, %v371_v10  ;;  %v374_v15 = vadd.f32 %v524_v7, %v373_v13  ;;  %v557_v16 = vpop.f32.mrb[3].mxu0 }
  0xef   : > { %v535_v17 = vpack.c.bf16 %v381_v14, %v381_v14  ;;  %v382_v18 = vadd.f32 %v540_v12, %v374_v15 }
  0xf1   : > { %392 = vst.msk [vmem:[%s283_s13] sm:$0xf] %vm391_vm2, %v535_v17  ;;  %v536_v19 = vpack.c.bf16 %v382_v18, %v382_v18 }
  0xf3   : > { %393 = vst.msk [vmem:[%s283_s13 + $0x4] sm:$0xf] %vm391_vm2, %v536_v19 }
  0xf4 PF: > { %s14_s17 = sadd.s32 1, %s611_s17   ;;  %s696_s15 = smov %s607_s16 }
  0xf5   : > { %p11_p5 = scmp.ge.s32.totalorder %s14_s17, 4   ;;  %s697_s16 = smov %s699_s18 }
  0xf7   :  { %13 = sbr.rel (!%p11_p5) target bundleno = 2 (0x2), region = 75 }

// kernel: paligemma_forward.28
= control target key start
LH: loop header
LB: loop body
LE: loop exit
PB: predicated region body
PF: predicated region fallthrough
CT: control target
= control target key end

     0   :  { %s659_s18 = smov 0   ;;  %s661_s19 = smov 0   ;;  %s719_s0 = inlined_call_operand.vmem [shape: bf16[32,32], index: 0, kind: input, shape index: {}]   ;;  %s720_s1 = inlined_call_operand.vmem [shape: f32[1,32], index: 1, kind: input, shape index: {}]   ;;  %s721_s2 = inlined_call_operand.vmem [shape: f32[1,32], index: 2, kind: input, shape index: {}]   ;;  %s722_s3 = inlined_call_operand.vmem [shape: bf16[32,64], index: 3, kind: input, shape index: {}]   ;;  %s723_s4 = inlined_call_operand.vmem [shape: f32[1,64], index: 4, kind: input, shape index: {}]   ;;  %s724_s5 = inlined_call_operand.vmem [shape: bf16[32,64], index: 5, kind: output, shape index: {}]  }
   0x1   :  { %s663_s20 = smov 0  }
   0x2 LB: > { %s24_s21 = sadd.s32 1, %s621_s19  ;;  %p535_p0 = scmp.ge.s32.totalorder %s625_s20, 1  ;;  %s625_s20 = sphi %s663_s20, %s15_s20   ;;  %s621_s19 = sphi %s661_s19, %s726_s19   ;;  %s617_s18 = sphi %s659_s18, %s725_s18  }
   0x3   : > { %p25_p1 = scmp.ge.s32.totalorder %s24_s21, 2  ;;  %p219_p2 = scmp.lt.s32.totalorder %s625_s20, 3 }
   0x5   : > { %s728_s21 = smov (%p25_p1, %s24_s21), 0  ;;  %p220_p3 = pnand %p535_p0, %p219_p2 }
   0x6   : > { %s536_s22 = sshll.u32 (!%p220_p3), %s617_s18, 1  ;;  %vm284_vm0 = vcmask (!%p220_p3), 261120   ;;  %v593_v15 = vld [vmem:[%s722_s3] sm:$0xff] (!%p220_p3)   ;;  %v627_v16 = vmov (!%p220_p3), 0.0   ;;  %v594_v17 = vld [vmem:[%s722_s3 + $0x8] sm:$0xff] (!%p220_p3)   ;;  %vm628_vm1 = vmmov (!%p220_p3), 0  }
   0x7   : > { %223 = sbr.rel (%p220_p3) target bundleno = 583 (0x247), region = 40  ;;  %p258_p4 = scmp.lt.s32.totalorder (!%p220_p3), %s536_s22, 3  ;;  %559 = vmatprep.subr.bf16.mxu0 (!%p220_p3), %v627_v16  ;;  %563 = vmatprep.mubr.msk.bf16.mxu0 (!%p220_p3), %vm628_vm1, %v627_v16  ;;  %v540_v26 = vld [vmem:[%s720_s1] ss:$0 sm:$0xff] (!%p220_p3)  ;;  %vm424_vm2 = vcmask (!%p220_p3), 519168  }
   0x8   : > { %560 = vmatpush3.bf16.msra.mxu0 (!%p220_p3), %v593_v15  ;;  %v541_v30 = vld [vmem:[%s721_s2] ss:$0 sm:$0xff] (!%p220_p3) }
   0x9   : > { %561 = vmatprep.subr.bf16.mxu0 (!%p220_p3), %v627_v16  ;;  %v542_v35 = vld [vmem:[%s723_s4] ss:$0 sm:$0xff] (!%p220_p3) }
   0xc   : > { %562 = vmatpush3.bf16.msra.mxu0 (!%p220_p3), %v594_v17 }
   0xe   : > { %s730_s22 = smov (!%p258_p4, %s536_s22), 3 }
   0xf   : > { %s537_s23 = sshll.u32 %s730_s22, 2 }
  0x10   : > { %s261_s26 = scalar_lea.vmem %s719_s0, %s537_s23  ;;  %s277_s14 = scalar_lea.vmem %s724_s5, %s537_s23 }
  0x11   : > { %v553_v0 = vld [vmem:[%s261_s26] sm:$0xff]  }
  0x12   : > { %v554_v1 = vunpack.c.l.bf16 %v553_v0  ;;  %v555_v2 = vunpack.c.h.bf16 %v553_v0 }
  0x14   : > { %v285_v3 = vsel %vm284_vm0, %v554_v1, 0.0  ;;  %v288_v4 = vsel %vm284_vm0, %v555_v2, 0.0 }
  0x15   : > { %286 = vadd.xlane.f32.xlu0 %v285_v3 }
  0x19   : > { %289 = vadd.xlane.f32.xlu0 %v288_v4 }
  0xa2   : > { %v287_v5 = vpop.xlane.xlu0 %286 }
  0xa3   : > { %v292_v6 = vmul.f32 0.03125, %v287_v5 }
  0xa5   : > { %v294_v7 = vsub.f32 %v554_v1, %v292_v6 }
  0xa6   : > { %v290_v8 = vpop.xlane.xlu0 %289 }
  0xa7   : > { %v293_v9 = vmul.f32 0.03125, %v290_v8  ;;  %v296_v10 = vmul.f32 %v294_v7, %v294_v7 }
  0xa9   : > { %v295_v11 = vsub.f32 %v555_v2, %v293_v9  ;;  %v298_v12 = vsel %vm284_vm0, %v296_v10, 0.0 }
  0xaa   : > { %299 = vadd.xlane.f32.xlu1 %v298_v12 }
  0xab   : > { %v297_v13 = vmul.f32 %v295_v11, %v295_v11 }
  0xad   : > { %v301_v14 = vsel %vm284_vm0, %v297_v13, 0.0 }
  0xae   : > { %302 = vadd.xlane.f32.xlu1 %v301_v14 }
 0x137   : > { %v300_v18 = vpop.xlane.xlu1 %299 }
 0x138   : > { %v304_v19 = vmul.f32 0.03125, %v300_v18 }
 0x13a   : > { %v306_v20 = vadd.f32 1e-06, %v304_v19 }
 0x13b   : > { %v303_v21 = vpop.xlane.xlu1 %302 }
 0x13c   : > { %595 = vrsqrt.f32 %v306_v20  ;;  %v305_v22 = vmul.f32 0.03125, %v303_v21 }
 0x13e   : > { %v307_v23 = vadd.f32 1e-06, %v305_v22 }
 0x140   : > { %597 = vrsqrt.f32 %v307_v23 }
 0x146   : > { %v596_v24 = vpop.eup %595 }
 0x147   : > { %v310_v25 = vmul.f32 %v596_v24, %v294_v7 }
 0x149   : > { %v319_v29 = vmul.f32 %v540_v26, %v310_v25 }
 0x14a   : > { %v598_v27 = vpop.eup %597 }
 0x14b   : > { %v311_v28 = vmul.f32 %v598_v27, %v295_v11  ;;  %v328_v32 = vadd.f32 %v541_v30, %v319_v29 }
 0x14d   : > { %v320_v31 = vmul.f32 %v540_v26, %v311_v28 }
 0x14f   : > { %v329_v33 = vadd.f32 %v541_v30, %v320_v31 }
 0x151   : > { %v330_v34 = vpack.c.bf16 %v329_v33, %v328_v32 }
 0x153   : > { %564 = vmatmul.mubr.msk.bf16.vlgmr.msra.gmra.mrb[0].mxu0 %vm284_vm0, %v330_v34 }
 0x226   : > { %v391_v36 = vpop.f32.mrb[0].mxu0 }
 0x227   : > { %v392_v37 = vadd.f32 %v542_v35, %v391_v36  ;;  %v565_v38 = vpop.f32.mrb[1].mxu0 }
 0x228   : > { %v394_v39 = vpop.f32.mrb[2].mxu0 }
 0x229   : > { %v400_v40 = vmul.f32 0.044715, %v392_v37  ;;  %v395_v41 = vadd.f32 %v542_v35, %v394_v39  ;;  %v566_v42 = vpop.f32.mrb[3].mxu0  ;;  %v398_v53 = vmul.f32 0.5, %v392_v37 }
 0x22b   : > { %v402_v43 = vmul.f32 %v400_v40, %v392_v37  ;;  %v401_v44 = vmul.f32 0.044715, %v395_v41  ;;  %v399_v57 = vmul.f32 0.5, %v395_v41 }
 0x22d   : > { %v404_v45 = vmul.f32 %v402_v43, %v392_v37  ;;  %v403_v46 = vmul.f32 %v401_v44, %v395_v41 }
 0x22f   : > { %v406_v47 = vadd.f32 %v404_v45, %v392_v37  ;;  %v405_v48 = vmul.f32 %v403_v46, %v395_v41 }
 0x231   : > { %v408_v49 = vmul.f32 0.7978846, %v406_v47  ;;  %v407_v50 = vadd.f32 %v405_v48, %v395_v41 }
 0x233   : > { %599 = vtanh.f32 %v408_v49  ;;  %v409_v51 = vmul.f32 0.7978846, %v407_v50 }
 0x235   : > { %601 = vtanh.f32 %v409_v51 }
 0x23d   : > { %v600_v52 = vpop.eup %599 }
 0x23e   : > { %v412_v54 = vadd.f32 1.0, %v600_v52 }
 0x23f   : > { %v602_v55 = vpop.eup %601 }
 0x240   : > { %v414_v56 = vmul.f32 %v412_v54, %v398_v53  ;;  %v413_v58 = vadd.f32 1.0, %v602_v55 }
 0x242   : > { %v550_v59 = vpack.c.bf16 %v414_v56, %v414_v56  ;;  %v415_v60 = vmul.f32 %v413_v58, %v399_v57 }
 0x244   : > { %425 = vst.msk [vmem:[%s277_s14] sm:$0xf] %vm424_vm2, %v550_v59  ;;  %v551_v61 = vpack.c.bf16 %v415_v60, %v415_v60 }
 0x246   : > { %426 = vst.msk [vmem:[%s277_s14 + $0x4] sm:$0xf] %vm424_vm2, %v551_v61 }
 0x247 PF: > { %s15_s20 = sadd.s32 1, %s625_s20   ;;  %s725_s18 = smov %s621_s19 }
 0x248   : > { %p12_p5 = scmp.ge.s32.totalorder %s15_s20, 4   ;;  %s726_s19 = smov %s728_s21 }
 0x24a   :  { %14 = sbr.rel (!%p12_p5) target bundleno = 2 (0x2), region = 76 }

// kernel: paligemma_forward.36
= control target key start
LH: loop header
LB: loop body
LE: loop exit
PB: predicated region body
PF: predicated region fallthrough
CT: control target
= control target key end

     0   :  { %s494_s12 = smov 0   ;;  %s554_s0 = inlined_call_operand.vmem [shape: s32[2,32,1], index: 0, kind: input, shape index: {}]   ;;  %s555_s1 = inlined_call_operand.vmem [shape: f32[2,32,32], index: 1, kind: input, shape index: {}]   ;;  %s556_s2 = inlined_call_operand.vmem [shape: bf16[2,16,32], index: 2, kind: input, shape index: {}]   ;;  %s557_s3 = inlined_call_operand.vmem [shape: bf16[2,32,32], index: 3, kind: output, shape index: {}]  }
   0x1 LB: > { %s421_s13 = sadd.s32 4294967295, %s470_s12   ;;  %p425_p0 = scmp.ge.s32.totalorder %s470_s12, 1  ;;  %s470_s12 = sphi %s494_s12, %s13_s12  }
   0x2   : > { %p157_p1 = scmp.lt.s32.totalorder %s470_s12, 3 }
   0x4   : > { %p158_p2 = pnand %p425_p0, %p157_p1 }
   0x5   : > { %p191_p3 = scmp.lt.s32.totalorder (!%p158_p2), %s421_s13, 1  ;;  %v472_v0 = vmov (!%p158_p2), 0   ;;  %vm473_vm2 = vmmov (!%p158_p2), 1  }
   0x6   : > { %161 = sbr.rel (%p158_p2) target bundleno = 178 (0xb2), region = 32  ;;  %463 = vset.pattern.permute.xlu1 (!%p158_p2), %v472_v0  ;;  %462 = vset.pattern.permute.xlu0 (!%p158_p2), %v472_v0 }
   0xd   : > { %s563_s13 = smov (!%p191_p3, %s421_s13), 1 }
   0xe   : > { %s440_s14 = sshll.u32 %s563_s13, 5  ;;  %s442_s18 = sshll.u32 %s563_s13, 3 }
   0xf   : > { %s195_s17 = scalar_lea.vmem %s554_s0, %s440_s14  ;;  %s205_s21 = scalar_lea.vmem %s556_s2, %s442_s18 }
  0x10   : > { %v212_v1 = vld [vmem:[%s195_s17 + $0x8] sm:$0xff]  ;;  %v211_v2 = vld [vmem:[%s195_s17] sm:$0xff]  ;;  %v213_v3 = vld [vmem:[%s195_s17 + $0x10] sm:$0xff]  ;;  %s200_s24 = scalar_lea.vmem %s555_s1, %s440_s14  ;;  %s443_s25 = sshll.u32 %s563_s13, 4 }
  0x11   : > { %vm226_vm0 = vcmp.eq.s32.totalorder %v212_v1, 255  ;;  %vm225_vm1 = vcmp.eq.s32.totalorder %v211_v2, 255  ;;  %vm558_vm4 = vcmp.eq.s32.totalorder %v213_v3, 255  ;;  %vm231_vm5 = vcmp.eq.s32.totalorder %v213_v3, 0  ;;  %v214_v7 = vld [vmem:[%s195_s17 + $0x18] sm:$0xff]  ;;  %v449_v18 = vld [vmem:[%s205_s21] sm:$0xff]   ;;  %s210_s28 = scalar_lea.vmem %s557_s3, %s443_s25 }
  0x12   : > { %v270_v4 = vsel %vm226_vm0, 1, %v472_v0  ;;  %vm511_vm3 = vmxor %vm226_vm0, %vm473_vm2  ;;  %v269_v6 = vsel %vm225_vm1, 1, %v472_v0  ;;  %vm229_vm7 = vcmp.eq.s32.totalorder %v211_v2, 0  ;;  %vm228_vm11 = vcmp.eq.s32.totalorder %v214_v7, 255  ;;  %v215_v23 = vld [vmem:[%s200_s24] sm:$0xff]  ;;  %v216_v30 = vld [vmem:[%s200_s24 + $0x8] sm:$0xff] }
  0x13   : > { %277 = vperm.xlu1 %463, %v270_v4   ;;  %274 = vperm.xlu0 %462, %v269_v6   ;;  %vm233_vm6 = vmxor %vm225_vm1, %vm473_vm2  ;;  %vm232_vm13 = vcmp.eq.s32.totalorder %v214_v7, 0  ;;  %vm230_vm15 = vcmp.eq.s32.totalorder %v212_v1, 0  ;;  %v272_v12 = vsel %vm228_vm11, 1, %v472_v0  ;;  %v293_v15 = vsel %vm229_vm7, 1, %v472_v0  ;;  %v218_v38 = vld [vmem:[%s200_s24 + $0x18] sm:$0xff]  ;;  %v217_v41 = vld [vmem:[%s200_s24 + $0x10] sm:$0xff] }
  0x14   : > { %vm235_vm8 = vmxor %vm558_vm4, %vm473_vm2  ;;  %v294_v14 = vsel %vm230_vm15, 1, %v472_v0  ;;  %v296_v16 = vsel %vm232_vm13, 1, %v472_v0  ;;  %v295_v17 = vsel %vm231_vm5, 1, %v472_v0  ;;  %v450_v21 = vunpack.c.l.bf16 %v449_v18 }
  0x15   : > { %vm239_vm9 = vmxor %vm231_vm5, %vm473_vm2  ;;  %v451_v26 = vunpack.c.h.bf16 %v449_v18 }
  0x16   : > { %vm243_vm10 = vmand %vm235_vm8, %vm239_vm9  ;;  %v223_v24 = vmul.f32 0.17677669, %v450_v21 }
  0x17   : > { %v247_v8 = vsel %vm243_vm10, 1, %v472_v0  ;;  %vm237_vm12 = vmxor %vm229_vm7, %vm473_vm2  ;;  %v224_v31 = vmul.f32 0.17677669, %v451_v26 }
  0x18   : > { %256 = vperm.xlu1 %463, %v247_v8   ;;  %vm241_vm14 = vmand %vm233_vm6, %vm237_vm12  ;;  %vm561_vm6 = vcmp.eq.s32.totalorder %v213_v3, 255 }
  0x19   : > { %v245_v9 = vsel %vm241_vm14, 1, %v472_v0  ;;  %vm236_vm0 = vmxor %vm228_vm11, %vm473_vm2  ;;  %v271_v13 = vsel %vm561_vm6, 1, %v472_v0 }
  0x1a   : > { %250 = vperm.xlu0 %462, %v245_v9   ;;  %vm240_vm1 = vmxor %vm232_vm13, %vm473_vm2 }
  0x1b   : > { %vm244_vm4 = vmand %vm236_vm0, %vm240_vm1 }
  0x1c   : > { %v248_v10 = vsel %vm244_vm4, 1, %v472_v0  ;;  %vm238_vm8 = vmxor %vm230_vm15, %vm473_vm2  ;;  %vm337_vm15 = vcmask 257024  }
  0x1d   : > { %259 = vperm.xlu1 %463, %v248_v10   ;;  %vm242_vm9 = vmand %vm511_vm3, %vm238_vm8 }
  0x1e   : > { %v246_v11 = vsel %vm242_vm9, 1, %v472_v0 }
  0x1f   : > { %253 = vperm.xlu0 %462, %v246_v11  }
  0x21   : > { %283 = vperm.xlu1 %463, %v272_v12  }
  0x23   : > { %280 = vperm.xlu0 %462, %v271_v13  }
  0x25   : > { %301 = vperm.xlu1 %463, %v294_v14  }
  0x27   : > { %298 = vperm.xlu0 %462, %v293_v15  }
  0x29   : > { %307 = vperm.xlu1 %463, %v296_v16  }
  0x2b   : > { %304 = vperm.xlu0 %462, %v295_v17  }
  0x92   : > { %v278_v19 = vpop.permute.xlu1 %277  ;;  %v275_v20 = vpop.permute.xlu0 %274 }
  0x93   : > { %vm285_vm3 = vcmp.eq.s32.totalorder %v275_v20, 1  ;;  %vm286_vm5 = vcmp.eq.s32.totalorder %v278_v19, 1 }
  0x97   : > { %v257_v22 = vpop.permute.xlu1 %256 }
  0x98   : > { %vm263_vm12 = vcmp.eq.s32.totalorder %v257_v22, 1 }
  0x99   : > { %v251_v25 = vpop.permute.xlu0 %250  ;;  %v267_v49 = vsel %vm263_vm12, %v217_v41, 0.0 }
  0x9a   : > { %vm261_vm2 = vcmp.eq.s32.totalorder %v251_v25, 1 }
  0x9b   : > { %v265_v27 = vsel %vm261_vm2, %v215_v23, 0.0 }
  0x9c   : > { %v260_v28 = vpop.permute.xlu1 %259  ;;  %v289_v29 = vsel %vm285_vm3, %v223_v24, %v265_v27 }
  0x9d   : > { %vm264_vm7 = vcmp.eq.s32.totalorder %v260_v28, 1 }
  0x9e   : > { %v254_v32 = vpop.permute.xlu0 %253  ;;  %v268_v43 = vsel %vm264_vm7, %v218_v38, 0.0 }
  0x9f   : > { %vm262_vm4 = vcmp.eq.s32.totalorder %v254_v32, 1 }
  0xa0   : > { %v266_v33 = vsel %vm262_vm4, %v216_v30, 0.0  ;;  %v284_v34 = vpop.permute.xlu1 %283 }
  0xa1   : > { %v290_v35 = vsel %vm286_vm5, %v224_v31, %v266_v33  ;;  %vm288_vm11 = vcmp.eq.s32.totalorder %v284_v34, 1 }
  0xa2   : > { %v281_v36 = vpop.permute.xlu0 %280  ;;  %v292_v46 = vsel %vm288_vm11, 0.0, %v268_v43 }
  0xa3   : > { %vm287_vm14 = vcmp.eq.s32.totalorder %v281_v36, 1 }
  0xa4   : > { %v302_v37 = vpop.permute.xlu1 %301  ;;  %v291_v52 = vsel %vm287_vm14, 0.0, %v267_v49 }
  0xa5   : > { %vm310_vm10 = vcmp.eq.s32.totalorder %v302_v37, 1 }
  0xa6   : > { %v314_v39 = vsel %vm310_vm10, 0.0, %v290_v35  ;;  %v299_v40 = vpop.permute.xlu0 %298 }
  0xa7   : > { %v318_v42 = vmul.f32 5.656854, %v314_v39  ;;  %vm309_vm13 = vcmp.eq.s32.totalorder %v299_v40, 1 }
  0xa8   : > { %v313_v44 = vsel %vm309_vm13, 0.0, %v289_v29  ;;  %v308_v45 = vpop.permute.xlu1 %307 }
  0xa9   : > { %v445_v47 = vpack.c.bf16 %v318_v42, %v318_v42  ;;  %v317_v48 = vmul.f32 5.656854, %v313_v44  ;;  %vm312_vm0 = vcmp.eq.s32.totalorder %v308_v45, 1 }
  0xaa   : > { %v316_v50 = vsel %vm312_vm0, 0.0, %v292_v46  ;;  %v305_v51 = vpop.permute.xlu0 %304 }
  0xab   : > { %339 = vst.msk [vmem:[%s210_s28 + $0x4] sm:$0xf] %vm337_vm15, %v445_v47  ;;  %v444_v53 = vpack.c.bf16 %v317_v48, %v317_v48  ;;  %v320_v54 = vmul.f32 5.656854, %v316_v50  ;;  %vm311_vm1 = vcmp.eq.s32.totalorder %v305_v51, 1 }
  0xac   : > { %v315_v55 = vsel %vm311_vm1, 0.0, %v291_v52 }
  0xad   : > { %338 = vst.msk [vmem:[%s210_s28] sm:$0xf] %vm337_vm15, %v444_v53  ;;  %v447_v56 = vpack.c.bf16 %v320_v54, %v320_v54  ;;  %v319_v57 = vmul.f32 5.656854, %v315_v55 }
  0xaf   : > { %341 = vst.msk [vmem:[%s210_s28 + $0xc] sm:$0xf] %vm337_vm15, %v447_v56  ;;  %v446_v58 = vpack.c.bf16 %v319_v57, %v319_v57 }
  0xb1   : > { %340 = vst.msk [vmem:[%s210_s28 + $0x8] sm:$0xf] %vm337_vm15, %v446_v58 }
  0xb2 PF: > { %s13_s12 = sadd.s32 1, %s470_s12  }
  0xb3   : > { %p10_p4 = scmp.ge.s32.totalorder %s13_s12, 4  }
  0xb5   :  { %12 = sbr.rel (!%p10_p4) target bundleno = 1 (0x1), region = 68 }

// kernel: paligemma_forward.37
= control target key start
LH: loop header
LB: loop body
LE: loop exit
PB: predicated region body
PF: predicated region fallthrough
CT: control target
= control target key end

     0   :  { %s573_s12 = smov 0   ;;  %s575_s13 = smov 0   ;;  %s628_s0 = inlined_call_operand.vmem [shape: bf16[64,32], index: 0, kind: input, shape index: {}]   ;;  %s629_s1 = inlined_call_operand.vmem [shape: f32[1,32], index: 1, kind: input, shape index: {}]   ;;  %s630_s2 = inlined_call_operand.vmem [shape: bf16[32,96], index: 2, kind: input, shape index: {}]   ;;  %s631_s3 = inlined_call_operand.vmem [shape: bf16[64,96], index: 3, kind: output, shape index: {}]  }
   0x1   :  { %s577_s14 = smov 0  }
   0x2 LB: > { %s22_s15 = sadd.s32 1, %s547_s13  ;;  %p455_p0 = scmp.ge.s32.totalorder %s551_s14, 1  ;;  %s551_s14 = sphi %s577_s14, %s13_s14   ;;  %s547_s13 = sphi %s575_s13, %s633_s13   ;;  %s543_s12 = sphi %s573_s12, %s632_s12  }
   0x3   : > { %p23_p1 = scmp.ge.s32.totalorder %s22_s15, 2  ;;  %p161_p2 = scmp.lt.s32.totalorder %s551_s14, 3 }
   0x5   : > { %s635_s15 = smov (%p23_p1, %s22_s15), 0  ;;  %p162_p3 = pnand %p455_p0, %p161_p2 }
   0x6   : > { %s456_s16 = sshll.u32 (!%p162_p3), %s543_s12, 2  ;;  %vm224_vm0 = vcmask (!%p162_p3), 261120   ;;  %v519_v14 = vld [vmem:[%s630_s2] sm:$0xff] (!%p162_p3)   ;;  %v520_v15 = vld [vmem:[%s630_s2 + $0x8] sm:$0xff] (!%p162_p3)   ;;  %v257_v26 = vlaneseq (!%p162_p3)  ;;  %vm355_vm1 = vcmask (!%p162_p3), 781312  }
   0x7   : > { %165 = sbr.rel (%p162_p3) target bundleno = 410 (0x19a), region = 32  ;;  %p193_p4 = scmp.lt.s32.totalorder (!%p162_p3), %s456_s16, 7  ;;  %487 = vmatprep.subr.bf16.mxu0 (!%p162_p3), %v519_v14  ;;  %v254_v30 = vld [vmem:[%s629_s1] sm:$0x1] (!%p162_p3) }
   0x8   : > { %488 = vmatpush3.bf16.msra.mxu0 (!%p162_p3), %v519_v14  ;;  %v258_v29 = vshrl.u32 (!%p162_p3), %v257_v26, 7  ;;  %v255_v31 = vadd.f32 (!%p162_p3), 1.0, %v254_v30 }
   0x9   : > { %489 = vmatprep.subr.bf16.mxu0 (!%p162_p3), %v520_v15 }
   0xa   : > { %v259_v32 = vsub.s32 (!%p162_p3), 0, %v258_v29 }
   0xc   : > { %490 = vmatpush3.bf16.msra.mxu0 (!%p162_p3), %v520_v15  ;;  %v260_v35 = vrot.slane (!%p162_p3), %v255_v31, %v259_v32 }
   0xe   : > { %s637_s16 = smov (!%p193_p4, %s456_s16), 7 }
   0xf   : > { %s457_s17 = sshll.u32 %s637_s16, 2 }
  0x10   : > { %s196_s20 = scalar_lea.vmem %s628_s0, %s457_s17  ;;  %s209_s29 = scalar_lea.vmem %s631_s3, %s457_s17 }
  0x11   : > { %v482_v0 = vld [vmem:[%s196_s20 + $0x8] sm:$0xff]   ;;  %v475_v1 = vld [vmem:[%s196_s20] sm:$0xff]  }
  0x12   : > { %v480_v2 = vunpack.c.l.bf16 %v482_v0  ;;  %v476_v3 = vunpack.c.l.bf16 %v475_v1  ;;  %v481_v4 = vunpack.c.h.bf16 %v482_v0  ;;  %v477_v5 = vunpack.c.h.bf16 %v475_v1 }
  0x14   : > { %v222_v6 = vmul.f32 %v480_v2, %v480_v2  ;;  %v220_v7 = vmul.f32 %v476_v3, %v476_v3  ;;  %v223_v8 = vmul.f32 %v481_v4, %v481_v4  ;;  %v221_v9 = vmul.f32 %v477_v5, %v477_v5 }
  0x16   : > { %v231_v10 = vsel %vm224_vm0, %v222_v6, 0.0  ;;  %v225_v11 = vsel %vm224_vm0, %v220_v7, 0.0  ;;  %v234_v12 = vsel %vm224_vm0, %v223_v8, 0.0  ;;  %v228_v13 = vsel %vm224_vm0, %v221_v9, 0.0 }
  0x17   : > { %232 = vadd.xlane.f32.xlu1 %v231_v10  ;;  %226 = vadd.xlane.f32.xlu0 %v225_v11 }
  0x1b   : > { %235 = vadd.xlane.f32.xlu1 %v234_v12  ;;  %229 = vadd.xlane.f32.xlu0 %v228_v13 }
  0xa4   : > { %v233_v16 = vpop.xlane.xlu1 %232  ;;  %v227_v17 = vpop.xlane.xlu0 %226 }
  0xa5   : > { %v240_v18 = vmul.f32 0.03125, %v233_v16  ;;  %v238_v19 = vmul.f32 0.03125, %v227_v17 }
  0xa7   : > { %v244_v20 = vadd.f32 1e-06, %v240_v18  ;;  %v242_v21 = vadd.f32 1e-06, %v238_v19 }
  0xa8   : > { %v236_v22 = vpop.xlane.xlu1 %235  ;;  %v230_v23 = vpop.xlane.xlu0 %229 }
  0xa9   : > { %521 = vrsqrt.f32 %v244_v20  ;;  %v241_v24 = vmul.f32 0.03125, %v236_v22  ;;  %v239_v25 = vmul.f32 0.03125, %v230_v23 }
  0xaa   : > { %523 = vrsqrt.f32 %v242_v21 }
  0xab   : > { %v245_v27 = vadd.f32 1e-06, %v241_v24  ;;  %v243_v28 = vadd.f32 1e-06, %v239_v25 }
  0xad   : > { %525 = vrsqrt.f32 %v245_v27 }
  0xae   : > { %527 = vrsqrt.f32 %v243_v28 }
  0xb3   : > { %v522_v33 = vpop.eup %521 }
  0xb4   : > { %v524_v34 = vpop.eup %523  ;;  %v252_v36 = vmul.f32 %v522_v33, %v480_v2 }
  0xb5   : > { %v250_v38 = vmul.f32 %v524_v34, %v476_v3 }
  0xb6   : > { %v264_v42 = vmul.f32 %v260_v35, %v252_v36 }
  0xb7   : > { %v526_v37 = vpop.eup %525  ;;  %v262_v44 = vmul.f32 %v260_v35, %v250_v38 }
  0xb8   : > { %v528_v39 = vpop.eup %527  ;;  %v253_v40 = vmul.f32 %v526_v37, %v481_v4 }
  0xb9   : > { %v251_v41 = vmul.f32 %v528_v39, %v477_v5 }
  0xba   : > { %v265_v43 = vmul.f32 %v260_v35, %v253_v40 }
  0xbb   : > { %v263_v45 = vmul.f32 %v260_v35, %v251_v41 }
  0xbc   : > { %v267_v46 = vpack.c.bf16 %v265_v43, %v264_v42 }
  0xbd   : > { %v266_v47 = vpack.c.bf16 %v263_v45, %v262_v44 }
  0xbf   : > { %491 = vmatprep.mubr.msk.bf16.mxu0 %vm224_vm0, %v266_v47 }
  0xc0   : > { %492 = vmatmul.mubr.msk.bf16.vlgmr.msra.gmra.mrb[0].mxu0 %vm224_vm0, %v267_v46 }
 0x193   : > { %v493_v48 = vpop.f32.mrb[0].mxu0 }
 0x194   : > { %v324_v49 = vpop.f32.mrb[1].mxu0  ;;  %v472_v54 = vpack.c.bf16 %v493_v48, %v493_v48 }
 0x195   : > { %v470_v50 = vpack.c.bf16 %v324_v49, %v324_v49  ;;  %v494_v51 = vpop.f32.mrb[2].mxu0 }
 0x196   : > { %v327_v52 = vpop.f32.mrb[3].mxu0  ;;  %v473_v55 = vpack.c.bf16 %v494_v51, %v494_v51  ;;  %358 = vst.msk [vmem:[%s209_s29 + $0x8] sm:$0xf] %vm355_vm1, %v472_v54 }
 0x197   : > { %356 = vst.msk [vmem:[%s209_s29] sm:$0xf] %vm355_vm1, %v470_v50  ;;  %v471_v53 = vpack.c.bf16 %v327_v52, %v327_v52 }
 0x198   : > { %359 = vst.msk [vmem:[%s209_s29 + $0xc] sm:$0xf] %vm355_vm1, %v473_v55 }
 0x199   : > { %357 = vst.msk [vmem:[%s209_s29 + $0x4] sm:$0xf] %vm355_vm1, %v471_v53 }
 0x19a PF: > { %s13_s14 = sadd.s32 1, %s551_s14   ;;  %s632_s12 = smov %s547_s13 }
 0x19b   : > { %p10_p5 = scmp.ge.s32.totalorder %s13_s14, 4   ;;  %s633_s13 = smov %s635_s15 }
 0x19d   :  { %12 = sbr.rel (!%p10_p5) target bundleno = 2 (0x2), region = 65 }

// kernel: paligemma_forward.39
= control target key start
LH: loop header
LB: loop body
LE: loop exit
PB: predicated region body
PF: predicated region fallthrough
CT: control target
= control target key end

     0   :  { %s586_s12 = smov 0   ;;  %s588_s13 = smov 0   ;;  %s628_s0 = inlined_call_operand.vmem [shape: bf16[64,32], index: 0, kind: input, shape index: {}]   ;;  %s629_s1 = inlined_call_operand.vmem [shape: bf16[32,32], index: 1, kind: input, shape index: {}]   ;;  %s630_s2 = inlined_call_operand.vmem [shape: bf16[64,32], index: 2, kind: input, shape index: {}]   ;;  %s631_s3 = inlined_call_operand.vmem [shape: bf16[64,32], index: 3, kind: output, shape index: {}]  }
   0x1   :  { %s590_s14 = smov 0  }
   0x2 LB: > { %s22_s15 = sadd.s32 1, %s560_s13  ;;  %p470_p0 = scmp.ge.s32.totalorder %s564_s14, 1  ;;  %s564_s14 = sphi %s590_s14, %s13_s14   ;;  %s560_s13 = sphi %s588_s13, %s633_s13   ;;  %s556_s12 = sphi %s586_s12, %s632_s12  }
   0x3   : > { %p23_p1 = scmp.ge.s32.totalorder %s22_s15, 2  ;;  %p177_p2 = scmp.lt.s32.totalorder %s564_s14, 3 }
   0x5   : > { %s635_s15 = smov (%p23_p1, %s22_s15), 0  ;;  %p178_p3 = pnand %p470_p0, %p177_p2 }
   0x6   : > { %v538_v0 = vld [vmem:[%s629_s1] sm:$0xff] (!%p178_p3)   ;;  %s471_s18 = sshll.u32 (!%p178_p3), %s556_s12, 2  ;;  %v539_v1 = vld [vmem:[%s629_s1 + $0x8] sm:$0xff] (!%p178_p3)   ;;  %vm283_vm0 = vcmask (!%p178_p3), 261120   ;;  %vm355_vm1 = vcmask (!%p178_p3), 257024  }
   0x7   : > { %181 = sbr.rel (%p178_p3) target bundleno = 239 (0xef), region = 32  ;;  %p217_p4 = scmp.lt.s32.totalorder (!%p178_p3), %s471_s18, 7  ;;  %506 = vmatprep.subr.bf16.mxu0 (!%p178_p3), %v538_v0 }
   0x8   : > { %507 = vmatpush3.bf16.msra.mxu0 (!%p178_p3), %v538_v0 }
   0x9   : > { %508 = vmatprep.subr.bf16.mxu0 (!%p178_p3), %v539_v1 }
   0xc   : > { %509 = vmatpush3.bf16.msra.mxu0 (!%p178_p3), %v539_v1 }
   0xe   : > { %s637_s18 = smov (!%p217_p4, %s471_s18), 7 }
   0xf   : > { %s472_s21 = sshll.u32 %s637_s18, 2 }
  0x10   : > { %s220_s24 = scalar_lea.vmem %s628_s0, %s472_s21  ;;  %s233_s27 = scalar_lea.vmem %s630_s2, %s472_s21 }
  0x11   : > { %v540_v2 = vld [vmem:[%s220_s24] sm:$0xff]   ;;  %v541_v3 = vld [vmem:[%s220_s24 + $0x8] sm:$0xff]   ;;  %s242_s30 = scalar_lea.vmem %s631_s3, %s472_s21 }
  0x12   : > { %510 = vmatprep.mubr.msk.bf16.mxu0 %vm283_vm0, %v540_v2  ;;  %v494_v4 = vld [vmem:[%s233_s27] sm:$0xff]   ;;  %v501_v5 = vld [vmem:[%s233_s27 + $0x8] sm:$0xff]  }
  0x13   : > { %511 = vmatmul.mubr.msk.bf16.vlgmr.msra.gmra.mrb[0].mxu0 %vm283_vm0, %v541_v3  ;;  %v495_v6 = vunpack.c.l.bf16 %v494_v4  ;;  %v499_v7 = vunpack.c.l.bf16 %v501_v5  ;;  %v500_v9 = vunpack.c.h.bf16 %v501_v5  ;;  %v496_v10 = vunpack.c.h.bf16 %v494_v4 }
  0xe6   : > { %v512_v8 = vpop.f32.mrb[0].mxu0 }
  0xe7   : > { %v324_v11 = vpop.f32.mrb[1].mxu0  ;;  %v333_v14 = vadd.f32 %v512_v8, %v499_v7 }
  0xe8   : > { %v325_v12 = vadd.f32 %v495_v6, %v324_v11  ;;  %v513_v13 = vpop.f32.mrb[2].mxu0 }
  0xe9   : > { %v327_v15 = vpop.f32.mrb[3].mxu0  ;;  %v336_v17 = vadd.f32 %v513_v13, %v500_v9  ;;  %v491_v20 = vpack.c.bf16 %v333_v14, %v333_v14 }
  0xea   : > { %v489_v16 = vpack.c.bf16 %v325_v12, %v325_v12  ;;  %v328_v18 = vadd.f32 %v496_v10, %v327_v15 }
  0xeb   : > { %v492_v21 = vpack.c.bf16 %v336_v17, %v336_v17  ;;  %358 = vst.msk [vmem:[%s242_s30 + $0x8] sm:$0xf] %vm355_vm1, %v491_v20 }
  0xec   : > { %356 = vst.msk [vmem:[%s242_s30] sm:$0xf] %vm355_vm1, %v489_v16  ;;  %v490_v19 = vpack.c.bf16 %v328_v18, %v328_v18 }
  0xed   : > { %359 = vst.msk [vmem:[%s242_s30 + $0xc] sm:$0xf] %vm355_vm1, %v492_v21 }
  0xee   : > { %357 = vst.msk [vmem:[%s242_s30 + $0x4] sm:$0xf] %vm355_vm1, %v490_v19 }
  0xef PF: > { %s13_s14 = sadd.s32 1, %s564_s14   ;;  %s632_s12 = smov %s560_s13 }
  0xf0   : > { %p10_p5 = scmp.ge.s32.totalorder %s13_s14, 4   ;;  %s633_s13 = smov %s635_s15 }
  0xf2   :  { %12 = sbr.rel (!%p10_p5) target bundleno = 2 (0x2), region = 68 }

// kernel: paligemma_forward.40
= control target key start
LH: loop header
LB: loop body
LE: loop exit
PB: predicated region body
PF: predicated region fallthrough
CT: control target
= control target key end

     0   :  { %s769_s15 = smov 0   ;;  %s771_s16 = smov 0   ;;  %s832_s0 = inlined_call_operand.vmem [shape: bf16[64,32], index: 0, kind: input, shape index: {}]   ;;  %s833_s1 = inlined_call_operand.vmem [shape: f32[1,32], index: 1, kind: input, shape index: {}]   ;;  %s834_s2 = inlined_call_operand.vmem [shape: bf16[32,64], index: 2, kind: input, shape index: {}]   ;;  %s835_s3 = inlined_call_operand.vmem [shape: bf16[32,64], index: 3, kind: input, shape index: {}]   ;;  %s836_s4 = inlined_call_operand.vmem [shape: bf16[64,64], index: 4, kind: output, shape index: {}]  }
   0x1   :  { %s773_s17 = smov 0  }
   0x2 LB: > { %s23_s18 = sadd.s32 1, %s738_s16  ;;  %p620_p0 = scmp.ge.s32.totalorder %s742_s17, 1  ;;  %s742_s17 = sphi %s773_s17, %s14_s17   ;;  %s738_s16 = sphi %s771_s16, %s838_s16   ;;  %s734_s15 = sphi %s769_s15, %s837_s15  }
   0x3   : > { %p24_p1 = scmp.ge.s32.totalorder %s23_s18, 2  ;;  %p195_p2 = scmp.lt.s32.totalorder %s742_s17, 3 }
   0x5   : > { %s840_s18 = smov (%p24_p1, %s23_s18), 0  ;;  %p196_p3 = pnand %p620_p0, %p195_p2 }
   0x6   : > { %s621_s19 = sshll.u32 (!%p196_p3), %s734_s15, 2  ;;  %vm268_vm0 = vcmask (!%p196_p3), 261120   ;;  %v700_v14 = vld [vmem:[%s834_s2] sm:$0xff] (!%p196_p3)   ;;  %v702_v16 = vld [vmem:[%s834_s2 + $0x8] sm:$0xff] (!%p196_p3)   ;;  %v301_v28 = vlaneseq (!%p196_p3)  ;;  %vm504_vm1 = vcmask (!%p196_p3), 519168  }
   0x7   : > { %199 = sbr.rel (%p196_p3) target bundleno = 437 (0x1b5), region = 36  ;;  %p233_p4 = scmp.lt.s32.totalorder (!%p196_p3), %s621_s19, 7  ;;  %v701_v15 = vld [vmem:[%s835_s3] sm:$0xff] (!%p196_p3)   ;;  %v703_v17 = vld [vmem:[%s835_s3 + $0x8] sm:$0xff] (!%p196_p3)   ;;  %660 = vmatprep.subr.bf16.mxu0 (!%p196_p3), %v700_v14 }
   0x8   : > { %668 = vmatprep.subr.bf16.mxu1 (!%p196_p3), %v701_v15  ;;  %661 = vmatpush3.bf16.msra.mxu0 (!%p196_p3), %v700_v14  ;;  %v302_v31 = vshrl.u32 (!%p196_p3), %v301_v28, 7  ;;  %v298_v32 = vld [vmem:[%s833_s1] sm:$0x1] (!%p196_p3) }
   0x9   : > { %669 = vmatpush3.bf16.msra.mxu1 (!%p196_p3), %v701_v15  ;;  %662 = vmatprep.subr.bf16.mxu0 (!%p196_p3), %v702_v16  ;;  %v299_v33 = vadd.f32 (!%p196_p3), 1.0, %v298_v32 }
   0xa   : > { %670 = vmatprep.subr.bf16.mxu1 (!%p196_p3), %v703_v17  ;;  %v303_v34 = vsub.s32 (!%p196_p3), 0, %v302_v31 }
   0xc   : > { %663 = vmatpush3.bf16.msra.mxu0 (!%p196_p3), %v702_v16  ;;  %v304_v37 = vrot.slane (!%p196_p3), %v299_v33, %v303_v34 }
   0xd   : > { %671 = vmatpush3.bf16.msra.mxu1 (!%p196_p3), %v703_v17 }
   0xe   : > { %s842_s19 = smov (!%p233_p4, %s621_s19), 7 }
   0xf   : > { %s622_s20 = sshll.u32 %s842_s19, 2 }
  0x10   : > { %s236_s23 = scalar_lea.vmem %s832_s0, %s622_s20  ;;  %s253_s10 = scalar_lea.vmem %s836_s4, %s622_s20 }
  0x11   : > { %v651_v0 = vld [vmem:[%s236_s23 + $0x8] sm:$0xff]   ;;  %v644_v1 = vld [vmem:[%s236_s23] sm:$0xff]  }
  0x12   : > { %v649_v2 = vunpack.c.l.bf16 %v651_v0  ;;  %v645_v3 = vunpack.c.l.bf16 %v644_v1  ;;  %v650_v4 = vunpack.c.h.bf16 %v651_v0  ;;  %v646_v5 = vunpack.c.h.bf16 %v644_v1 }
  0x14   : > { %v266_v6 = vmul.f32 %v649_v2, %v649_v2  ;;  %v264_v7 = vmul.f32 %v645_v3, %v645_v3  ;;  %v267_v8 = vmul.f32 %v650_v4, %v650_v4  ;;  %v265_v9 = vmul.f32 %v646_v5, %v646_v5 }
  0x16   : > { %v275_v10 = vsel %vm268_vm0, %v266_v6, 0.0  ;;  %v269_v11 = vsel %vm268_vm0, %v264_v7, 0.0  ;;  %v278_v12 = vsel %vm268_vm0, %v267_v8, 0.0  ;;  %v272_v13 = vsel %vm268_vm0, %v265_v9, 0.0 }
  0x17   : > { %276 = vadd.xlane.f32.xlu1 %v275_v10  ;;  %270 = vadd.xlane.f32.xlu0 %v269_v11 }
  0x1b   : > { %279 = vadd.xlane.f32.xlu1 %v278_v12  ;;  %273 = vadd.xlane.f32.xlu0 %v272_v13 }
  0xa4   : > { %v277_v18 = vpop.xlane.xlu1 %276  ;;  %v271_v19 = vpop.xlane.xlu0 %270 }
  0xa5   : > { %v284_v20 = vmul.f32 0.03125, %v277_v18  ;;  %v282_v21 = vmul.f32 0.03125, %v271_v19 }
  0xa7   : > { %v288_v22 = vadd.f32 1e-06, %v284_v20  ;;  %v286_v23 = vadd.f32 1e-06, %v282_v21 }
  0xa8   : > { %v280_v24 = vpop.xlane.xlu1 %279  ;;  %v274_v25 = vpop.xlane.xlu0 %273 }
  0xa9   : > { %704 = vrsqrt.f32 %v288_v22  ;;  %v285_v26 = vmul.f32 0.03125, %v280_v24  ;;  %v283_v27 = vmul.f32 0.03125, %v274_v25 }
  0xaa   : > { %706 = vrsqrt.f32 %v286_v23 }
  0xab   : > { %v289_v29 = vadd.f32 1e-06, %v285_v26  ;;  %v287_v30 = vadd.f32 1e-06, %v283_v27 }
  0xad   : > { %708 = vrsqrt.f32 %v289_v29 }
  0xae   : > { %710 = vrsqrt.f32 %v287_v30 }
  0xb3   : > { %v705_v35 = vpop.eup %704 }
  0xb4   : > { %v707_v36 = vpop.eup %706  ;;  %v296_v38 = vmul.f32 %v705_v35, %v649_v2 }
  0xb5   : > { %v294_v40 = vmul.f32 %v707_v36, %v645_v3 }
  0xb6   : > { %v308_v44 = vmul.f32 %v304_v37, %v296_v38 }
  0xb7   : > { %v709_v39 = vpop.eup %708  ;;  %v306_v46 = vmul.f32 %v304_v37, %v294_v40 }
  0xb8   : > { %v711_v41 = vpop.eup %710  ;;  %v297_v42 = vmul.f32 %v709_v39, %v650_v4 }
  0xb9   : > { %v295_v43 = vmul.f32 %v711_v41, %v646_v5 }
  0xba   : > { %v309_v45 = vmul.f32 %v304_v37, %v297_v42 }
  0xbb   : > { %v307_v47 = vmul.f32 %v304_v37, %v295_v43 }
  0xbc   : > { %v311_v48 = vpack.c.bf16 %v309_v45, %v308_v44 }
  0xbd   : > { %v310_v49 = vpack.c.bf16 %v307_v47, %v306_v46 }
  0xbf   : > { %664 = vmatprep.mubr.msk.bf16.mxu0 %vm268_vm0, %v310_v49  ;;  %672 = vmatprep.mubr.msk.bf16.mxu1 %vm268_vm0, %v310_v49 }
  0xc0   : > { %665 = vmatmul.mubr.msk.bf16.vlgmr.msra.gmra.mrb[0].mxu0 %vm268_vm0, %v311_v48  ;;  %673 = vmatmul.mubr.msk.bf16.vlgmr.msra.gmra.mrb[0].mxu1 %vm268_vm0, %v311_v48 }
 0x193   : > { %v666_v50 = vpop.f32.mrb[0].mxu0  ;;  %v674_v51 = vpop.f32.mrb[0].mxu1 }
 0x194   : > { %v454_v52 = vmul.f32 0.044715, %v666_v50  ;;  %v368_v53 = vpop.f32.mrb[1].mxu0  ;;  %v433_v54 = vpop.f32.mrb[1].mxu1  ;;  %v450_v16 = vmul.f32 0.5, %v666_v50 }
 0x195   : > { %v452_v55 = vmul.f32 0.044715, %v368_v53  ;;  %v667_v56 = vpop.f32.mrb[2].mxu0  ;;  %v675_v57 = vpop.f32.mrb[2].mxu1  ;;  %v448_v19 = vmul.f32 0.5, %v368_v53 }
 0x196   : > { %v458_v58 = vmul.f32 %v666_v50, %v454_v52  ;;  %v455_v59 = vmul.f32 0.044715, %v667_v56  ;;  %v371_v60 = vpop.f32.mrb[3].mxu0  ;;  %v436_v61 = vpop.f32.mrb[3].mxu1  ;;  %v451_v23 = vmul.f32 0.5, %v667_v56 }
 0x197   : > { %v456_v62 = vmul.f32 %v452_v55, %v368_v53  ;;  %v453_v63 = vmul.f32 0.044715, %v371_v60  ;;  %v449_v26 = vmul.f32 0.5, %v371_v60 }
 0x198   : > { %v462_v0 = vmul.f32 %v666_v50, %v458_v58  ;;  %v459_v1 = vmul.f32 %v667_v56, %v455_v59 }
 0x199   : > { %v460_v2 = vmul.f32 %v456_v62, %v368_v53  ;;  %v457_v3 = vmul.f32 %v453_v63, %v371_v60 }
 0x19a   : > { %v466_v4 = vadd.f32 %v666_v50, %v462_v0  ;;  %v463_v5 = vmul.f32 %v667_v56, %v459_v1 }
 0x19b   : > { %v464_v6 = vadd.f32 %v460_v2, %v368_v53  ;;  %v461_v7 = vmul.f32 %v457_v3, %v371_v60 }
 0x19c   : > { %v470_v8 = vmul.f32 0.7978846, %v466_v4  ;;  %v467_v9 = vadd.f32 %v667_v56, %v463_v5 }
 0x19d   : > { %v468_v10 = vmul.f32 0.7978846, %v464_v6  ;;  %v465_v11 = vadd.f32 %v461_v7, %v371_v60 }
 0x19e   : > { %712 = vtanh.f32 %v470_v8  ;;  %v471_v12 = vmul.f32 0.7978846, %v467_v9 }
 0x19f   : > { %714 = vtanh.f32 %v468_v10  ;;  %v469_v13 = vmul.f32 0.7978846, %v465_v11 }
 0x1a0   : > { %716 = vtanh.f32 %v471_v12 }
 0x1a1   : > { %718 = vtanh.f32 %v469_v13 }
 0x1a8   : > { %v713_v14 = vpop.eup %712 }
 0x1a9   : > { %v715_v15 = vpop.eup %714  ;;  %v478_v17 = vadd.f32 1.0, %v713_v14 }
 0x1aa   : > { %v717_v18 = vpop.eup %716  ;;  %v476_v20 = vadd.f32 1.0, %v715_v15 }
 0x1ab   : > { %v719_v21 = vpop.eup %718  ;;  %v482_v22 = vmul.f32 %v478_v17, %v450_v16  ;;  %v479_v24 = vadd.f32 1.0, %v717_v18 }
 0x1ac   : > { %v480_v25 = vmul.f32 %v476_v20, %v448_v19  ;;  %v477_v27 = vadd.f32 1.0, %v719_v21 }
 0x1ad   : > { %v486_v28 = vmul.f32 %v674_v51, %v482_v22  ;;  %v483_v29 = vmul.f32 %v479_v24, %v451_v23 }
 0x1ae   : > { %v484_v30 = vmul.f32 %v480_v25, %v433_v54  ;;  %v481_v31 = vmul.f32 %v477_v27, %v449_v26 }
 0x1af   : > { %v487_v32 = vmul.f32 %v675_v57, %v483_v29  ;;  %v641_v36 = vpack.c.bf16 %v486_v28, %v486_v28 }
 0x1b0   : > { %v639_v33 = vpack.c.bf16 %v484_v30, %v484_v30  ;;  %v485_v34 = vmul.f32 %v481_v31, %v436_v61 }
 0x1b1   : > { %v642_v37 = vpack.c.bf16 %v487_v32, %v487_v32  ;;  %507 = vst.msk [vmem:[%s253_s10 + $0x8] sm:$0xf] %vm504_vm1, %v641_v36 }
 0x1b2   : > { %505 = vst.msk [vmem:[%s253_s10] sm:$0xf] %vm504_vm1, %v639_v33  ;;  %v640_v35 = vpack.c.bf16 %v485_v34, %v485_v34 }
 0x1b3   : > { %508 = vst.msk [vmem:[%s253_s10 + $0xc] sm:$0xf] %vm504_vm1, %v642_v37 }
 0x1b4   : > { %506 = vst.msk [vmem:[%s253_s10 + $0x4] sm:$0xf] %vm504_vm1, %v640_v35 }
 0x1b5 PF: > { %s14_s17 = sadd.s32 1, %s742_s17   ;;  %s837_s15 = smov %s738_s16 }
 0x1b6   : > { %p11_p5 = scmp.ge.s32.totalorder %s14_s17, 4   ;;  %s838_s16 = smov %s840_s18 }
 0x1b8   :  { %13 = sbr.rel (!%p11_p5) target bundleno = 2 (0x2), region = 72 }

// kernel: paligemma_forward.41
= control target key start
LH: loop header
LB: loop body
LE: loop exit
PB: predicated region body
PF: predicated region fallthrough
CT: control target
= control target key end

     0   :  { %s612_s12 = smov 0   ;;  %s614_s13 = smov 0   ;;  %s660_s0 = inlined_call_operand.vmem [shape: bf16[64,64], index: 0, kind: input, shape index: {}]   ;;  %s661_s1 = inlined_call_operand.vmem [shape: bf16[64,32], index: 1, kind: input, shape index: {}]   ;;  %s662_s2 = inlined_call_operand.vmem [shape: bf16[64,32], index: 2, kind: input, shape index: {}]   ;;  %s663_s3 = inlined_call_operand.vmem [shape: bf16[64,32], index: 3, kind: output, shape index: {}]  }
   0x1   :  { %s616_s14 = smov 0  }
   0x2 LB: > { %s22_s15 = sadd.s32 1, %s586_s13  ;;  %p486_p0 = scmp.ge.s32.totalorder %s590_s14, 1  ;;  %s590_s14 = sphi %s616_s14, %s13_s14   ;;  %s586_s13 = sphi %s614_s13, %s665_s13   ;;  %s582_s12 = sphi %s612_s12, %s664_s12  }
   0x3   : > { %p23_p1 = scmp.ge.s32.totalorder %s22_s15, 2  ;;  %p177_p2 = scmp.lt.s32.totalorder %s590_s14, 3 }
   0x5   : > { %s667_s15 = smov (%p23_p1, %s22_s15), 0  ;;  %p178_p3 = pnand %p486_p0, %p177_p2 }
   0x6   : > { %v562_v0 = vld [vmem:[%s661_s1] sm:$0xff] (!%p178_p3)   ;;  %s487_s18 = sshll.u32 (!%p178_p3), %s582_s12, 2  ;;  %v563_v1 = vld [vmem:[%s661_s1 + $0x8] sm:$0xff] (!%p178_p3)   ;;  %v564_v2 = vld [vmem:[%s661_s1 + $0x10] sm:$0xff] (!%p178_p3)   ;;  %vm299_vm0 = vcmask (!%p178_p3), 523264   ;;  %vm371_vm1 = vcmask (!%p178_p3), 257024  }
   0x7   : > { %181 = sbr.rel (%p178_p3) target bundleno = 243 (0xf3), region = 32  ;;  %p217_p4 = scmp.lt.s32.totalorder (!%p178_p3), %s487_s18, 7  ;;  %526 = vmatprep.subr.bf16.mxu0 (!%p178_p3), %v562_v0  ;;  %v565_v4 = vld [vmem:[%s661_s1 + $0x18] sm:$0xff] (!%p178_p3)  }
   0x8   : > { %527 = vmatpush3.bf16.msra.mxu0 (!%p178_p3), %v562_v0 }
   0x9   : > { %528 = vmatprep.subr.bf16.mxu0 (!%p178_p3), %v563_v1 }
   0xc   : > { %529 = vmatpush3.bf16.msra.mxu0 (!%p178_p3), %v563_v1 }
   0xd   : > { %530 = vmatprep.subr.bf16.mxu0 (!%p178_p3), %v564_v2 }
   0xe   : > { %s669_s18 = smov (!%p217_p4, %s487_s18), 7 }
   0xf   : > { %s488_s23 = sshll.u32 %s669_s18, 2 }
  0x10   : > { %s220_s26 = scalar_lea.vmem %s660_s0, %s488_s23  ;;  %531 = vmatpush3.bf16.msra.mxu0 %v564_v2  ;;  %s233_s4 = scalar_lea.vmem %s662_s2, %s488_s23 }
  0x11   : > { %v566_v3 = vld [vmem:[%s220_s26] sm:$0xff]   ;;  %532 = vmatprep.subr.bf16.mxu0 %v565_v4  ;;  %v567_v5 = vld [vmem:[%s220_s26 + $0x8] sm:$0xff]   ;;  %s242_s7 = scalar_lea.vmem %s663_s3, %s488_s23 }
  0x12   : > { %534 = vmatprep.mubr.msk.bf16.mxu0 %vm299_vm0, %v566_v3  ;;  %v512_v6 = vld [vmem:[%s233_s4] sm:$0xff]   ;;  %v519_v7 = vld [vmem:[%s233_s4 + $0x8] sm:$0xff]  }
  0x13   : > { %v513_v8 = vunpack.c.l.bf16 %v512_v6  ;;  %v517_v9 = vunpack.c.l.bf16 %v519_v7  ;;  %v518_v11 = vunpack.c.h.bf16 %v519_v7  ;;  %v514_v12 = vunpack.c.h.bf16 %v512_v6 }
  0x14   : > { %533 = vmatpush3.bf16.msra.mxu0 %v565_v4 }
  0x17   : > { %535 = vmatmul.mubr.msk.bf16.vlgmr.msra.gmra.mrb[0].mxu0 %vm299_vm0, %v567_v5 }
  0xea   : > { %v536_v10 = vpop.f32.mrb[0].mxu0 }
  0xeb   : > { %v340_v13 = vpop.f32.mrb[1].mxu0  ;;  %v349_v16 = vadd.f32 %v536_v10, %v517_v9 }
  0xec   : > { %v341_v14 = vadd.f32 %v513_v8, %v340_v13  ;;  %v537_v15 = vpop.f32.mrb[2].mxu0 }
  0xed   : > { %v343_v17 = vpop.f32.mrb[3].mxu0  ;;  %v352_v19 = vadd.f32 %v537_v15, %v518_v11  ;;  %v509_v22 = vpack.c.bf16 %v349_v16, %v349_v16 }
  0xee   : > { %v507_v18 = vpack.c.bf16 %v341_v14, %v341_v14  ;;  %v344_v20 = vadd.f32 %v514_v12, %v343_v17 }
  0xef   : > { %v510_v23 = vpack.c.bf16 %v352_v19, %v352_v19  ;;  %374 = vst.msk [vmem:[%s242_s7 + $0x8] sm:$0xf] %vm371_vm1, %v509_v22 }
  0xf0   : > { %372 = vst.msk [vmem:[%s242_s7] sm:$0xf] %vm371_vm1, %v507_v18  ;;  %v508_v21 = vpack.c.bf16 %v344_v20, %v344_v20 }
  0xf1   : > { %375 = vst.msk [vmem:[%s242_s7 + $0xc] sm:$0xf] %vm371_vm1, %v510_v23 }
  0xf2   : > { %373 = vst.msk [vmem:[%s242_s7 + $0x4] sm:$0xf] %vm371_vm1, %v508_v21 }
  0xf3 PF: > { %s13_s14 = sadd.s32 1, %s590_s14   ;;  %s664_s12 = smov %s586_s13 }
  0xf4   : > { %p10_p5 = scmp.ge.s32.totalorder %s13_s14, 4   ;;  %s665_s13 = smov %s667_s15 }
  0xf6   :  { %12 = sbr.rel (!%p10_p5) target bundleno = 2 (0x2), region = 68 }

// kernel: paligemma_forward.47
= control target key start
LH: loop header
LB: loop body
LE: loop exit
PB: predicated region body
PF: predicated region fallthrough
CT: control target
= control target key end

     0   :  { %8 = vsyncpa [#allocation3], 0  ;;  %s809_s0 = inlined_call_operand.vmem [shape: bf16[64,32], index: 0, kind: input, shape index: {}]   ;;  %s810_s1 = inlined_call_operand.vmem [shape: f32[1,32], index: 1, kind: input, shape index: {}]   ;;  %s811_s2 = inlined_call_operand.vmem [shape: bf16[32,256], index: 2, kind: input, shape index: {}]   ;;  %s812_s3 = inlined_call_operand.hbm [shape: f32[64,256], index: 3, kind: output, shape index: {}]  }
   0x1   :  { %10 = vsyncpa [#allocation3 + $0x1], 0  ;;  %s674_s12 = smov 0   ;;  %s676_s13 = smov 0  }
   0x2   :  { %s678_s14 = smov 0   ;;  %s680_s15 = smov 0  }
   0x3   :  { %s682_s16 = smov 0   ;;  %s684_s17 = smov 0  }
   0x4 LB: > { %s462_s18 = sadd.s32 4294967295, %s648_s17   ;;  %s463_s19 = sadd.s32 4294967294, %s648_s17   ;;  %s648_s17 = sphi %s684_s17, %s16_s17   ;;  %s644_s16 = sphi %s682_s16, %s819_s16   ;;  %s640_s15 = sphi %s680_s15, %s818_s15   ;;  %s636_s14 = sphi %s678_s14, %s817_s14   ;;  %s632_s13 = sphi %s676_s13, %s816_s13   ;;  %s628_s12 = sphi %s674_s12, %s815_s12  }
   0x5   : > { %s25_s20 = sadd.s32 1, %s644_s16  ;;  %s110_s21 = sadd.s32 1, %s636_s14 }
   0x6   : > { %p26_p0 = scmp.ge.s32.totalorder %s25_s20, 2  ;;  %p120_p1 = scmp.ne.s32.totalorder %s636_s14, %s632_s13 }
   0x7   : > { %p121_p2 = scmp.eq.s32.totalorder %s462_s18, 1  ;;  %p126_p3 = scmp.ne.s32.totalorder %s632_s13, %s628_s12 }
   0x8   : > { %s821_s20 = smov (%p26_p0, %s25_s20), 0  ;;  %p127_p5 = scmp.eq.s32.totalorder %s463_s19, 1 }
   0x9   : > { %p714_p4 = por %p121_p2, %p120_p1  ;;  %s105_s23 = ssub.s32 %s644_s16, %s821_s20 }
   0xa   : > { %p467_p6 = scmp.ge.s32.totalorder %s648_s17, 1  ;;  %p108_p7 = scmp.eq.s32.totalorder %s105_s23, 0 }
   0xb   : > { %p721_p8 = por %p127_p5, %p126_p3  ;;  %p166_p9 = scmp.lt.s32.totalorder %s648_s17, 3 }
   0xc   : > { %s727_s25 = scalar_select %p108_p7, %s636_s14, %s110_s21  }
   0xd   : > { %p167_p10 = pnand %p467_p6, %p166_p9 }
   0xe   : > { %s469_s26 = sshll.u32 (!%p167_p10), %s640_s15, 2  ;;  %vm222_vm0 = vcmask (!%p167_p10), 261120   ;;  %v556_v14 = vld [vmem:[%s811_s2 + $0x4] ss:$8 sps:$4 sm:$0xff] (!%p167_p10)   ;;  %v558_v15 = vld [vmem:[%s811_s2] ss:$8 sps:$4 sm:$0xff] (!%p167_p10)   ;;  %v255_v29 = vlaneseq (!%p167_p10) }
   0xf   : > { %170 = sbr.rel (%p167_p10) target bundleno = 429 (0x1ad), region = 32  ;;  %p196_p11 = scmp.lt.s32.totalorder (!%p167_p10), %s469_s26, 7  ;;  %v559_v16 = vld [vmem:[%s811_s2 + $0x14] ss:$8 sps:$4 sm:$0xff] (!%p167_p10)   ;;  %296 = vmatprep.subr.bf16.mxu0 (!%p167_p10), %v556_v14  ;;  %494 = vmatprep.subr.bf16.mxu1 (!%p167_p10), %v556_v14  ;;  %v561_v17 = vld [vmem:[%s811_s2 + $0x10] ss:$8 sps:$4 sm:$0xff] (!%p167_p10)  }
  0x10   : > { %297 = vmatpush1.bf16.msra.mxu0 (!%p167_p10), %v558_v15  ;;  %496 = vmatpush1.bf16.msra.mxu1 (!%p167_p10), %v558_v15  ;;  %v650_v18 = vmov (!%p167_p10), 0   ;;  %v256_v32 = vshrl.u32 (!%p167_p10), %v255_v29, 7  ;;  %v252_v33 = vld [vmem:[%s810_s1] sm:$0x1] (!%p167_p10)  ;;  %s192_s21 = sand.u32 (!%p167_p10), 1, %s632_s13   ;;  %s484_s28 = sshll.u32 (!%p167_p10), %s640_s15, 10 }
  0x11   : > { %298 = vmatprep.subr.bf16.mxu0 (!%p167_p10), %v559_v16  ;;  %495 = vmatprep.subr.bf16.mxu1 (!%p167_p10), %v559_v16  ;;  %v253_v34 = vadd.f32 (!%p167_p10), 1.0, %v252_v33  ;;  %s468_s23 = sshll.u32 (!%p167_p10), %s192_s21, 6  ;;  %s761_s4 = scalar_lea.hbm (!%p167_p10), %s812_s3, %s484_s28 }
  0x12   : > { %328 = vmatprep.mubr.bf16.mxu0 (!%p167_p10), %v650_v18  ;;  %338 = vmatprep.mubr.bf16.mxu1 (!%p167_p10), %v650_v18  ;;  %v257_v35 = vsub.s32 (!%p167_p10), 0, %v256_v32  ;;  %s763_s15 = scalar_lea.sflag (!%p167_p10), [#allocation3], %s192_s21  ;;  %s651_s6 = smov (!%p167_p10), [#allocation2]  }
  0x13   : > { %s574_s7 = sshll.u32 (!%p167_p10), %s651_s6, 4  ;;  %s575_s7 = int_to_ptr.vmem [resolvable:$false] %s574_s7 }
  0x14   : > { %299 = vmatpush1.bf16.msra.mxu0 (!%p167_p10), %v561_v17  ;;  %497 = vmatpush1.bf16.msra.mxu1 (!%p167_p10), %v561_v17  ;;  %v258_v38 = vrot.slane (!%p167_p10), %v253_v34, %v257_v35  ;;  %s576_s8 = scalar_lea.vmem (!%p167_p10), %s575_s7, 2048 }
  0x16   : > { %s823_s26 = smov (!%p196_p11, %s469_s26), 7 }
  0x17   : > { %s470_s27 = sshll.u32 %s823_s26, 2  ;;  %s194_s26 = scalar_lea.vmem [#allocation2], %s468_s23 }
  0x18   : > { %s199_s30 = scalar_lea.vmem %s809_s0, %s470_s27  ;;  %s374_s27 = sshll.u32 %s194_s26, 4  ;;  %s756_s27 = int_to_ptr.vmem [resolvable:$true] %s374_s27 }
  0x19   : > { %v493_v0 = vld [vmem:[%s199_s30 + $0x8] sm:$0xff]   ;;  %v486_v1 = vld [vmem:[%s199_s30] sm:$0xff]   ;;  %s570_s5 = scalar_lea.vmem %s756_s27, 1024  ;;  %p577_p1 = scmp.lt.s32.totalorder %s756_s27, %s575_s7 }
  0x1a   : > { %v491_v2 = vunpack.c.l.bf16 %v493_v0  ;;  %v487_v3 = vunpack.c.l.bf16 %v486_v1  ;;  %v492_v4 = vunpack.c.h.bf16 %v493_v0  ;;  %v488_v5 = vunpack.c.h.bf16 %v486_v1  ;;  %p571_p12 = scmp.ne.s32.totalorder %s756_s27, %s570_s5  ;;  %p578_p2 = scmp.lt.s32.totalorder %s576_s8, %s570_s5 }
  0x1c   : > { %v220_v6 = vmul.f32 %v491_v2, %v491_v2  ;;  %v218_v7 = vmul.f32 %v487_v3, %v487_v3  ;;  %v221_v8 = vmul.f32 %v492_v4, %v492_v4  ;;  %v219_v9 = vmul.f32 %v488_v5, %v488_v5  ;;  %p572_p13 = pnand %p571_p12, %p714_p4  ;;  %p579_p3 = por %p578_p2, %p577_p1 }
  0x1e   : > { %v229_v10 = vsel %vm222_vm0, %v220_v6, 0.0  ;;  %v223_v11 = vsel %vm222_vm0, %v218_v7, 0.0  ;;  %v232_v12 = vsel %vm222_vm0, %v221_v8, 0.0  ;;  %v226_v13 = vsel %vm222_vm0, %v219_v9, 0.0  ;;  %p573_p0 = pneg %p572_p13 }
  0x1f   : > { %230 = vadd.xlane.f32.xlu1 %v229_v10  ;;  %224 = vadd.xlane.f32.xlu0 %v223_v11 }
  0x20   : > { %p580_p5 = pnand %p579_p3, %p573_p0 }
  0x23   : > { %233 = vadd.xlane.f32.xlu1 %v232_v12  ;;  %227 = vadd.xlane.f32.xlu0 %v226_v13 }
  0xac   : > { %v231_v19 = vpop.xlane.xlu1 %230  ;;  %v225_v20 = vpop.xlane.xlu0 %224 }
  0xad   : > { %v238_v21 = vmul.f32 0.03125, %v231_v19  ;;  %v236_v22 = vmul.f32 0.03125, %v225_v20 }
  0xaf   : > { %v242_v23 = vadd.f32 1e-06, %v238_v21  ;;  %v240_v24 = vadd.f32 1e-06, %v236_v22 }
  0xb0   : > { %v234_v25 = vpop.xlane.xlu1 %233  ;;  %v228_v26 = vpop.xlane.xlu0 %227 }
  0xb1   : > { %562 = vrsqrt.f32 %v242_v23  ;;  %v239_v27 = vmul.f32 0.03125, %v234_v25  ;;  %v237_v28 = vmul.f32 0.03125, %v228_v26 }
  0xb2   : > { %564 = vrsqrt.f32 %v240_v24 }
  0xb3   : > { %v243_v30 = vadd.f32 1e-06, %v239_v27  ;;  %v241_v31 = vadd.f32 1e-06, %v237_v28 }
  0xb5   : > { %566 = vrsqrt.f32 %v243_v30 }
  0xb6   : > { %568 = vrsqrt.f32 %v241_v31 }
  0xbb   : > { %v563_v36 = vpop.eup %562 }
  0xbc   : > { %v565_v37 = vpop.eup %564  ;;  %v250_v39 = vmul.f32 %v563_v36, %v491_v2 }
  0xbd   : > { %v248_v41 = vmul.f32 %v565_v37, %v487_v3 }
  0xbe   : > { %v262_v45 = vmul.f32 %v258_v38, %v250_v39 }
  0xbf   : > { %v567_v40 = vpop.eup %566  ;;  %v260_v47 = vmul.f32 %v258_v38, %v248_v41 }
  0xc0   : > { %v569_v42 = vpop.eup %568  ;;  %v251_v43 = vmul.f32 %v567_v40, %v492_v4 }
  0xc1   : > { %v249_v44 = vmul.f32 %v569_v42, %v488_v5 }
  0xc2   : > { %v263_v46 = vmul.f32 %v258_v38, %v251_v43 }
  0xc3   : > { %v261_v48 = vmul.f32 %v258_v38, %v249_v44 }
  0xc4   : > { %v265_v49 = vpack.c.bf16 %v263_v46, %v262_v45 }
  0xc5   : > { %v264_v50 = vpack.c.bf16 %v261_v48, %v260_v47 }
  0xc6   : > { %476 = vmatmul.mubr.msk.bf16.vlgmr.msra.gmra.mrb[0].mxu1 %vm222_vm0, %v265_v49 }
  0xc7   : > { %475 = vmatmul.mubr.msk.bf16.vlgmr.msra.gmra.mrb[0].mxu0 %vm222_vm0, %v264_v50 }
 0x199   : > { %v340_v51 = vpop.f32.mrb[0].mxu1 }
 0x19a   : > { %v330_v52 = vpop.f32.mrb[0].mxu0  ;;  %353 = vst [vmem:[%s194_s26 + $0x20] sm:$0xff] %v340_v51  ;;  %v342_v53 = vpop.f32.mrb[1].mxu1 }
 0x19b   : > { %349 = vst [vmem:[%s194_s26] sm:$0xff] %v330_v52  ;;  %v332_v54 = vpop.f32.mrb[1].mxu0  ;;  %354 = vst [vmem:[%s194_s26 + $0x28] sm:$0xff] %v342_v53  ;;  %v344_v55 = vpop.f32.mrb[2].mxu1 }
 0x19c   : > { %350 = vst [vmem:[%s194_s26 + $0x8] sm:$0xff] %v332_v54  ;;  %v334_v56 = vpop.f32.mrb[2].mxu0  ;;  %355 = vst [vmem:[%s194_s26 + $0x30] sm:$0xff] %v344_v55  ;;  %v346_v57 = vpop.f32.mrb[3].mxu1 }
 0x19d   : > { %351 = vst [vmem:[%s194_s26 + $0x10] sm:$0xff] %v334_v56  ;;  %v336_v58 = vpop.f32.mrb[3].mxu0  ;;  %356 = vst [vmem:[%s194_s26 + $0x38] sm:$0xff] %v346_v57 }
 0x19e   : > { %352 = vst [vmem:[%s194_s26 + $0x18] sm:$0xff] %v336_v58 }
 0x19f   : > { %583 = shalt.err (!%p580_p5)
}
 0x1a0   : > { %s584_s9 = scalar_lea.hbm %s761_s4, 1024  ;;  %s588_s18 = scalar_lea.hbm %s812_s3, 2048 }
 0x1a1   : > { %p585_p6 = scmp.ne.s32.totalorder %s761_s4, %s584_s9  ;;  %p589_p10 = scmp.lt.u32.totalorder %s761_s4, %s812_s3 }
 0x1a2   : > { %p590_p11 = scmp.lt.u32.totalorder %s588_s18, %s584_s9  ;;  %p592_p13 = scmp.lt.u32.totalorder %s584_s9, %s761_s4 }
 0x1a3   : > { %p586_p7 = pnand %p585_p6, %p714_p4 }
 0x1a4   : > { %p591_p12 = por %p590_p11, %p589_p10 }
 0x1a5   : > { %p587_p9 = pneg %p586_p7 }
 0x1a6   : > { %p593_p0 = por %p592_p13, %p591_p12 }
 0x1a8   : > { %p594_p1 = pnand %p593_p0, %p587_p9 }
 0x1aa   : > { %597 = shalt.err (!%p594_p1)
}
 0x1ab   : > { %s652_s23 = smov 256   ;;  %s653_s26 = smov 16  }
 0x1ac   : > { %498 = dma.vmem_to_hbm [thread:$0]  (%p714_p4), %s756_s27, 1024, %s761_s4, %s763_s15, %s652_s23, %s652_s23, %s653_s26  }
 0x1ad PF: > { %p504_p2 = scmp.ge.s32.totalorder %s648_s17, 2  ;;  %s389_s28 = sand.u32 1, %s628_s12  }
 0x1ae   : > { %s390_s29 = scalar_lea.sflag [#allocation3], %s389_s28 }
 0x1af   : > { %p501_p3 = pnand %p504_p2, %p721_p8 }
 0x1b1   : > { %623 = dma.done.wait (!%p501_p3), %s390_s29, 1024  }
 0x1b2   : > { %625 = vsyncadd (!%p501_p3), %s390_s29, 4294966272  ;;  %s16_s17 = sadd.s32 1, %s648_s17   ;;  %s815_s12 = smov %s632_s13 }
 0x1b3   : > { %p13_p5 = scmp.ge.s32.totalorder %s16_s17, 4   ;;  %s816_s13 = smov %s636_s14 }
 0x1b4   : > { %s817_s14 = smov %s727_s25  ;;  %s818_s15 = smov %s644_s16 }
 0x1b5   : > { %s819_s16 = smov %s821_s20  ;;  %15 = sbr.rel (!%p13_p5) target bundleno = 4 (0x4), region = 70 }
 0x1bc   :  { %395 = vsyncpa [#allocation3], 1 }
 0x1bd   :  { %397 = vsyncpa [#allocation3 + $0x1], 1 }

// kernel: paligemma_forward.38
= control target key start
LH: loop header
LB: loop body
LE: loop exit
PB: predicated region body
PF: predicated region fallthrough
CT: control target
= control target key end

     0   :  { %s2076_s21 = smov 0   ;;  %s2078_s22 = smov 0   ;;  %s2644_s0 = inlined_call_operand.vmem [shape: bf16[2,32,96], index: 0, kind: input, shape index: {}, may-alias: {0,1}]   ;;  %s2645_s1 = inlined_call_operand.vmem [shape: bf16[2,32,96], index: 1, kind: input, shape index: {}, may-alias: {0,1}]   ;;  %s2646_s2 = inlined_call_operand.vmem [shape: f32[2,32,8], index: 2, kind: input, shape index: {}, may-alias: {2,4}]   ;;  %s2647_s3 = inlined_call_operand.vmem [shape: f32[2,32,8], index: 3, kind: input, shape index: {}, may-alias: {3,5}]   ;;  %s2648_s4 = inlined_call_operand.vmem [shape: f32[2,32,8], index: 4, kind: input, shape index: {}, may-alias: {2,4}]   ;;  %s2649_s5 = inlined_call_operand.vmem [shape: f32[2,32,8], index: 5, kind: input, shape index: {}, may-alias: {3,5}]   ;;  %s2650_s6 = inlined_call_operand.vmem [shape: bf16[2,32,32], index: 6, kind: output, shape index: {}]  }
   0x1   :  { %s2080_s23 = smov 0   ;;  %s2082_s24 = smov 0  }
   0x2   :  { %s2084_s25 = smov 0  }
   0x3 LB: > { %s25_s26 = sadd.s32 1, %s2016_s23  ;;  %s28_s27 = sadd.s32 1, %s2020_s24  ;;  %s2024_s25 = sphi %s2084_s25, %s16_s25   ;;  %s2020_s24 = sphi %s2082_s24, %s2654_s24   ;;  %s2016_s23 = sphi %s2080_s23, %s2653_s23   ;;  %s2012_s22 = sphi %s2078_s22, %s2652_s22   ;;  %s2008_s21 = sphi %s2076_s21, %s2651_s21  }
   0x4   : > { %p26_p0 = scmp.ge.s32.totalorder %s25_s26, 2  ;;  %p1690_p1 = scmp.ge.s32.totalorder %s2024_s25, 1 }
   0x5   : > { %p297_p2 = scmp.lt.s32.totalorder %s2024_s25, 5 }
   0x6   : > { %s2656_s26 = smov (%p26_p0, %s25_s26), 0  ;;  %s2658_s27 = smov (!%p26_p0, %s28_s27), %s2020_s24 }
   0x7   : > { %p298_p3 = pnand %p1690_p1, %p297_p2  ;;  %p30_p4 = scmp.ge.s32.totalorder %s2658_s27, 2 }
   0x8   : > { %p369_p5 = scmp.lt.s32.totalorder (!%p298_p3), %s2012_s22, 1  ;;  %s2026_s8 = smov (!%p298_p3), 120   ;;  %vm590_vm0 = vcmask (!%p298_p3), 31744   ;;  %vm2035_vm1 = vmmov (!%p298_p3), 0   ;;  %vm937_vm2 = vcmask (!%p298_p3), 64512   ;;  %vm1164_vm3 = vcmask (!%p298_p3), 261120  }
   0x9   : > { %s2660_s27 = smov (%p30_p4, %s2658_s27), 0  ;;  %301 = sbr.rel (%p298_p3) target bundleno = 1419 (0x58b), region = 44 }
   0xa   : > { %s2027_s9 = smov (!%p298_p3), 112   ;;  %s2028_s10 = smov (!%p298_p3), 104   ;;  %vm1507_vm4 = vcmask (!%p298_p3), 130048   ;;  %vm1510_vm5 = vcmask (!%p298_p3), 195584   ;;  %vm1521_vm6 = vcmask (!%p298_p3), 257024  }
   0xb   : > { %s2029_s11 = smov (!%p298_p3), 92   ;;  %s2030_s12 = smov (!%p298_p3), 100  }
   0xc   : > { %s1691_s13 = sshll.u32 (!%p298_p3), %s2008_s21, 1  ;;  %s2031_s21 = smov (!%p298_p3), 32  }
   0xd   : > { %p371_p6 = scmp.lt.s32.totalorder (!%p298_p3), %s1691_s13, 3 }
  0x10   : > { %s2662_s22 = smov (!%p369_p5, %s2012_s22), 1  ;;  %s2664_s13 = smov (!%p371_p6, %s1691_s13), 3 }
  0x11   : > { %s1729_s28 = sshll.u32 %s2662_s22, 4  ;;  %s1730_s14 = sshll.u32 %s2662_s22, 5 }
  0x12   : > { %s382_s7 = scalar_lea.vmem %s2645_s1, %s1729_s28  ;;  %s1692_s15 = sshll.u32 %s2662_s22, 2 }
  0x13   : > { %v2114_v0 = vld [vmem:[%s382_s7 + $0x8] sm:$0xf]  ;;  %v2116_v1 = vld [vmem:[%s382_s7] sm:$0xf]  ;;  %v2122_v2 = vld [vmem:[%s382_s7 + $0xc] sm:$0xf]  ;;  %s407_s18 = scalar_lea.vmem %s2648_s4, %s1730_s14  ;;  %s2277_s19 = sadd.s32 %s1692_s15, %s2664_s13 }
  0x14   : > { %466 = vrot.lane.b32.xlu1 %v2114_v0, %s2026_s8  ;;  %462 = vrot.lane.b32.xlu0 %v2116_v1, %s2026_s8  ;;  %v2124_v3 = vld [vmem:[%s382_s7 + $0x4] sm:$0xf]  ;;  %v2143_v4 = vunpack.c.l.bf16 %v2116_v1  ;;  %v2155_v8 = vunpack.c.l.bf16 %v2122_v2  ;;  %v2162_v10 = vunpack.c.l.bf16 %v2114_v0  ;;  %s1693_s20 = sshll.u32 %s2277_s19, 2  ;;  %v624_v60 = vld [vmem:[%s407_s18 + $0x8] sm:$0xff]  ;;  %s412_s29 = scalar_lea.vmem %s2649_s5, %s1730_s14 }
  0x15   : > { %v2146_v5 = vunpack.c.l.bf16 %v2124_v3  ;;  %v623_v58 = vld [vmem:[%s407_s18] sm:$0xff]  ;;  %v625_v61 = vld [vmem:[%s407_s18 + $0x10] sm:$0xff]  ;;  %s2038_s22 = smov 8   ;;  %s2039_s28 = smov 16  }
  0x16   : > { %v631_v6 = vsub.f32 0.0, %v2143_v4  ;;  %v634_v11 = vsub.f32 0.0, %v2155_v8  ;;  %v633_v12 = vsub.f32 0.0, %v2162_v10  ;;  %v1882_v13 = vpack.i.bf16 %v2155_v8, %v2162_v10 }
  0x17   : > { %v632_v7 = vsub.f32 0.0, %v2146_v5  ;;  %v1877_v9 = vpack.i.bf16 %v2146_v5, %v2143_v4 }
  0x18   : > { %468 = vrot.lane.b32.xlu1 %v2122_v2, %s2026_s8  ;;  %464 = vrot.lane.b32.xlu0 %v2124_v3, %s2026_s8 }
  0x1c   : > { %476 = vrot.lane.b32.xlu1 %v2124_v3, %s2027_s9  ;;  %474 = vrot.lane.b32.xlu0 %v2116_v1, %s2027_s9 }
  0x20   : > { %488 = vrot.lane.b32.xlu1 %v2124_v3, %s2028_s10  ;;  %486 = vrot.lane.b32.xlu0 %v2116_v1, %s2028_s10 }
  0x24   : > { %480 = vrot.lane.b32.xlu1 %v2122_v2, %s2027_s9  ;;  %478 = vrot.lane.b32.xlu0 %v2114_v0, %s2027_s9 }
  0x28   : > { %492 = vrot.lane.b32.xlu1 %v2122_v2, %s2028_s10  ;;  %490 = vrot.lane.b32.xlu0 %v2114_v0, %s2028_s10 }
  0x2c   : > { %663 = vrot.lane.b32.xlu0 %v631_v6, %s2029_s11  ;;  %665 = vrot.lane.b32.xlu1 %v632_v7, %s2029_s11  ;;  %v626_v6 = vld [vmem:[%s407_s18 + $0x18] sm:$0xff] }
  0x30   : > { %1878 = vrot.lane.b32.xlu0 %v1877_v9, %s2030_s12  ;;  %669 = vrot.lane.b32.xlu1 %v634_v11, %s2029_s11  ;;  %v2296_v11 = vld [vmem:[%s412_s29] sm:$0xff] }
  0x34   : > { %667 = vrot.lane.b32.xlu0 %v633_v12, %s2029_s11 }
  0x38   : > { %1883 = vrot.lane.b32.xlu0 %v1882_v13, %s2030_s12 }
  0x86   : > { %v2172_v14 = vpop.permute.xlu1 %466  ;;  %v2174_v15 = vpop.permute.xlu0 %462 }
  0x87   : > { %v2181_v18 = vunpack.c.l.bf16 %v2174_v15  ;;  %v2196_v24 = vunpack.c.l.bf16 %v2172_v14 }
  0x89   : > { %v635_v39 = vsub.f32 0.0, %v2181_v18  ;;  %v637_v41 = vsub.f32 0.0, %v2196_v24 }
  0x8a   : > { %v2176_v16 = vpop.permute.xlu1 %468  ;;  %v2178_v17 = vpop.permute.xlu0 %464 }
  0x8b   : > { %v2184_v19 = vunpack.c.l.bf16 %v2178_v17  ;;  %v2187_v20 = vunpack.c.l.bf16 %v2176_v16 }
  0x8d   : > { %v1887_v21 = vpack.i.bf16 %v2184_v19, %v2181_v18  ;;  %v1892_v27 = vpack.i.bf16 %v2187_v20, %v2196_v24  ;;  %v636_v34 = vsub.f32 0.0, %v2184_v19  ;;  %v638_v42 = vsub.f32 0.0, %v2187_v20 }
  0x8e   : > { %v2191_v22 = vpop.permute.xlu1 %476  ;;  %v2193_v23 = vpop.permute.xlu0 %474 }
  0x8f   : > { %v2199_v25 = vunpack.c.l.bf16 %v2191_v22  ;;  %v2202_v26 = vunpack.c.l.bf16 %v2193_v23  ;;  %1888 = vrot.lane.b32.xlu1 %v1887_v21, %s2030_s12 }
  0x91   : > { %v1897_v28 = vpack.i.bf16 %v2199_v25, %v2202_v26  ;;  %v640_v44 = vsub.f32 0.0, %v2199_v25  ;;  %v639_v45 = vsub.f32 0.0, %v2202_v26 }
  0x92   : > { %v2209_v29 = vpop.permute.xlu1 %488  ;;  %v2211_v30 = vpop.permute.xlu0 %486 }
  0x93   : > { %v2214_v31 = vunpack.c.l.bf16 %v2209_v29  ;;  %v2217_v32 = vunpack.c.l.bf16 %v2211_v30  ;;  %1893 = vrot.lane.b32.xlu1 %v1892_v27, %s2030_s12  ;;  %1898 = vrot.lane.b32.xlu0 %v1897_v28, %s2030_s12  ;;  %v628_v28 = vld [vmem:[%s412_s29 + $0x8] sm:$0xff] }
  0x95   : > { %v1902_v33 = vpack.i.bf16 %v2214_v31, %v2217_v32  ;;  %v643_v48 = vsub.f32 0.0, %v2217_v32  ;;  %v644_v49 = vsub.f32 0.0, %v2214_v31 }
  0x96   : > { %v2224_v35 = vpop.permute.xlu1 %480  ;;  %v2226_v36 = vpop.permute.xlu0 %478 }
  0x97   : > { %v2229_v37 = vunpack.c.l.bf16 %v2224_v35  ;;  %v2232_v38 = vunpack.c.l.bf16 %v2226_v36  ;;  %1903 = vrot.lane.b32.xlu1 %v1902_v33, %s2030_s12  ;;  %673 = vrot.lane.b32.xlu0 %v636_v34, %s2029_s11 }
  0x99   : > { %v1907_v40 = vpack.i.bf16 %v2229_v37, %v2232_v38  ;;  %v642_v52 = vsub.f32 0.0, %v2229_v37  ;;  %v641_v53 = vsub.f32 0.0, %v2232_v38 }
  0x9a   : > { %v2245_v43 = vpop.permute.xlu0 %490  ;;  %v2251_v47 = vpop.permute.xlu1 %492 }
  0x9b   : > { %671 = vrot.lane.b32.xlu1 %v635_v39, %s2029_s11  ;;  %1908 = vrot.lane.b32.xlu0 %v1907_v40, %s2030_s12  ;;  %v2259_v50 = vunpack.c.l.bf16 %v2251_v47  ;;  %v2262_v51 = vunpack.c.l.bf16 %v2245_v43  ;;  %v2306_v40 = vld [vmem:[%s412_s29 + $0x10] sm:$0xff] }
  0x9d   : > { %v645_v55 = vsub.f32 0.0, %v2262_v51  ;;  %v646_v56 = vsub.f32 0.0, %v2259_v50  ;;  %v1912_v59 = vpack.i.bf16 %v2259_v50, %v2262_v51 }
  0x9e   : > { %v664_v46 = vpop.permute.xlu0 %663  ;;  %v666_v21 = vpop.permute.xlu1 %665 }
  0x9f   : > { %675 = vrot.lane.b32.xlu1 %v637_v41, %s2029_s11  ;;  %677 = vrot.lane.b32.xlu0 %v638_v42, %s2029_s11 }
  0xa2   : > { %v1879_v54 = vpop.permute.xlu0 %1878  ;;  %v670_v42 = vpop.permute.xlu1 %669 }
  0xa3   : > { %681 = vrot.lane.b32.xlu1 %v640_v44, %s2029_s11  ;;  %679 = vrot.lane.b32.xlu0 %v639_v45, %s2029_s11  ;;  %v1880_v62 = vunpack.i.l.bf16 %v1879_v54  ;;  %v1881_v7 = vunpack.i.h.bf16 %v1879_v54 }
  0xa5   : > { %v775_v12 = vsel %vm590_vm0, %v664_v46, %v1880_v62  ;;  %v776_v33 = vsel %vm590_vm0, %v666_v21, %v1881_v7  ;;  %v2313_v46 = vld [vmem:[%s412_s29 + $0x18] sm:$0xff]  ;;  %s2040_s29 = smov 24  }
  0xa6   : > { %v668_v57 = vpop.permute.xlu0 %667  ;;  %v823_v27 = vmul.f32 %v775_v12, %v2296_v11  ;;  %v824_v44 = vmul.f32 %v776_v33, %v628_v28 }
  0xa7   : > { %687 = vrot.lane.b32.xlu1 %v643_v48, %s2029_s11  ;;  %689 = vrot.lane.b32.xlu0 %v644_v49, %s2029_s11 }
  0xaa   : > { %v1884_v63 = vpop.permute.xlu0 %1883 }
  0xab   : > { %685 = vrot.lane.b32.xlu1 %v642_v52, %s2029_s11  ;;  %683 = vrot.lane.b32.xlu0 %v641_v53, %s2029_s11  ;;  %v1885_v13 = vunpack.i.l.bf16 %v1884_v63  ;;  %v1886_v39 = vunpack.i.h.bf16 %v1884_v63 }
  0xad   : > { %v777_v41 = vsel %vm590_vm0, %v668_v57, %v1885_v13  ;;  %v778_v48 = vsel %vm590_vm0, %v670_v42, %v1886_v39 }
  0xae   : > { %v825_v45 = vmul.f32 %v777_v41, %v2306_v40  ;;  %v826_v49 = vmul.f32 %v778_v48, %v2313_v46 }
  0xaf   : > { %691 = vrot.lane.b32.xlu1 %v645_v55, %s2029_s11  ;;  %693 = vrot.lane.b32.xlu0 %v646_v56, %s2029_s11  ;;  %s376_s11 = scalar_lea.vmem %s2644_s0, %s1693_s20 }
  0xb0   : > { %v2294_v9 = vld [vmem:[%s376_s11] sm:$0xf]  ;;  %v2304_v34 = vld [vmem:[%s376_s11 + $0x4] sm:$0xf]  ;;  %s421_s11 = scalar_lea.vmem %s2650_s6, %s1693_s20 }
  0xb3   : > { %1913 = vrot.lane.b32.xlu1 %v1912_v59, %s2030_s12  ;;  %795 = vrot.lane.b32.xlu0 %v623_v58, %s2031_s21  ;;  %s1698_s12 = sshll.u32 %s2277_s19, 3 }
  0xb4   : > { %s401_s15 = scalar_lea.vmem %s2647_s3, %s1698_s12  ;;  %s391_s18 = scalar_lea.vmem %s2646_s2, %s1698_s12 }
  0xb7   : > { %797 = vrot.lane.b32.xlu1 %v624_v60, %s2031_s21  ;;  %799 = vrot.lane.b32.xlu0 %v625_v61, %s2031_s21 }
  0xbb   : > { %801 = vrot.lane.b32.xlu1 %v626_v6, %s2031_s21  ;;  %432 = vrot.lane.b32.xlu0 %v2294_v9, %s2026_s8 }
  0xbf   : > { %434 = vrot.lane.b32.xlu1 %v2304_v34, %s2026_s8  ;;  %855 = vrot.lane.b32.xlu0 %v823_v27, %s2031_s21  ;;  %s2033_s8 = smov 124  }
  0xc3   : > { %857 = vrot.lane.b32.xlu1 %v824_v44, %s2031_s21  ;;  %859 = vrot.lane.b32.xlu0 %v825_v45, %s2031_s21 }
  0xc7   : > { %861 = vrot.lane.b32.xlu1 %v826_v49, %s2031_s21 }
 0x101   : > { %v1889_v52 = vpop.permute.xlu1 %1888 }
 0x102   : > { %v1891_v55 = vunpack.i.h.bf16 %v1889_v52  ;;  %v1890_v60 = vunpack.i.l.bf16 %v1889_v52 }
 0x105   : > { %v1894_v53 = vpop.permute.xlu1 %1893  ;;  %v1899_v54 = vpop.permute.xlu0 %1898 }
 0x106   : > { %v1896_v7 = vunpack.i.h.bf16 %v1894_v53  ;;  %v1895_v21 = vunpack.i.l.bf16 %v1894_v53  ;;  %v1901_v39 = vunpack.i.h.bf16 %v1899_v54  ;;  %v1900_v45 = vunpack.i.l.bf16 %v1899_v54 }
 0x109   : > { %v1904_v56 = vpop.permute.xlu1 %1903  ;;  %v674_v57 = vpop.permute.xlu0 %673 }
 0x10a   : > { %v780_v58 = vsel %vm590_vm0, %v674_v57, %v1891_v55  ;;  %v1906_v53 = vunpack.i.h.bf16 %v1904_v56 }
 0x10b   : > { %v828_v59 = vmul.f32 %v780_v58, %v628_v28 }
 0x10d   : > { %v672_v61 = vpop.permute.xlu1 %671  ;;  %v1909_v62 = vpop.permute.xlu0 %1908  ;;  %865 = vrot.lane.b32.xlu1 %v828_v59, %s2031_s21  ;;  %v1905_v59 = vunpack.i.l.bf16 %v1904_v56 }
 0x10e   : > { %v779_v63 = vsel %vm590_vm0, %v672_v61, %v1890_v60 }
 0x10f   : > { %v827_v6 = vmul.f32 %v779_v63, %v2296_v11  ;;  %v1911_v63 = vunpack.i.h.bf16 %v1909_v62 }
 0x111   : > { %v676_v12 = vpop.permute.xlu1 %675  ;;  %v678_v13 = vpop.permute.xlu0 %677  ;;  %440 = vrot.lane.b32.xlu1 %v2304_v34, %s2027_s9  ;;  %863 = vrot.lane.b32.xlu0 %v827_v6, %s2031_s21 }
 0x112   : > { %v782_v27 = vsel %vm590_vm0, %v678_v13, %v1896_v7  ;;  %v781_v41 = vsel %vm590_vm0, %v676_v12, %v1895_v21  ;;  %v1910_v13 = vunpack.i.l.bf16 %v1909_v62 }
 0x113   : > { %v830_v33 = vmul.f32 %v782_v27, %v2313_v46  ;;  %v829_v49 = vmul.f32 %v781_v41, %v2306_v40 }
 0x115   : > { %v682_v42 = vpop.permute.xlu1 %681  ;;  %v680_v44 = vpop.permute.xlu0 %679  ;;  %869 = vrot.lane.b32.xlu1 %v830_v33, %s2031_s21  ;;  %438 = vrot.lane.b32.xlu0 %v2294_v9, %s2027_s9  ;;  %s2034_s9 = smov 4  }
 0x116   : > { %v784_v48 = vsel %vm590_vm0, %v682_v42, %v1901_v39  ;;  %v783_v55 = vsel %vm590_vm0, %v680_v44, %v1900_v45 }
 0x117   : > { %v832_v52 = vmul.f32 %v784_v48, %v628_v28  ;;  %v831_v61 = vmul.f32 %v783_v55, %v2296_v11 }
 0x119   : > { %v688_v57 = vpop.permute.xlu1 %687  ;;  %v690_v58 = vpop.permute.xlu0 %689  ;;  %873 = vrot.lane.b32.xlu1 %v832_v52, %s2031_s21  ;;  %867 = vrot.lane.b32.xlu0 %v829_v49, %s2031_s21 }
 0x11a   : > { %v788_v60 = vsel %vm590_vm0, %v690_v58, %v1906_v53  ;;  %v787_v6 = vsel %vm590_vm0, %v688_v57, %v1905_v59  ;;  %v2362_v57 = vunpack.c.l.bf16 %v2294_v9  ;;  %v2367_v58 = vunpack.c.l.bf16 %v2304_v34 }
 0x11b   : > { %v836_v54 = vmul.f32 %v788_v60, %v628_v28  ;;  %v835_v27 = vmul.f32 %v787_v6, %v2296_v11 }
 0x11d   : > { %v686_v7 = vpop.permute.xlu1 %685  ;;  %v684_v12 = vpop.permute.xlu0 %683  ;;  %881 = vrot.lane.b32.xlu1 %v836_v54, %s2031_s21  ;;  %871 = vrot.lane.b32.xlu0 %v831_v61, %s2031_s21  ;;  %v2032_v61 = vmov 0.0   ;;  %v519_v54 = vsub.f32 0.0, %v2367_v58 }
 0x11e   : > { %v786_v21 = vsel %vm590_vm0, %v686_v7, %v1911_v63  ;;  %v785_v33 = vsel %vm590_vm0, %v684_v12, %v1910_v13  ;;  %1758 = vmatprep.subr.bf16.mxu0 %v2032_v61  ;;  %1766 = vmatprep.subr.bf16.mxu1 %v2032_v61 }
 0x11f   : > { %v834_v56 = vmul.f32 %v786_v21, %v2313_v46  ;;  %v833_v41 = vmul.f32 %v785_v33, %v2306_v40  ;;  %1762 = vmatprep.mubr.msk.bf16.mxu0 %vm2035_vm1, %v2032_v61  ;;  %1770 = vmatprep.mubr.msk.bf16.mxu1 %vm2035_vm1, %v2032_v61 }
 0x121   : > { %v692_v39 = vpop.permute.xlu1 %691  ;;  %v694_v28 = vpop.permute.xlu0 %693  ;;  %877 = vrot.lane.b32.xlu1 %v834_v56, %s2031_s21  ;;  %879 = vrot.lane.b32.xlu0 %v835_v27, %s2031_s21 }
 0x125   : > { %v1914_v42 = vpop.permute.xlu1 %1913  ;;  %v2350_v44 = vpop.permute.xlu0 %795  ;;  %875 = vrot.lane.b32.xlu0 %v833_v41, %s2031_s21 }
 0x126   : > { %v1916_v62 = vunpack.i.h.bf16 %v1914_v42  ;;  %v1915_v45 = vunpack.i.l.bf16 %v1914_v42  ;;  %v807_v63 = vmul.f32 %v2350_v44, %v2143_v4 }
 0x128   : > { %v790_v11 = vsel %vm590_vm0, %v694_v28, %v1916_v62  ;;  %v789_v48 = vsel %vm590_vm0, %v692_v39, %v1915_v45 }
 0x129   : > { %v2355_v49 = vpop.permute.xlu1 %797  ;;  %v2357_v52 = vpop.permute.xlu0 %799  ;;  %v838_v53 = vmul.f32 %v790_v11, %v2313_v46  ;;  %v837_v55 = vmul.f32 %v789_v48, %v2306_v40  ;;  %v518_v46 = vsub.f32 0.0, %v2362_v57  ;;  %v811_v48 = vmul.f32 %v2350_v44, %v2181_v18 }
 0x12a   : > { %v808_v13 = vmul.f32 %v2355_v49, %v2146_v5  ;;  %v809_v33 = vmul.f32 %v2357_v52, %v2162_v10  ;;  %v812_v11 = vmul.f32 %v2355_v49, %v2184_v19  ;;  %v813_v18 = vmul.f32 %v2357_v52, %v2196_v24 }
 0x12b   : > { %885 = vrot.lane.b32.xlu1 %v838_v53, %s2031_s21  ;;  %883 = vrot.lane.b32.xlu0 %v837_v55, %s2031_s21  ;;  %v820_v24 = vmul.f32 %v2355_v49, %v2214_v31  ;;  %v817_v31 = vmul.f32 %v2357_v52, %v2232_v38  ;;  %s2037_s21 = smov 64  }
 0x12d   : > { %v2369_v59 = vpop.permute.xlu1 %801  ;;  %v433_v60 = vpop.permute.xlu0 %432 }
 0x12e   : > { %v2377_v40 = vunpack.c.l.bf16 %v433_v60  ;;  %v810_v5 = vmul.f32 %v2369_v59, %v2155_v8  ;;  %v814_v19 = vmul.f32 %v2369_v59, %v2187_v20 }
 0x12f   : > { %446 = vrot.lane.b32.xlu1 %v2304_v34, %s2028_s10  ;;  %444 = vrot.lane.b32.xlu0 %v2294_v9, %s2028_s10  ;;  %v1917_v9 = vpack.i.bf16 %v2367_v58, %v2362_v57  ;;  %s2036_s10 = smov 96  }
 0x130   : > { %v520_v34 = vsub.f32 0.0, %v2377_v40 }
 0x131   : > { %v435_v6 = vpop.permute.xlu1 %434  ;;  %v856_v7 = vpop.permute.xlu0 %855 }
 0x132   : > { %v2383_v12 = vunpack.c.l.bf16 %v435_v6  ;;  %v903_v21 = vadd.f32 %v856_v7, %v807_v63 }
 0x133   : > { %534 = vrot.lane.b32.xlu0 %v518_v46, %s2033_s8  ;;  %536 = vrot.lane.b32.xlu1 %v519_v54, %s2033_s8 }
 0x134   : > { %v1922_v4 = vpack.i.bf16 %v2383_v12, %v2377_v40  ;;  %v521_v62 = vsub.f32 0.0, %v2383_v12 }
 0x135   : > { %v858_v27 = vpop.permute.xlu1 %857  ;;  %v860_v28 = vpop.permute.xlu0 %859 }
 0x136   : > { %v904_v56 = vadd.f32 %v858_v27, %v808_v13  ;;  %v905_v8 = vadd.f32 %v860_v28, %v809_v33 }
 0x137   : > { %1918 = vrot.lane.b32.xlu0 %v1917_v9, %s2034_s9  ;;  %538 = vrot.lane.b32.xlu1 %v520_v34, %s2033_s8 }
 0x138   : > { %v923_v39 = vpack.c.bf16 %v904_v56, %v903_v21 }
 0x139   : > { %v862_v41 = vpop.permute.xlu1 %861 }
 0x13a   : > { %v906_v42 = vadd.f32 %v862_v41, %v810_v5  ;;  %v816_v5 = vmul.f32 %v2355_v49, %v2199_v25 }
 0x13b   : > { %933 = vrot.lane.b32.xlu0 %v923_v39, %s2036_s10  ;;  %v815_v39 = vmul.f32 %v2350_v44, %v2202_v26 }
 0x13c   : > { %v924_v10 = vpack.c.bf16 %v906_v42, %v905_v8 }
 0x13f   : > { %540 = vrot.lane.b32.xlu0 %v521_v62, %s2033_s8 }
 0x143   : > { %935 = vrot.lane.b32.xlu0 %v924_v10, %s2036_s10 }
 0x17f   : > { %v866_v45 = vpop.permute.xlu1 %865 }
 0x180   : > { %v908_v60 = vadd.f32 %v866_v45, %v812_v11  ;;  %v818_v11 = vmul.f32 %v2369_v59, %v2229_v37  ;;  %v822_v37 = vmul.f32 %v2369_v59, %v2259_v50 }
 0x183   : > { %v441_v53 = vpop.permute.xlu1 %440  ;;  %v864_v55 = vpop.permute.xlu0 %863 }
 0x184   : > { %v2412_v46 = vunpack.c.l.bf16 %v441_v53  ;;  %v907_v54 = vadd.f32 %v864_v55, %v811_v48 }
 0x186   : > { %v925_v63 = vpack.c.bf16 %v908_v60, %v907_v54  ;;  %v523_v6 = vsub.f32 0.0, %v2412_v46  ;;  %v821_v60 = vmul.f32 %v2357_v52, %v2262_v51 }
 0x187   : > { %v870_v7 = vpop.permute.xlu1 %869  ;;  %v439_v13 = vpop.permute.xlu0 %438 }
 0x188   : > { %990 = vrot.lane.b32.xlu1 %v925_v63, %s2036_s10  ;;  %544 = vrot.lane.b32.xlu0 %v523_v6, %s2033_s8  ;;  %v910_v21 = vadd.f32 %v870_v7, %v814_v19  ;;  %v2422_v56 = vunpack.c.l.bf16 %v439_v13 }
 0x18a   : > { %v522_v62 = vsub.f32 0.0, %v2422_v56  ;;  %v1927_v55 = vpack.i.bf16 %v2412_v46, %v2422_v56 }
 0x18b   : > { %v874_v9 = vpop.permute.xlu1 %873  ;;  %v868_v34 = vpop.permute.xlu0 %867 }
 0x18c   : > { %v909_v27 = vadd.f32 %v868_v34, %v813_v18  ;;  %1923 = vrot.lane.b32.xlu1 %v1922_v4, %s2034_s9  ;;  %v912_v41 = vadd.f32 %v874_v9, %v816_v5  ;;  %v819_v4 = vmul.f32 %v2350_v44, %v2217_v32 }
 0x18e   : > { %v926_v33 = vpack.c.bf16 %v910_v21, %v909_v27 }
 0x18f   : > { %v882_v28 = vpop.permute.xlu1 %881  ;;  %v872_v20 = vpop.permute.xlu0 %871 }
 0x190   : > { %v911_v42 = vadd.f32 %v872_v20, %v815_v39  ;;  %992 = vrot.lane.b32.xlu1 %v926_v33, %s2036_s10  ;;  %v916_v10 = vadd.f32 %v882_v28, %v820_v24  ;;  %v2469_v28 = vld [vmem:[%s401_s15] sm:$0xff]  ;;  %v2476_v24 = vld [vmem:[%s391_s18 + $0x8] sm:$0xff] }
 0x192   : > { %v927_v8 = vpack.c.bf16 %v912_v41, %v911_v42  ;;  %v2472_v41 = vld [vmem:[%s401_s15 + $0x8] sm:$0xff] }
 0x193   : > { %v880_v25 = vpop.permute.xlu0 %879  ;;  %v878_v26 = vpop.permute.xlu1 %877 }
 0x194   : > { %v915_v45 = vadd.f32 %v880_v25, %v819_v4  ;;  %542 = vrot.lane.b32.xlu1 %v522_v62, %s2033_s8  ;;  %1046 = vrot.lane.b32.xlu0 %v927_v8, %s2036_s10  ;;  %v914_v53 = vadd.f32 %v878_v26, %v818_v11  ;;  %v2478_v8 = vld [vmem:[%s391_s18] sm:$0xff]  ;;  %v600_v25 = vmul.f32 %v2476_v24, %v2367_v58 }
 0x196   : > { %v929_v48 = vpack.c.bf16 %v916_v10, %v915_v45  ;;  %v599_v10 = vmul.f32 %v2478_v8, %v2362_v57 }
 0x197   : > { %v876_v49 = vpop.permute.xlu0 %875 }
 0x198   : > { %v913_v32 = vadd.f32 %v876_v49, %v817_v31  ;;  %1102 = vrot.lane.b32.xlu1 %v929_v48, %s2036_s10 }
 0x19a   : > { %v928_v44 = vpack.c.bf16 %v914_v53, %v913_v32 }
 0x19c   : > { %1928 = vrot.lane.b32.xlu1 %v1927_v55, %s2034_s9  ;;  %1048 = vrot.lane.b32.xlu0 %v928_v44, %s2036_s10 }
 0x19d   : > { %v886_v38 = vpop.permute.xlu1 %885  ;;  %v884_v54 = vpop.permute.xlu0 %883 }
 0x19e   : > { %v918_v63 = vadd.f32 %v886_v38, %v822_v37  ;;  %v917_v6 = vadd.f32 %v884_v54, %v821_v60  ;;  %v602_v54 = vmul.f32 %v2476_v24, %v2383_v12 }
 0x1a0   : > { %v930_v7 = vpack.c.bf16 %v918_v63, %v917_v6  ;;  %v601_v63 = vmul.f32 %v2478_v8, %v2377_v40 }
 0x1a1   : > { %v447_v13 = vpop.permute.xlu1 %446  ;;  %v445_v19 = vpop.permute.xlu0 %444 }
 0x1a2   : > { %v2449_v18 = vunpack.c.l.bf16 %v445_v19  ;;  %1104 = vrot.lane.b32.xlu0 %v930_v7, %s2036_s10  ;;  %v2452_v9 = vunpack.c.l.bf16 %v447_v13 }
 0x1a4   : > { %v524_v34 = vsub.f32 0.0, %v2449_v18  ;;  %v525_v59 = vsub.f32 0.0, %v2452_v9  ;;  %v1932_v51 = vpack.i.bf16 %v2452_v9, %v2449_v18 }
 0x1a5   : > { %v535_v50 = vpop.permute.xlu0 %534  ;;  %v537_v5 = vpop.permute.xlu1 %536 }
 0x1a6   : > { %546 = vrot.lane.b32.xlu1 %v524_v34, %s2033_s8  ;;  %548 = vrot.lane.b32.xlu0 %v525_v59, %s2033_s8 }
 0x1a9   : > { %v1919_v52 = vpop.permute.xlu0 %1918  ;;  %v539_v58 = vpop.permute.xlu1 %538 }
 0x1aa   : > { %1933 = vrot.lane.b32.xlu1 %v1932_v51, %s2034_s9  ;;  %v1921_v21 = vunpack.i.h.bf16 %v1919_v52  ;;  %v1920_v27 = vunpack.i.l.bf16 %v1919_v52 }
 0x1ac   : > { %v591_v20 = vsel %vm590_vm0, %v535_v50, %v1920_v27  ;;  %v592_v42 = vsel %vm590_vm0, %v537_v5, %v1921_v21 }
 0x1ad   : > { %v934_v33 = vpop.permute.xlu0 %933  ;;  %v607_v62 = vmul.f32 %v591_v20, %v2469_v28  ;;  %v608_v45 = vmul.f32 %v592_v42, %v2472_v41 }
 0x1ae   : > { %v942_v39 = vsel %vm937_vm2, %v934_v33, 0 }
 0x1af   : > { %1759 = vmatpush3.bf16.xpose.msra.mxu0 %v942_v39  ;;  %v615_v48 = vadd.f32 %v607_v62, %v599_v10  ;;  %v616_v31 = vadd.f32 %v608_v45, %v600_v25  ;;  %v604_v62 = vmul.f32 %v2476_v24, %v2412_v46  ;;  %v603_v25 = vmul.f32 %v2478_v8, %v2422_v56 }
 0x1b0   : > { %1760 = vmatprep.subr.bf16.mxu0 %v2032_v61 }
 0x1b1   : > { %v541_v4 = vpop.permute.xlu0 %540  ;;  %v919_v49 = vpack.c.bf16 %v616_v31, %v615_v48 }
 0x1b5   : > { %v936_v26 = vpop.permute.xlu0 %935 }
 0x1b6   : > { %v945_v11 = vsel %vm937_vm2, %v936_v26, 0 }
 0x1b7   : > { %1761 = vmatpush3.bf16.xpose.msra.mxu0 %v945_v11 }
 0x1b8   : > { %1774 = vmatprep.subr.bf16.mxu0 %v2032_v61 }
 0x1be   : > { %1763 = vmatmul.mubr.msk.bf16.vlgmr.msra.gmra.mrb[0].mxu0 %vm937_vm2, %v919_v49 }
 0x1bf   : > { %1778 = vmatprep.mubr.msk.bf16.mxu0 %vm2035_vm1, %v2032_v61 }
 0x1fa   : > { %v991_v53 = vpop.permute.xlu1 %990  ;;  %v545_v37 = vpop.permute.xlu0 %544 }
 0x1fb   : > { %v998_v57 = vsel %vm937_vm2, %v991_v53, 0 }
 0x1fc   : > { %1767 = vmatpush3.bf16.xpose.msra.mxu1 %v998_v57 }
 0x1fd   : > { %1768 = vmatprep.subr.bf16.mxu1 %v2032_v61 }
 0x1fe   : > { %v1924_v32 = vpop.permute.xlu1 %1923 }
 0x1ff   : > { %v1926_v44 = vunpack.i.h.bf16 %v1924_v32  ;;  %v1925_v55 = vunpack.i.l.bf16 %v1924_v32 }
 0x201   : > { %v593_v60 = vsel %vm590_vm0, %v539_v58, %v1925_v55  ;;  %v594_v38 = vsel %vm590_vm0, %v541_v4, %v1926_v44  ;;  %v606_v55 = vmul.f32 %v2476_v24, %v2452_v9 }
 0x202   : > { %v609_v6 = vmul.f32 %v593_v60, %v2469_v28  ;;  %v610_v7 = vmul.f32 %v594_v38, %v2472_v41  ;;  %v993_v13 = vpop.permute.xlu1 %992 }
 0x203   : > { %v1001_v19 = vsel %vm937_vm2, %v993_v13, 0 }
 0x204   : > { %v617_v34 = vadd.f32 %v609_v6, %v601_v63  ;;  %v618_v50 = vadd.f32 %v610_v7, %v602_v54  ;;  %1769 = vmatpush3.bf16.xpose.msra.mxu1 %v1001_v19 }
 0x205   : > { %1782 = vmatprep.subr.bf16.mxu1 %v2032_v61 }
 0x206   : > { %v543_v59 = vpop.permute.xlu1 %542  ;;  %v1047_v51 = vpop.permute.xlu0 %1046  ;;  %v920_v52 = vpack.c.bf16 %v618_v50, %v617_v34 }
 0x207   : > { %v1054_v12 = vsel %vm937_vm2, %v1047_v51, 0 }
 0x208   : > { %1775 = vmatpush3.bf16.xpose.msra.mxu0 %v1054_v12 }
 0x209   : > { %1776 = vmatprep.subr.bf16.mxu0 %v2032_v61 }
 0x20a   : > { %v1103_v40 = vpop.permute.xlu1 %1102 }
 0x20b   : > { %v1110_v21 = vsel %vm937_vm2, %v1103_v40, 0  ;;  %1771 = vmatmul.mubr.msk.bf16.vlgmr.msra.gmra.mrb[0].mxu1 %vm937_vm2, %v920_v52 }
 0x20c   : > { %1783 = vmatpush3.bf16.xpose.msra.mxu1 %v1110_v21  ;;  %1786 = vmatprep.mubr.msk.bf16.mxu1 %vm2035_vm1, %v2032_v61 }
 0x20d   : > { %1784 = vmatprep.subr.bf16.mxu1 %v2032_v61 }
 0x20e   : > { %v1929_v27 = vpop.permute.xlu1 %1928  ;;  %v1049_v5 = vpop.permute.xlu0 %1048 }
 0x20f   : > { %v1931_v33 = vunpack.i.h.bf16 %v1929_v27  ;;  %v1930_v39 = vunpack.i.l.bf16 %v1929_v27  ;;  %v1057_v20 = vsel %vm937_vm2, %v1049_v5, 0 }
 0x210   : > { %1777 = vmatpush3.bf16.xpose.msra.mxu0 %v1057_v20 }
 0x211   : > { %v595_v42 = vsel %vm590_vm0, %v543_v59, %v1930_v39  ;;  %v596_v4 = vsel %vm590_vm0, %v545_v37, %v1931_v33  ;;  %1790 = vmatprep.subr.bf16.mxu0 %v2032_v61  ;;  %v605_v37 = vmul.f32 %v2478_v8, %v2449_v18 }
 0x212   : > { %v611_v10 = vmul.f32 %v595_v42, %v2469_v28  ;;  %v612_v45 = vmul.f32 %v596_v4, %v2472_v41 }
 0x214   : > { %v619_v26 = vadd.f32 %v611_v10, %v603_v25  ;;  %v620_v11 = vadd.f32 %v612_v45, %v604_v62  ;;  %v1105_v48 = vpop.permute.xlu0 %1104 }
 0x215   : > { %v1113_v31 = vsel %vm937_vm2, %v1105_v48, 0 }
 0x216   : > { %v921_v49 = vpack.c.bf16 %v620_v11, %v619_v26  ;;  %1785 = vmatpush3.bf16.xpose.msra.mxu1 %v1113_v31 }
 0x217   : > { %1798 = vmatprep.subr.bf16.mxu1 %v2032_v61 }
 0x218   : > { %v547_v58 = vpop.permute.xlu1 %546  ;;  %1779 = vmatmul.mubr.msk.bf16.vlgmr.msra.gmra.mrb[4].mxu0 %vm937_vm2, %v921_v49  ;;  %v549_v57 = vpop.permute.xlu0 %548  ;;  %v1713_v49 = vcombine.low %v2116_v1, %v2124_v3  ;;  %v1719_v1 = vcombine.low %v2193_v23, %v2191_v22  ;;  %v1722_v3 = vcombine.low %v2211_v30, %v2209_v29 }
 0x219   : > { %1794 = vmatprep.mubr.msk.bf16.mxu0 %vm2035_vm1, %v2032_v61 }
 0x21c   : > { %v1934_v46 = vpop.permute.xlu1 %1933 }
 0x21d   : > { %v1936_v56 = vunpack.i.h.bf16 %v1934_v46  ;;  %v1935_v53 = vunpack.i.l.bf16 %v1934_v46  ;;  %v1716_v46 = vcombine.low %v2174_v15, %v2178_v17 }
 0x21f   : > { %v597_v32 = vsel %vm590_vm0, %v547_v58, %v1935_v53  ;;  %v598_v44 = vsel %vm590_vm0, %v549_v57, %v1936_v56  ;;  %v1714_v58 = vcombine.low %v2114_v0, %v2122_v2  ;;  %v1717_v56 = vcombine.low %v2172_v14, %v2176_v16 }
 0x220   : > { %v613_v60 = vmul.f32 %v597_v32, %v2469_v28  ;;  %v614_v38 = vmul.f32 %v598_v44, %v2472_v41 }
 0x222   : > { %v621_v54 = vadd.f32 %v613_v60, %v605_v37  ;;  %v622_v63 = vadd.f32 %v614_v38, %v606_v55 }
 0x224   : > { %v922_v6 = vpack.c.bf16 %v622_v63, %v621_v54 }
 0x226   : > { %1787 = vmatmul.mubr.msk.bf16.vlgmr.msra.gmra.mrb[4].mxu1 %vm937_vm2, %v922_v6 }
 0x227   : > { %1802 = vmatprep.mubr.msk.bf16.mxu1 %vm2035_vm1, %v2032_v61 }
 0x291   : > { %v981_v7 = vpop.f32.mrb[0].mxu0 }
 0x292   : > { %v1156_v13 = vmul.f32 0.35355338, %v981_v7  ;;  %v1764_v19 = vpop.f32.mrb[1].mxu0 }
 0x293   : > { %v984_v9 = vpop.f32.mrb[2].mxu0 }
 0x294   : > { %v1157_v24 = vmul.f32 0.35355338, %v984_v9  ;;  %v1165_v18 = vsel %vm1164_vm3, %v1156_v13, -inf  ;;  %v1765_v8 = vpop.f32.mrb[3].mxu0 }
 0x295   : > { %1166 = vmax.xlane.f32.xlu0 %v1165_v18 }
 0x296   : > { %v1168_v28 = vsel %vm1164_vm3, %v1157_v24, -inf }
 0x297   : > { %1169 = vmax.xlane.f32.xlu1 %v1168_v28 }
 0x2de   : > { %v1037_v41 = vpop.f32.mrb[0].mxu1 }
 0x2df   : > { %v1158_v34 = vmul.f32 0.35355338, %v1037_v41  ;;  %v1772_v50 = vpop.f32.mrb[1].mxu1 }
 0x2e0   : > { %v1040_v59 = vpop.f32.mrb[2].mxu1 }
 0x2e1   : > { %v1159_v51 = vmul.f32 0.35355338, %v1040_v59  ;;  %v1773_v52 = vpop.f32.mrb[3].mxu1  ;;  %v1171_v12 = vsel %vm1164_vm3, %v1158_v34, -inf }
 0x2e2   : > { %1172 = vmax.xlane.f32.xlu0 %v1171_v12 }
 0x2e3   : > { %v1174_v40 = vsel %vm1164_vm3, %v1159_v51, -inf }
 0x2e6   : > { %1175 = vmax.xlane.f32.xlu0 %v1174_v40 }
 0x2eb   : > { %v1093_v21 = vpop.f32.mrb[4].mxu0 }
 0x2ec   : > { %v1160_v27 = vmul.f32 0.35355338, %v1093_v21  ;;  %v1780_v5 = vpop.f32.mrb[5].mxu0 }
 0x2ed   : > { %v1096_v33 = vpop.f32.mrb[6].mxu0 }
 0x2ee   : > { %v1161_v39 = vmul.f32 0.35355338, %v1096_v33  ;;  %v1781_v20 = vpop.f32.mrb[7].mxu0  ;;  %v1177_v42 = vsel %vm1164_vm3, %v1160_v27, -inf }
 0x2ef   : > { %1178 = vmax.xlane.f32.xlu1 %v1177_v42 }
 0x2f0   : > { %v1180_v4 = vsel %vm1164_vm3, %v1161_v39, -inf }
 0x2f1   : > { %1181 = vmax.xlane.f32.xlu0 %v1180_v4  ;;  %v1723_v4 = vcombine.low %v2245_v43, %v2251_v47 }
 0x2f9   : > { %v1149_v62 = vpop.f32.mrb[4].mxu1 }
 0x2fa   : > { %v2542_v25 = vmul.f32 0.35355338, %v1149_v62  ;;  %v1788_v10 = vpop.f32.mrb[5].mxu1  ;;  %v1720_v62 = vcombine.low %v2226_v36, %v2224_v35 }
 0x2fb   : > { %v1152_v45 = vpop.f32.mrb[6].mxu1 }
 0x2fc   : > { %v2544_v26 = vmul.f32 0.35355338, %v1152_v45  ;;  %v1789_v11 = vpop.f32.mrb[7].mxu1  ;;  %v1183_v48 = vsel %vm1164_vm3, %v2542_v25, -inf }
 0x2fd   : > { %1184 = vmax.xlane.f32.xlu1 %v1183_v48 }
 0x2fe   : > { %v1186_v31 = vsel %vm1164_vm3, %v2544_v26, -inf }
 0x2ff   : > { %1187 = vmax.xlane.f32.xlu0 %v1186_v31 }
 0x30e   : > { %1263 = vrot.lane.b32.xlu1 %v1713_v49, %s2037_s21 }
 0x312   : > { %1265 = vrot.lane.b32.xlu1 %v1714_v58, %s2037_s21 }
 0x315   : > { %1319 = vrot.lane.b32.xlu0 %v1716_v46, %s2037_s21 }
 0x316   : > { %1321 = vrot.lane.b32.xlu1 %v1717_v56, %s2037_s21 }
 0x319   : > { %1375 = vrot.lane.b32.xlu0 %v1719_v1, %s2037_s21 }
 0x31a   : > { %1431 = vrot.lane.b32.xlu1 %v1722_v3, %s2037_s21 }
 0x322   : > { %v1167_v2 = vpop.xlane.xlu0 %1166 }
 0x323   : > { %v1189_v53 = vsub.f32 %v1156_v13, %v1167_v2 }
 0x324   : > { %v1170_v0 = vpop.xlane.xlu1 %1169 }
 0x325   : > { %v1190_v15 = vsub.f32 %v1157_v24, %v1170_v0  ;;  %v1197_v14 = vmul.f32 1.442695, %v1189_v53 }
 0x327   : > { %v1199_v17 = vmul.f32 1.442695, %v1190_v15 }
 0x329   : > { %1954 = vpow2.f32 %v1199_v17 }
 0x32a   : > { %1956 = vpow2.f32 %v1197_v14 }
 0x333   : > { %v2568_v16 = vpop.eup %1954 }
 0x334   : > { %v1216_v22 = vsel %vm1164_vm3, %v2568_v16, 0.0  ;;  %v2572_v23 = vpop.eup %1956 }
 0x335   : > { %v1213_v29 = vsel %vm1164_vm3, %v2572_v23, 0.0 }
 0x338   : > { %1217 = vadd.xlane.f32.xlu0 %v1216_v22 }
 0x33e   : > { %1214 = vadd.xlane.f32.xlu1 %v1213_v29 }
 0x36f   : > { %v1173_v30 = vpop.xlane.xlu0 %1172 }
 0x370   : > { %v1191_v57 = vsub.f32 %v1158_v34, %v1173_v30 }
 0x372   : > { %v1201_v32 = vmul.f32 1.442695, %v1191_v57 }
 0x373   : > { %v1176_v44 = vpop.xlane.xlu0 %1175 }
 0x374   : > { %1958 = vpow2.f32 %v1201_v32  ;;  %v1192_v55 = vsub.f32 %v1159_v51, %v1176_v44 }
 0x376   : > { %v1203_v37 = vmul.f32 1.442695, %v1192_v55 }
 0x378   : > { %1960 = vpow2.f32 %v1203_v37 }
 0x37c   : > { %v1179_v60 = vpop.xlane.xlu1 %1178 }
 0x37d   : > { %v1193_v38 = vsub.f32 %v1160_v27, %v1179_v60 }
 0x37e   : > { %v2576_v54 = vpop.eup %1958  ;;  %v1182_v63 = vpop.xlane.xlu0 %1181 }
 0x37f   : > { %v1205_v6 = vmul.f32 1.442695, %v1193_v38  ;;  %v1194_v7 = vsub.f32 %v1161_v39, %v1182_v63  ;;  %v1219_v13 = vsel %vm1164_vm3, %v2576_v54, 0.0 }
 0x380   : > { %1220 = vadd.xlane.f32.xlu1 %v1219_v13 }
 0x381   : > { %1962 = vpow2.f32 %v1205_v6  ;;  %v1207_v19 = vmul.f32 1.442695, %v1194_v7 }
 0x382   : > { %v2580_v9 = vpop.eup %1960 }
 0x383   : > { %1964 = vpow2.f32 %v1207_v19  ;;  %v1222_v24 = vsel %vm1164_vm3, %v2580_v9, 0.0 }
 0x384   : > { %1223 = vadd.xlane.f32.xlu0 %v1222_v24 }
 0x38a   : > { %v1185_v18 = vpop.xlane.xlu1 %1184 }
 0x38b   : > { %v2584_v8 = vpop.eup %1962  ;;  %v1195_v28 = vsub.f32 %v2542_v25, %v1185_v18 }
 0x38c   : > { %v1188_v41 = vpop.xlane.xlu0 %1187  ;;  %v1225_v34 = vsel %vm1164_vm3, %v2584_v8, 0.0 }
 0x38d   : > { %v2589_v50 = vpop.eup %1964  ;;  %v1209_v59 = vmul.f32 1.442695, %v1195_v28  ;;  %v1196_v51 = vsub.f32 %v2544_v26, %v1188_v41  ;;  %1226 = vadd.xlane.f32.xlu1 %v1225_v34 }
 0x38e   : > { %v1264_v52 = vpop.permute.xlu1 %1263  ;;  %v1228_v12 = vsel %vm1164_vm3, %v2589_v50, 0.0 }
 0x38f   : > { %1966 = vpow2.f32 %v1209_v59  ;;  %v1211_v40 = vmul.f32 1.442695, %v1196_v51  ;;  %1229 = vadd.xlane.f32.xlu0 %v1228_v12  ;;  %1791 = vmatpush3.bf16.msra.mxu0 %v1264_v52 }
 0x390   : > { %v1320_v21 = vpop.permute.xlu0 %1319  ;;  %1792 = vmatprep.subr.bf16.mxu0 %v2032_v61 }
 0x391   : > { %1968 = vpow2.f32 %v1211_v40  ;;  %1799 = vmatpush3.bf16.msra.mxu1 %v1320_v21 }
 0x392   : > { %v1266_v27 = vpop.permute.xlu1 %1265  ;;  %1800 = vmatprep.subr.bf16.mxu1 %v2032_v61 }
 0x393   : > { %1793 = vmatpush3.bf16.msra.mxu0 %v1266_v27 }
 0x394   : > { %1806 = vmatprep.subr.bf16.mxu0 %v2032_v61  ;;  %v1376_v25 = vpop.permute.xlu0 %1375 }
 0x396   : > { %v1322_v5 = vpop.permute.xlu1 %1321 }
 0x397   : > { %1801 = vmatpush3.bf16.msra.mxu1 %v1322_v5 }
 0x398   : > { %1814 = vmatprep.subr.bf16.mxu1 %v2032_v61 }
 0x399   : > { %v1967_v33 = vpop.eup %1966 }
 0x39a   : > { %v1231_v39 = vsel %vm1164_vm3, %v1967_v33, 0.0  ;;  %v1432_v10 = vpop.permute.xlu1 %1431 }
 0x39b   : > { %v1969_v20 = vpop.eup %1968  ;;  %1232 = vadd.xlane.f32.xlu1 %v1231_v39 }
 0x39c   : > { %v1234_v42 = vsel %vm1164_vm3, %v1969_v20, 0.0 }
 0x39d   : > { %1235 = vadd.xlane.f32.xlu0 %v1234_v42 }
 0x3ac   : > { %1433 = vrot.lane.b32.xlu1 %v1723_v4, %s2037_s21 }
 0x3b3   : > { %1377 = vrot.lane.b32.xlu0 %v1720_v62, %s2037_s21 }
 0x3c5   : > { %v1218_v45 = vpop.xlane.xlu0 %1217 }
 0x3c6   : > { %1970 = vrcp.f32 %v1218_v45 }
 0x3cb   : > { %v1215_v26 = vpop.xlane.xlu1 %1214 }
 0x3cc   : > { %1972 = vrcp.f32 %v1215_v26 }
 0x3d0   : > { %v1971_v11 = vpop.eup %1970 }
 0x3d1   : > { %v1240_v31 = vmul.f32 %v1971_v11, %v2568_v16 }
 0x3d6   : > { %v1973_v48 = vpop.eup %1972 }
 0x3d7   : > { %v1238_v49 = vmul.f32 %v1973_v48, %v2572_v23 }
 0x3d9   : > { %v1253_v43 = vpack.c.bf16 %v1240_v31, %v1238_v49 }
 0x3db   : > { %1795 = vmatmul.mubr.msk.bf16.vlgmr.msra.gmra.mrb[8].mxu0 %vm1164_vm3, %v1253_v43 }
 0x3dc   : > { %1807 = vmatpush3.bf16.msra.mxu0 %v1376_v25  ;;  %1810 = vmatprep.mubr.msk.bf16.mxu0 %vm2035_vm1, %v2032_v61 }
 0x3dd   : > { %1808 = vmatprep.subr.bf16.mxu0 %v2032_v61 }
 0x40d   : > { %v1221_v35 = vpop.xlane.xlu1 %1220 }
 0x40e   : > { %1974 = vrcp.f32 %v1221_v35 }
 0x411   : > { %v1224_v36 = vpop.xlane.xlu0 %1223 }
 0x412   : > { %1976 = vrcp.f32 %v1224_v36 }
 0x418   : > { %v1975_v47 = vpop.eup %1974 }
 0x419   : > { %v1242_v56 = vmul.f32 %v1975_v47, %v2576_v54 }
 0x41a   : > { %v1227_v3 = vpop.xlane.xlu1 %1226 }
 0x41c   : > { %v1977_v58 = vpop.eup %1976  ;;  %v1230_v46 = vpop.xlane.xlu0 %1229 }
 0x41d   : > { %v1244_v1 = vmul.f32 %v1977_v58, %v2580_v9  ;;  %1978 = vrcp.f32 %v1230_v46 }
 0x41e   : > { %1980 = vrcp.f32 %v1227_v3 }
 0x41f   : > { %v1254_v0 = vpack.c.bf16 %v1244_v1, %v1242_v56 }
 0x421   : > { %1803 = vmatmul.mubr.msk.bf16.vlgmr.msra.gmra.mrb[8].mxu1 %vm1164_vm3, %v1254_v0 }
 0x422   : > { %1815 = vmatpush3.bf16.msra.mxu1 %v1432_v10  ;;  %1818 = vmatprep.mubr.msk.bf16.mxu1 %vm2035_vm1, %v2032_v61 }
 0x423   : > { %1816 = vmatprep.subr.bf16.mxu1 %v2032_v61 }
 0x427   : > { %v1979_v15 = vpop.eup %1978 }
 0x428   : > { %v1233_v2 = vpop.xlane.xlu1 %1232  ;;  %v1981_v53 = vpop.eup %1980  ;;  %v1248_v14 = vmul.f32 %v1979_v15, %v2589_v50 }
 0x429   : > { %1982 = vrcp.f32 %v1233_v2  ;;  %v1246_v22 = vmul.f32 %v1981_v53, %v2584_v8 }
 0x42a   : > { %v1236_v17 = vpop.xlane.xlu0 %1235 }
 0x42b   : > { %1984 = vrcp.f32 %v1236_v17  ;;  %v1255_v29 = vpack.c.bf16 %v1248_v14, %v1246_v22 }
 0x42c   : > { %v1434_v16 = vpop.permute.xlu1 %1433 }
 0x42d   : > { %1817 = vmatpush3.bf16.msra.mxu1 %v1434_v16 }
 0x42e   : > { %v1378_v23 = vpop.permute.xlu0 %1377 }
 0x42f   : > { %1809 = vmatpush3.bf16.msra.mxu0 %v1378_v23 }
 0x432   : > { %1811 = vmatmul.mubr.msk.bf16.vlgmr.msra.gmra.mrb[12].mxu0 %vm1164_vm3, %v1255_v29 }
 0x433   : > { %v1983_v30 = vpop.eup %1982 }
 0x434   : > { %v1250_v61 = vmul.f32 %v1983_v30, %v1967_v33 }
 0x435   : > { %v1985_v57 = vpop.eup %1984 }
 0x436   : > { %v1252_v32 = vmul.f32 %v1985_v57, %v1969_v20 }
 0x438   : > { %v1256_v44 = vpack.c.bf16 %v1252_v32, %v1250_v61 }
 0x43a   : > { %1819 = vmatmul.mubr.msk.bf16.vlgmr.msra.gmra.mrb[12].mxu1 %vm1164_vm3, %v1256_v44 }
 0x4ae   : > { %v1306_v55 = vpop.f32.mrb[8].mxu0 }
 0x4af   : > { %v1796_v37 = vpop.f32.mrb[9].mxu0 }
 0x4b0   : > { %v1309_v60 = vpop.f32.mrb[10].mxu0 }
 0x4b1   : > { %v1797_v38 = vpop.f32.mrb[11].mxu0 }
 0x4f4   : > { %v1362_v54 = vpop.f32.mrb[8].mxu1 }
 0x4f5   : > { %v1804_v63 = vpop.f32.mrb[9].mxu1 }
 0x4f6   : > { %v1365_v6 = vpop.f32.mrb[10].mxu1 }
 0x4f7   : > { %v1937_v7 = vpack.i.bf16 %v1365_v6, %v1362_v54  ;;  %v1805_v13 = vpop.f32.mrb[11].mxu1 }
 0x4f9   : > { %1938 = vrot.lane.b32.xlu0 %v1937_v7, %s2038_s22 }
 0x505   : > { %v1418_v19 = vpop.f32.mrb[12].mxu0 }
 0x506   : > { %v1812_v9 = vpop.f32.mrb[13].mxu0 }
 0x507   : > { %v1421_v24 = vpop.f32.mrb[14].mxu0 }
 0x508   : > { %v1942_v18 = vpack.i.bf16 %v1421_v24, %v1418_v19  ;;  %v1813_v8 = vpop.f32.mrb[15].mxu0 }
 0x50a   : > { %1943 = vrot.lane.b32.xlu1 %v1942_v18, %s2039_s28 }
 0x50d   : > { %v1474_v28 = vpop.f32.mrb[12].mxu1 }
 0x50e   : > { %v1820_v41 = vpop.f32.mrb[13].mxu1 }
 0x50f   : > { %v1477_v34 = vpop.f32.mrb[14].mxu1 }
 0x510   : > { %v1947_v50 = vpack.i.bf16 %v1477_v34, %v1474_v28  ;;  %v1821_v59 = vpop.f32.mrb[15].mxu1 }
 0x512   : > { %1948 = vrot.lane.b32.xlu0 %v1947_v50, %s2040_s29 }
 0x56b   : > { %v1939_v51 = vpop.permute.xlu0 %1938 }
 0x56c   : > { %v1941_v12 = vunpack.i.h.bf16 %v1939_v51  ;;  %v1940_v40 = vunpack.i.l.bf16 %v1939_v51 }
 0x56e   : > { %v1505_v33 = vsel %vm937_vm2, %v1306_v55, %v1940_v40  ;;  %v1506_v39 = vsel %vm937_vm2, %v1309_v60, %v1941_v12 }
 0x57c   : > { %v1944_v52 = vpop.permute.xlu1 %1943 }
 0x57d   : > { %v1946_v21 = vunpack.i.h.bf16 %v1944_v52  ;;  %v1945_v27 = vunpack.i.l.bf16 %v1944_v52 }
 0x57f   : > { %v1509_v4 = vsel %vm1507_vm4, %v1506_v39, %v1946_v21  ;;  %v1508_v62 = vsel %vm1507_vm4, %v1505_v33, %v1945_v27 }
 0x584   : > { %v1949_v5 = vpop.permute.xlu0 %1948 }
 0x585   : > { %v1951_v20 = vunpack.i.h.bf16 %v1949_v5  ;;  %v1950_v42 = vunpack.i.l.bf16 %v1949_v5 }
 0x587   : > { %v1511_v25 = vsel %vm1510_vm5, %v1508_v62, %v1950_v42  ;;  %v1512_v10 = vsel %vm1510_vm5, %v1509_v4, %v1951_v20 }
 0x588   : > { %v1732_v45 = vpack.c.bf16 %v1511_v25, %v1511_v25  ;;  %v1733_v26 = vpack.c.bf16 %v1512_v10, %v1512_v10 }
 0x58a   : > { %1522 = vst.msk [vmem:[%s421_s11] sm:$0xf] %vm1521_vm6, %v1732_v45  ;;  %1523 = vst.msk [vmem:[%s421_s11 + $0x4] sm:$0xf] %vm1521_vm6, %v1733_v26 }
 0x58b PF: > { %s16_s25 = sadd.s32 1, %s2024_s25   ;;  %s2651_s21 = smov %s2016_s23 }
 0x58c   : > { %p13_p7 = scmp.ge.s32.totalorder %s16_s25, 6   ;;  %s2652_s22 = smov %s2020_s24 }
 0x58d   : > { %s2653_s23 = smov %s2656_s26  ;;  %s2654_s24 = smov %s2660_s27 }
 0x58e   :  { %15 = sbr.rel (!%p13_p7) target bundleno = 3 (0x3), region = 89 }

</bundles_post_ra>
